<compile_context>
chip_gen: v7x
topology: tpu7x:2x2x1
jax: 0.10.0
libtpu: 0.0.40
codegen_flags: <defaults>
</compile_context>

<pallas_src>
import functools

import jax
import jax.numpy as jnp
from jax.experimental import pallas as pl
from jax.experimental.pallas import tpu as pltpu


# ---------------------------------------------------------------------------
# Static architecture description (ResNet14-CIFAR): (in_planes, planes, stride)
# ---------------------------------------------------------------------------
ARCH = (
    ("layer1", ((16, 16, 1), (16, 16, 1))),
    ("layer2", ((16, 32, 2), (32, 32, 1))),
    ("layer3", ((32, 64, 2), (64, 64, 1))),
)


def _round_up(x, m):
    return ((x + m - 1) // m) * m


# ---------------------------------------------------------------------------
# Fused Pallas matmul kernels (conv-as-matmul hot path)
#   out = relu?( (x @ w) + bias [+ res] )
# BN scale is pre-folded into w, so the epilogue is a single VPU add (+max).
# ---------------------------------------------------------------------------
def _mm_bias_kernel(x_ref, w_ref, b_ref, o_ref, *, relu):
    y = jnp.dot(x_ref[...], w_ref[...], preferred_element_type=jnp.float32)
    y = y + b_ref[...]
    if relu:
        y = jnp.maximum(y, 0.0)
    o_ref[...] = y.astype(o_ref.dtype)


def _mm_bias_res_kernel(x_ref, w_ref, b_ref, r_ref, o_ref, *, relu):
    y = jnp.dot(x_ref[...], w_ref[...], preferred_element_type=jnp.float32)
    y = y + b_ref[...] + r_ref[...]
    if relu:
        y = jnp.maximum(y, 0.0)
    o_ref[...] = y.astype(o_ref.dtype)


def fused_matmul(x, w, bias, res=None, *, relu=True):
    """x:(M,K) w:(K,N) bias:(1,N) res:None|(M,N) -> (M,N) float32.

    x / w are cast to bf16 for the MXU; accumulation and epilogue are f32.
    """
    M, K = x.shape
    N = w.shape[1]
    TM = min(128, _round_up(M, 8))          # size the row tile to the real M
    Mp = _round_up(M, TM)

    xb = jnp.pad(x, ((0, Mp - M), (0, 0))).astype(jnp.bfloat16)
    wb = w.astype(jnp.bfloat16)

    in_specs = [
        pl.BlockSpec((TM, K), lambda i: (i, 0)),
        pl.BlockSpec((K, N), lambda i: (0, 0)),
        pl.BlockSpec((1, N), lambda i: (0, 0)),
    ]
    args = [xb, wb, bias]
    if res is None:
        kernel = functools.partial(_mm_bias_kernel, relu=relu)
    else:
        rp = jnp.pad(res, ((0, Mp - M), (0, 0)))
        in_specs.append(pl.BlockSpec((TM, N), lambda i: (i, 0)))
        args.append(rp)
        kernel = functools.partial(_mm_bias_res_kernel, relu=relu)

    out = pl.pallas_call(
        kernel,
        out_shape=jax.ShapeDtypeStruct((Mp, N), jnp.float32),
        grid=(Mp // TM,),
        in_specs=in_specs,
        out_specs=pl.BlockSpec((TM, N), lambda i: (i, 0)),
        compiler_params=pltpu.CompilerParams(
            dimension_semantics=("parallel",),
            vmem_limit_bytes=32 * 1024 * 1024,
        ),
    )(*args)
    return out[:M] if Mp != M else out


# ---------------------------------------------------------------------------
# Fused head kernel: backbone fc + projection MLP + L2 normalize, one call.
# ---------------------------------------------------------------------------
def _head_kernel(h_ref, fcw_ref, fcb_ref, w1_ref, b1_ref, w2_ref, b2_ref, o_ref):
    # backbone fc (no activation)
    h = jnp.dot(h_ref[...], fcw_ref[...],
                preferred_element_type=jnp.float32) + fcb_ref[...]
    # projection layer 1 + ReLU
    z = jnp.dot(h, w1_ref[...], preferred_element_type=jnp.float32) + b1_ref[...]
    z = jnp.maximum(z, 0.0)
    # projection layer 2 + ReLU
    z = jnp.dot(z, w2_ref[...], preferred_element_type=jnp.float32) + b2_ref[...]
    z = jnp.maximum(z, 0.0)
    # F.normalize(dim=1): rsqrt (EUP) instead of sqrt + divide.
    # NOTE: only correct because the feature dim is a single unblocked tile.
    ss = jnp.sum(z * z, axis=-1, keepdims=True)
    o_ref[...] = (z * jax.lax.rsqrt(jnp.maximum(ss, 1e-24))).astype(o_ref.dtype)


def projection_head(h, params):
    """Fused fc + projection MLP + L2 normalize (single pallas_call)."""
    B = h.shape[0]
    Bp = _round_up(max(B, 8), 8)
    hp = jnp.pad(h, ((0, Bp - B), (0, 0)))   # zero rows normalize to 0, sliced off
    proj_dim = params["p2_w"].shape[1]
    z = pl.pallas_call(
        _head_kernel,
        out_shape=jax.ShapeDtypeStruct((Bp, proj_dim), jnp.float32),
    )(hp, params["fc_w"], params["fc_b"],
      params["p1_w"], params["p1_b"],
      params["p2_w"], params["p2_b"])
    return z[:B]


# ---------------------------------------------------------------------------
# Glue: im2col for 3x3 conv, pad=1, static stride (NHWC)
# ---------------------------------------------------------------------------
def im2col_3x3(x, stride):
    N, H, W, C = x.shape
    Ho = (H + 2 - 3) // stride + 1
    Wo = (W + 2 - 3) // stride + 1
    xp = jnp.pad(x, ((0, 0), (1, 1), (1, 1), (0, 0)))
    cols = []
    for dh in range(3):
        for dw in range(3):
            sl = xp[:, dh:dh + (Ho - 1) * stride + 1:stride,
                    dw:dw + (Wo - 1) * stride + 1:stride, :]
            cols.append(sl)
    patches = jnp.concatenate(cols, axis=-1)   # (N,Ho,Wo,9C), (kh,kw,cin) order
    return patches.reshape(N * Ho * Wo, 9 * C), (N, Ho, Wo)


def conv_bn(x, w_mat, bias, *, stride, residual=None, relu=True):
    """3x3 conv (pad=1) + folded BN (+ optional residual) + optional ReLU."""
    patches, (N, Ho, Wo) = im2col_3x3(x, stride)
    Cout = w_mat.shape[1]
    res = None if residual is None else residual.reshape(N * Ho * Wo, Cout)
    y = fused_matmul(patches, w_mat, bias, res, relu=relu)
    return y.reshape(N, Ho, Wo, Cout)


def shortcut_option_a(x, planes):
    """Option-A shortcut: ::2 spatial subsample + zero-pad planes//4 channels each side."""
    x = x[:, ::2, ::2, :]
    p4 = planes // 4
    return jnp.pad(x, ((0, 0), (0, 0), (0, 0), (p4, p4)))


# ---------------------------------------------------------------------------
# Parameter init (deterministic; Kaiming-normal conv/linear, eval-mode BN
# folded into the conv weights + a per-channel bias).
# ---------------------------------------------------------------------------
def _bn_fold(gamma, beta, mean, var, eps=1e-5):
    scale = gamma / jnp.sqrt(var + eps)
    bias = beta - mean * scale
    return scale, bias


def init_params(key, in_ch, out_ch, proj_dim):
    keys = iter(jax.random.split(key, 128))

    def conv_bn_p(cin, cout):
        std = (2.0 / (cin * 9)) ** 0.5
        w = jax.random.normal(next(keys), (3, 3, cin, cout), jnp.float32) * std
        w = w.reshape(9 * cin, cout)           # matches im2col (kh,kw,cin) order
        gamma = 1.0 + 0.1 * jax.random.normal(next(keys), (cout,), jnp.float32)
        beta = 0.1 * jax.random.normal(next(keys), (cout,), jnp.float32)
        mean = 0.1 * jax.random.normal(next(keys), (cout,), jnp.float32)
        var = 1.0 + 0.1 * jnp.abs(jax.random.normal(next(keys), (cout,), jnp.float32))
        scale, bias = _bn_fold(gamma, beta, mean, var)
        return w * scale[None, :], bias.reshape(1, cout)   # BN scale folded into w

    def lin(cin, cout):
        std = (2.0 / cin) ** 0.5
        w = jax.random.normal(next(keys), (cin, cout), jnp.float32) * std
        b = 0.05 * jax.random.normal(next(keys), (cout,), jnp.float32)
        return w, b.reshape(1, cout)

    p = {}
    p["stem_w"], p["stem_b"] = conv_bn_p(in_ch, 16)
    for layer_name, blocks in ARCH:
        lst = []
        for (cin, planes, _stride) in blocks:
            w1, b1 = conv_bn_p(cin, planes)
            w2, b2 = conv_bn_p(planes, planes)
            lst.append(dict(w1=w1, b1=b1, w2=w2, b2=b2))
        p[layer_name] = lst
    p["fc_w"], p["fc_b"] = lin(64, out_ch)
    p["p1_w"], p["p1_b"] = lin(out_ch, proj_dim)
    p["p2_w"], p["p2_b"] = lin(proj_dim, proj_dim)
    return p


# ---------------------------------------------------------------------------
# Forward pass (== SimCLR.forward)
# ---------------------------------------------------------------------------
def basic_block(x, bp, in_planes, planes, stride):
    out = conv_bn(x, bp["w1"], bp["b1"], stride=stride, relu=True)
    if stride != 1 or in_planes != planes:
        sc = shortcut_option_a(x, planes)
    else:
        sc = x
    # conv2 + folded bn2 + residual add + ReLU fused in one Pallas call.
    out = conv_bn(out, bp["w2"], bp["b2"], stride=1, residual=sc, relu=True)
    return out


def simclr_forward(x_nchw, params):
    x = jnp.transpose(x_nchw, (0, 2, 3, 1)).astype(jnp.float32)   # NCHW -> NHWC
    x = conv_bn(x, params["stem_w"], params["stem_b"], stride=1, relu=True)
    for layer_name, blocks in ARCH:
        for bp, (cin, planes, stride) in zip(params[layer_name], blocks):
            x = basic_block(x, bp, cin, planes, stride)
    h = jnp.mean(x, axis=(1, 2))                                   # global avg pool
    return projection_head(h, params)            # fc + proj MLP + F.normalize


# ---------------------------------------------------------------------------
if __name__ == "__main__":
    B, C, H, W = 2, 3, 16, 16
    OUT_CH, PROJ_DIM = 32, 16

    key = jax.random.PRNGKey(0)
    k_x, k_p = jax.random.split(key)
    x = jax.random.normal(k_x, (B, C, H, W), jnp.float32)
    params = init_params(k_p, C, OUT_CH, PROJ_DIM)

    fwd = jax.jit(simclr_forward)
    z = fwd(x, params)
    jax.block_until_ready(z)

    assert z.shape == (B, PROJ_DIM)
    assert bool(jnp.all(jnp.isfinite(z)))
    norms = jnp.linalg.norm(z, axis=1)
    # Rows are unit-norm (or exactly zero if a row dies under the double ReLU).
    assert bool(jnp.all((jnp.abs(norms - 1.0) < 1e-2) | (norms < 1e-6)))
    print("KERNEL_OK")
</pallas_src>

<mosaic_0001>
module attributes {stable_mosaic.version = 11 : i64} {
  func.func @_mm_bias_kernel(%arg0: i32, %arg1: memref<128x27xbf16, #tpu.memory_space<vmem>>, %arg2: memref<27x16xbf16, #tpu.memory_space<vmem>>, %arg3: memref<1x16xf32, #tpu.memory_space<vmem>>, %arg4: memref<128x16xf32, #tpu.memory_space<vmem>>) attributes {dimension_semantics = [#tpu.dimension_semantics<parallel>], iteration_bounds = array<i64: 4>, scalar_prefetch = 0 : i64, scratch_operands = 0 : i64, tpu.core_type = #tpu.core_type<tc>, window_params = [{transform_indices = @transform_0, window_bounds = array<i64: 128, 27>}, {pipeline_mode = #tpu.pipeline_mode<synchronous>, transform_indices = @transform_1, window_bounds = array<i64: 27, 16>}, {pipeline_mode = #tpu.pipeline_mode<synchronous>, transform_indices = @transform_2, window_bounds = array<i64: 1, 16>}, {transform_indices = @transform_3, window_bounds = array<i64: 128, 16>}]} {
    %c0 = arith.constant 0 : index
    %c0_0 = arith.constant 0 : index
    %0 = vector.load %arg1[%c0, %c0_0] : memref<128x27xbf16, #tpu.memory_space<vmem>>, vector<128x27xbf16>
    %c0_1 = arith.constant 0 : index
    %c0_2 = arith.constant 0 : index
    %1 = vector.load %arg2[%c0_1, %c0_2] : memref<27x16xbf16, #tpu.memory_space<vmem>>, vector<27x16xbf16>
    %cst = arith.constant dense<0.000000e+00> : vector<128x16xf32>
    %2 = tpu.matmul %0, %1, %cst {dimension_numbers = #tpu.dot_dimension_numbers<[1], [0], [0], [1], [0, 0, 1, 1], [], []>} : vector<128x27xbf16>, vector<27x16xbf16>, vector<128x16xf32> -> vector<128x16xf32>
    %c0_3 = arith.constant 0 : index
    %c0_4 = arith.constant 0 : index
    %3 = vector.load %arg3[%c0_3, %c0_4] : memref<1x16xf32, #tpu.memory_space<vmem>>, vector<1x16xf32>
    %4 = vector.broadcast %3 : vector<1x16xf32> to vector<128x16xf32>
    %5 = arith.addf %2, %4 : vector<128x16xf32>
    %cst_5 = arith.constant 0.000000e+00 : f32
    %6 = vector.broadcast %cst_5 : f32 to vector<128x16xf32>
    %7 = arith.maximumf %5, %6 : vector<128x16xf32>
    %c0_6 = arith.constant 0 : index
    %c0_7 = arith.constant 0 : index
    %8 = vector.load %arg4[%c0_6, %c0_7] : memref<128x16xf32, #tpu.memory_space<vmem>>, vector<128x16xf32>
    tpu.vector_store %arg4[%c0_6, %c0_7], %7 {strides = array<i32>} : memref<128x16xf32, #tpu.memory_space<vmem>>, vector<128x16xf32>,
    return
  }
  func.func @transform_0(%arg0: i32) -> (i32, i32) {
    %c0_i32 = arith.constant 0 : i32
    %c0_i32_0 = arith.constant 0 : i32
    return %arg0, %c0_i32 : i32, i32
  }
  func.func @transform_1(%arg0: i32) -> (i32, i32) {
    %c0_i32 = arith.constant 0 : i32
    %c0_i32_0 = arith.constant 0 : i32
    %c0_i32_1 = arith.constant 0 : i32
    return %c0_i32, %c0_i32_0 : i32, i32
  }
  func.func @transform_2(%arg0: i32) -> (i32, i32) {
    %c0_i32 = arith.constant 0 : i32
    %c0_i32_0 = arith.constant 0 : i32
    %c0_i32_1 = arith.constant 0 : i32
    return %c0_i32, %c0_i32_0 : i32, i32
  }
  func.func @transform_3(%arg0: i32) -> (i32, i32) {
    %c0_i32 = arith.constant 0 : i32
    %c0_i32_0 = arith.constant 0 : i32
    return %arg0, %c0_i32 : i32, i32
  }
}

module attributes {stable_mosaic.version = 11 : i64} {
  func.func @_mm_bias_kernel(%arg0: i32, %arg1: memref<128x144xbf16, #tpu.memory_space<vmem>>, %arg2: memref<144x16xbf16, #tpu.memory_space<vmem>>, %arg3: memref<1x16xf32, #tpu.memory_space<vmem>>, %arg4: memref<128x16xf32, #tpu.memory_space<vmem>>) attributes {dimension_semantics = [#tpu.dimension_semantics<parallel>], iteration_bounds = array<i64: 4>, scalar_prefetch = 0 : i64, scratch_operands = 0 : i64, tpu.core_type = #tpu.core_type<tc>, window_params = [{transform_indices = @transform_0, window_bounds = array<i64: 128, 144>}, {pipeline_mode = #tpu.pipeline_mode<synchronous>, transform_indices = @transform_1, window_bounds = array<i64: 144, 16>}, {pipeline_mode = #tpu.pipeline_mode<synchronous>, transform_indices = @transform_2, window_bounds = array<i64: 1, 16>}, {transform_indices = @transform_3, window_bounds = array<i64: 128, 16>}]} {
    %c0 = arith.constant 0 : index
    %c0_0 = arith.constant 0 : index
    %0 = vector.load %arg1[%c0, %c0_0] : memref<128x144xbf16, #tpu.memory_space<vmem>>, vector<128x144xbf16>
    %c0_1 = arith.constant 0 : index
    %c0_2 = arith.constant 0 : index
    %1 = vector.load %arg2[%c0_1, %c0_2] : memref<144x16xbf16, #tpu.memory_space<vmem>>, vector<144x16xbf16>
    %cst = arith.constant dense<0.000000e+00> : vector<128x16xf32>
    %2 = tpu.matmul %0, %1, %cst {dimension_numbers = #tpu.dot_dimension_numbers<[1], [0], [0], [1], [0, 0, 1, 1], [], []>} : vector<128x144xbf16>, vector<144x16xbf16>, vector<128x16xf32> -> vector<128x16xf32>
    %c0_3 = arith.constant 0 : index
    %c0_4 = arith.constant 0 : index
    %3 = vector.load %arg3[%c0_3, %c0_4] : memref<1x16xf32, #tpu.memory_space<vmem>>, vector<1x16xf32>
    %4 = vector.broadcast %3 : vector<1x16xf32> to vector<128x16xf32>
    %5 = arith.addf %2, %4 : vector<128x16xf32>
    %cst_5 = arith.constant 0.000000e+00 : f32
    %6 = vector.broadcast %cst_5 : f32 to vector<128x16xf32>
    %7 = arith.maximumf %5, %6 : vector<128x16xf32>
    %c0_6 = arith.constant 0 : index
    %c0_7 = arith.constant 0 : index
    %8 = vector.load %arg4[%c0_6, %c0_7] : memref<128x16xf32, #tpu.memory_space<vmem>>, vector<128x16xf32>
    tpu.vector_store %arg4[%c0_6, %c0_7], %7 {strides = array<i32>} : memref<128x16xf32, #tpu.memory_space<vmem>>, vector<128x16xf32>,
    return
  }
  func.func @transform_0(%arg0: i32) -> (i32, i32) {
    %c0_i32 = arith.constant 0 : i32
    %c0_i32_0 = arith.constant 0 : i32
    return %arg0, %c0_i32 : i32, i32
  }
  func.func @transform_1(%arg0: i32) -> (i32, i32) {
    %c0_i32 = arith.constant 0 : i32
    %c0_i32_0 = arith.constant 0 : i32
    %c0_i32_1 = arith.constant 0 : i32
    return %c0_i32, %c0_i32_0 : i32, i32
  }
  func.func @transform_2(%arg0: i32) -> (i32, i32) {
    %c0_i32 = arith.constant 0 : i32
    %c0_i32_0 = arith.constant 0 : i32
    %c0_i32_1 = arith.constant 0 : i32
    return %c0_i32, %c0_i32_0 : i32, i32
  }
  func.func @transform_3(%arg0: i32) -> (i32, i32) {
    %c0_i32 = arith.constant 0 : i32
    %c0_i32_0 = arith.constant 0 : i32
    return %arg0, %c0_i32 : i32, i32
  }
}

module attributes {stable_mosaic.version = 11 : i64} {
  func.func @_mm_bias_res_kernel(%arg0: i32, %arg1: memref<128x144xbf16, #tpu.memory_space<vmem>>, %arg2: memref<144x16xbf16, #tpu.memory_space<vmem>>, %arg3: memref<1x16xf32, #tpu.memory_space<vmem>>, %arg4: memref<128x16xf32, #tpu.memory_space<vmem>>, %arg5: memref<128x16xf32, #tpu.memory_space<vmem>>) attributes {dimension_semantics = [#tpu.dimension_semantics<parallel>], iteration_bounds = array<i64: 4>, scalar_prefetch = 0 : i64, scratch_operands = 0 : i64, tpu.core_type = #tpu.core_type<tc>, window_params = [{transform_indices = @transform_0, window_bounds = array<i64: 128, 144>}, {pipeline_mode = #tpu.pipeline_mode<synchronous>, transform_indices = @transform_1, window_bounds = array<i64: 144, 16>}, {pipeline_mode = #tpu.pipeline_mode<synchronous>, transform_indices = @transform_2, window_bounds = array<i64: 1, 16>}, {transform_indices = @transform_3, window_bounds = array<i64: 128, 16>}, {transform_indices = @transform_4, window_bounds = array<i64: 128, 16>}]} {
    %c0 = arith.constant 0 : index
    %c0_0 = arith.constant 0 : index
    %0 = vector.load %arg1[%c0, %c0_0] : memref<128x144xbf16, #tpu.memory_space<vmem>>, vector<128x144xbf16>
    %c0_1 = arith.constant 0 : index
    %c0_2 = arith.constant 0 : index
    %1 = vector.load %arg2[%c0_1, %c0_2] : memref<144x16xbf16, #tpu.memory_space<vmem>>, vector<144x16xbf16>
    %cst = arith.constant dense<0.000000e+00> : vector<128x16xf32>
    %2 = tpu.matmul %0, %1, %cst {dimension_numbers = #tpu.dot_dimension_numbers<[1], [0], [0], [1], [0, 0, 1, 1], [], []>} : vector<128x144xbf16>, vector<144x16xbf16>, vector<128x16xf32> -> vector<128x16xf32>
    %c0_3 = arith.constant 0 : index
    %c0_4 = arith.constant 0 : index
    %3 = vector.load %arg3[%c0_3, %c0_4] : memref<1x16xf32, #tpu.memory_space<vmem>>, vector<1x16xf32>
    %4 = vector.broadcast %3 : vector<1x16xf32> to vector<128x16xf32>
    %5 = arith.addf %2, %4 : vector<128x16xf32>
    %c0_5 = arith.constant 0 : index
    %c0_6 = arith.constant 0 : index
    %6 = vector.load %arg4[%c0_5, %c0_6] : memref<128x16xf32, #tpu.memory_space<vmem>>, vector<128x16xf32>
    %7 = arith.addf %5, %6 : vector<128x16xf32>
    %cst_7 = arith.constant 0.000000e+00 : f32
    %8 = vector.broadcast %cst_7 : f32 to vector<128x16xf32>
    %9 = arith.maximumf %7, %8 : vector<128x16xf32>
    %c0_8 = arith.constant 0 : index
    %c0_9 = arith.constant 0 : index
    %10 = vector.load %arg5[%c0_8, %c0_9] : memref<128x16xf32, #tpu.memory_space<vmem>>, vector<128x16xf32>
    tpu.vector_store %arg5[%c0_8, %c0_9], %9 {strides = array<i32>} : memref<128x16xf32, #tpu.memory_space<vmem>>, vector<128x16xf32>,
    return
  }
  func.func @transform_0(%arg0: i32) -> (i32, i32) {
    %c0_i32 = arith.constant 0 : i32
    %c0_i32_0 = arith.constant 0 : i32
    return %arg0, %c0_i32 : i32, i32
  }
  func.func @transform_1(%arg0: i32) -> (i32, i32) {
    %c0_i32 = arith.constant 0 : i32
    %c0_i32_0 = arith.constant 0 : i32
    %c0_i32_1 = arith.constant 0 : i32
    return %c0_i32, %c0_i32_0 : i32, i32
  }
  func.func @transform_2(%arg0: i32) -> (i32, i32) {
    %c0_i32 = arith.constant 0 : i32
    %c0_i32_0 = arith.constant 0 : i32
    %c0_i32_1 = arith.constant 0 : i32
    return %c0_i32, %c0_i32_0 : i32, i32
  }
  func.func @transform_3(%arg0: i32) -> (i32, i32) {
    %c0_i32 = arith.constant 0 : i32
    %c0_i32_0 = arith.constant 0 : i32
    return %arg0, %c0_i32 : i32, i32
  }
  func.func @transform_4(%arg0: i32) -> (i32, i32) {
    %c0_i32 = arith.constant 0 : i32
    %c0_i32_0 = arith.constant 0 : i32
    return %arg0, %c0_i32 : i32, i32
  }
}

module attributes {stable_mosaic.version = 11 : i64} {
  func.func @_mm_bias_kernel(%arg0: i32, %arg1: memref<128x144xbf16, #tpu.memory_space<vmem>>, %arg2: memref<144x32xbf16, #tpu.memory_space<vmem>>, %arg3: memref<1x32xf32, #tpu.memory_space<vmem>>, %arg4: memref<128x32xf32, #tpu.memory_space<vmem>>) attributes {dimension_semantics = [#tpu.dimension_semantics<parallel>], iteration_bounds = array<i64: 1>, scalar_prefetch = 0 : i64, scratch_operands = 0 : i64, tpu.core_type = #tpu.core_type<tc>, window_params = [{transform_indices = @transform_0, window_bounds = array<i64: 128, 144>}, {pipeline_mode = #tpu.pipeline_mode<synchronous>, transform_indices = @transform_1, window_bounds = array<i64: 144, 32>}, {pipeline_mode = #tpu.pipeline_mode<synchronous>, transform_indices = @transform_2, window_bounds = array<i64: 1, 32>}, {transform_indices = @transform_3, window_bounds = array<i64: 128, 32>}]} {
    %c0 = arith.constant 0 : index
    %c0_0 = arith.constant 0 : index
    %0 = vector.load %arg1[%c0, %c0_0] : memref<128x144xbf16, #tpu.memory_space<vmem>>, vector<128x144xbf16>
    %c0_1 = arith.constant 0 : index
    %c0_2 = arith.constant 0 : index
    %1 = vector.load %arg2[%c0_1, %c0_2] : memref<144x32xbf16, #tpu.memory_space<vmem>>, vector<144x32xbf16>
    %cst = arith.constant dense<0.000000e+00> : vector<128x32xf32>
    %2 = tpu.matmul %0, %1, %cst {dimension_numbers = #tpu.dot_dimension_numbers<[1], [0], [0], [1], [0, 0, 1, 1], [], []>} : vector<128x144xbf16>, vector<144x32xbf16>, vector<128x32xf32> -> vector<128x32xf32>
    %c0_3 = arith.constant 0 : index
    %c0_4 = arith.constant 0 : index
    %3 = vector.load %arg3[%c0_3, %c0_4] : memref<1x32xf32, #tpu.memory_space<vmem>>, vector<1x32xf32>
    %4 = vector.broadcast %3 : vector<1x32xf32> to vector<128x32xf32>
    %5 = arith.addf %2, %4 : vector<128x32xf32>
    %cst_5 = arith.constant 0.000000e+00 : f32
    %6 = vector.broadcast %cst_5 : f32 to vector<128x32xf32>
    %7 = arith.maximumf %5, %6 : vector<128x32xf32>
    %c0_6 = arith.constant 0 : index
    %c0_7 = arith.constant 0 : index
    %8 = vector.load %arg4[%c0_6, %c0_7] : memref<128x32xf32, #tpu.memory_space<vmem>>, vector<128x32xf32>
    tpu.vector_store %arg4[%c0_6, %c0_7], %7 {strides = array<i32>} : memref<128x32xf32, #tpu.memory_space<vmem>>, vector<128x32xf32>,
    return
  }
  func.func @transform_0(%arg0: i32) -> (i32, i32) {
    %c0_i32 = arith.constant 0 : i32
    %c0_i32_0 = arith.constant 0 : i32
    return %arg0, %c0_i32 : i32, i32
  }
  func.func @transform_1(%arg0: i32) -> (i32, i32) {
    %c0_i32 = arith.constant 0 : i32
    %c0_i32_0 = arith.constant 0 : i32
    %c0_i32_1 = arith.constant 0 : i32
    return %c0_i32, %c0_i32_0 : i32, i32
  }
  func.func @transform_2(%arg0: i32) -> (i32, i32) {
    %c0_i32 = arith.constant 0 : i32
    %c0_i32_0 = arith.constant 0 : i32
    %c0_i32_1 = arith.constant 0 : i32
    return %c0_i32, %c0_i32_0 : i32, i32
  }
  func.func @transform_3(%arg0: i32) -> (i32, i32) {
    %c0_i32 = arith.constant 0 : i32
    %c0_i32_0 = arith.constant 0 : i32
    return %arg0, %c0_i32 : i32, i32
  }
}

module attributes {stable_mosaic.version = 11 : i64} {
  func.func @_mm_bias_kernel(%arg0: i32, %arg1: memref<128x288xbf16, #tpu.memory_space<vmem>>, %arg2: memref<288x32xbf16, #tpu.memory_space<vmem>>, %arg3: memref<1x32xf32, #tpu.memory_space<vmem>>, %arg4: memref<128x32xf32, #tpu.memory_space<vmem>>) attributes {dimension_semantics = [#tpu.dimension_semantics<parallel>], iteration_bounds = array<i64: 1>, scalar_prefetch = 0 : i64, scratch_operands = 0 : i64, tpu.core_type = #tpu.core_type<tc>, window_params = [{transform_indices = @transform_0, window_bounds = array<i64: 128, 288>}, {pipeline_mode = #tpu.pipeline_mode<synchronous>, transform_indices = @transform_1, window_bounds = array<i64: 288, 32>}, {pipeline_mode = #tpu.pipeline_mode<synchronous>, transform_indices = @transform_2, window_bounds = array<i64: 1, 32>}, {transform_indices = @transform_3, window_bounds = array<i64: 128, 32>}]} {
    %c0 = arith.constant 0 : index
    %c0_0 = arith.constant 0 : index
    %0 = vector.load %arg1[%c0, %c0_0] : memref<128x288xbf16, #tpu.memory_space<vmem>>, vector<128x288xbf16>
    %c0_1 = arith.constant 0 : index
    %c0_2 = arith.constant 0 : index
    %1 = vector.load %arg2[%c0_1, %c0_2] : memref<288x32xbf16, #tpu.memory_space<vmem>>, vector<288x32xbf16>
    %cst = arith.constant dense<0.000000e+00> : vector<128x32xf32>
    %2 = tpu.matmul %0, %1, %cst {dimension_numbers = #tpu.dot_dimension_numbers<[1], [0], [0], [1], [0, 0, 1, 1], [], []>} : vector<128x288xbf16>, vector<288x32xbf16>, vector<128x32xf32> -> vector<128x32xf32>
    %c0_3 = arith.constant 0 : index
    %c0_4 = arith.constant 0 : index
    %3 = vector.load %arg3[%c0_3, %c0_4] : memref<1x32xf32, #tpu.memory_space<vmem>>, vector<1x32xf32>
    %4 = vector.broadcast %3 : vector<1x32xf32> to vector<128x32xf32>
    %5 = arith.addf %2, %4 : vector<128x32xf32>
    %cst_5 = arith.constant 0.000000e+00 : f32
    %6 = vector.broadcast %cst_5 : f32 to vector<128x32xf32>
    %7 = arith.maximumf %5, %6 : vector<128x32xf32>
    %c0_6 = arith.constant 0 : index
    %c0_7 = arith.constant 0 : index
    %8 = vector.load %arg4[%c0_6, %c0_7] : memref<128x32xf32, #tpu.memory_space<vmem>>, vector<128x32xf32>
    tpu.vector_store %arg4[%c0_6, %c0_7], %7 {strides = array<i32>} : memref<128x32xf32, #tpu.memory_space<vmem>>, vector<128x32xf32>,
    return
  }
  func.func @transform_0(%arg0: i32) -> (i32, i32) {
    %c0_i32 = arith.constant 0 : i32
    %c0_i32_0 = arith.constant 0 : i32
    return %arg0, %c0_i32 : i32, i32
  }
  func.func @transform_1(%arg0: i32) -> (i32, i32) {
    %c0_i32 = arith.constant 0 : i32
    %c0_i32_0 = arith.constant 0 : i32
    %c0_i32_1 = arith.constant 0 : i32
    return %c0_i32, %c0_i32_0 : i32, i32
  }
  func.func @transform_2(%arg0: i32) -> (i32, i32) {
    %c0_i32 = arith.constant 0 : i32
    %c0_i32_0 = arith.constant 0 : i32
    %c0_i32_1 = arith.constant 0 : i32
    return %c0_i32, %c0_i32_0 : i32, i32
  }
  func.func @transform_3(%arg0: i32) -> (i32, i32) {
    %c0_i32 = arith.constant 0 : i32
    %c0_i32_0 = arith.constant 0 : i32
    return %arg0, %c0_i32 : i32, i32
  }
}

module attributes {stable_mosaic.version = 11 : i64} {
  func.func @_mm_bias_res_kernel(%arg0: i32, %arg1: memref<128x288xbf16, #tpu.memory_space<vmem>>, %arg2: memref<288x32xbf16, #tpu.memory_space<vmem>>, %arg3: memref<1x32xf32, #tpu.memory_space<vmem>>, %arg4: memref<128x32xf32, #tpu.memory_space<vmem>>, %arg5: memref<128x32xf32, #tpu.memory_space<vmem>>) attributes {dimension_semantics = [#tpu.dimension_semantics<parallel>], iteration_bounds = array<i64: 1>, scalar_prefetch = 0 : i64, scratch_operands = 0 : i64, tpu.core_type = #tpu.core_type<tc>, window_params = [{transform_indices = @transform_0, window_bounds = array<i64: 128, 288>}, {pipeline_mode = #tpu.pipeline_mode<synchronous>, transform_indices = @transform_1, window_bounds = array<i64: 288, 32>}, {pipeline_mode = #tpu.pipeline_mode<synchronous>, transform_indices = @transform_2, window_bounds = array<i64: 1, 32>}, {transform_indices = @transform_3, window_bounds = array<i64: 128, 32>}, {transform_indices = @transform_4, window_bounds = array<i64: 128, 32>}]} {
    %c0 = arith.constant 0 : index
    %c0_0 = arith.constant 0 : index
    %0 = vector.load %arg1[%c0, %c0_0] : memref<128x288xbf16, #tpu.memory_space<vmem>>, vector<128x288xbf16>
    %c0_1 = arith.constant 0 : index
    %c0_2 = arith.constant 0 : index
    %1 = vector.load %arg2[%c0_1, %c0_2] : memref<288x32xbf16, #tpu.memory_space<vmem>>, vector<288x32xbf16>
    %cst = arith.constant dense<0.000000e+00> : vector<128x32xf32>
    %2 = tpu.matmul %0, %1, %cst {dimension_numbers = #tpu.dot_dimension_numbers<[1], [0], [0], [1], [0, 0, 1, 1], [], []>} : vector<128x288xbf16>, vector<288x32xbf16>, vector<128x32xf32> -> vector<128x32xf32>
    %c0_3 = arith.constant 0 : index
    %c0_4 = arith.constant 0 : index
    %3 = vector.load %arg3[%c0_3, %c0_4] : memref<1x32xf32, #tpu.memory_space<vmem>>, vector<1x32xf32>
    %4 = vector.broadcast %3 : vector<1x32xf32> to vector<128x32xf32>
    %5 = arith.addf %2, %4 : vector<128x32xf32>
    %c0_5 = arith.constant 0 : index
    %c0_6 = arith.constant 0 : index
    %6 = vector.load %arg4[%c0_5, %c0_6] : memref<128x32xf32, #tpu.memory_space<vmem>>, vector<128x32xf32>
    %7 = arith.addf %5, %6 : vector<128x32xf32>
    %cst_7 = arith.constant 0.000000e+00 : f32
    %8 = vector.broadcast %cst_7 : f32 to vector<128x32xf32>
    %9 = arith.maximumf %7, %8 : vector<128x32xf32>
    %c0_8 = arith.constant 0 : index
    %c0_9 = arith.constant 0 : index
    %10 = vector.load %arg5[%c0_8, %c0_9] : memref<128x32xf32, #tpu.memory_space<vmem>>, vector<128x32xf32>
    tpu.vector_store %arg5[%c0_8, %c0_9], %9 {strides = array<i32>} : memref<128x32xf32, #tpu.memory_space<vmem>>, vector<128x32xf32>,
    return
  }
  func.func @transform_0(%arg0: i32) -> (i32, i32) {
    %c0_i32 = arith.constant 0 : i32
    %c0_i32_0 = arith.constant 0 : i32
    return %arg0, %c0_i32 : i32, i32
  }
  func.func @transform_1(%arg0: i32) -> (i32, i32) {
    %c0_i32 = arith.constant 0 : i32
    %c0_i32_0 = arith.constant 0 : i32
    %c0_i32_1 = arith.constant 0 : i32
    return %c0_i32, %c0_i32_0 : i32, i32
  }
  func.func @transform_2(%arg0: i32) -> (i32, i32) {
    %c0_i32 = arith.constant 0 : i32
    %c0_i32_0 = arith.constant 0 : i32
    %c0_i32_1 = arith.constant 0 : i32
    return %c0_i32, %c0_i32_0 : i32, i32
  }
  func.func @transform_3(%arg0: i32) -> (i32, i32) {
    %c0_i32 = arith.constant 0 : i32
    %c0_i32_0 = arith.constant 0 : i32
    return %arg0, %c0_i32 : i32, i32
  }
  func.func @transform_4(%arg0: i32) -> (i32, i32) {
    %c0_i32 = arith.constant 0 : i32
    %c0_i32_0 = arith.constant 0 : i32
    return %arg0, %c0_i32 : i32, i32
  }
}

module attributes {stable_mosaic.version = 11 : i64} {
  func.func @_mm_bias_kernel(%arg0: i32, %arg1: memref<32x288xbf16, #tpu.memory_space<vmem>>, %arg2: memref<288x64xbf16, #tpu.memory_space<vmem>>, %arg3: memref<1x64xf32, #tpu.memory_space<vmem>>, %arg4: memref<32x64xf32, #tpu.memory_space<vmem>>) attributes {dimension_semantics = [#tpu.dimension_semantics<parallel>], iteration_bounds = array<i64: 1>, scalar_prefetch = 0 : i64, scratch_operands = 0 : i64, tpu.core_type = #tpu.core_type<tc>, window_params = [{transform_indices = @transform_0, window_bounds = array<i64: 32, 288>}, {pipeline_mode = #tpu.pipeline_mode<synchronous>, transform_indices = @transform_1, window_bounds = array<i64: 288, 64>}, {pipeline_mode = #tpu.pipeline_mode<synchronous>, transform_indices = @transform_2, window_bounds = array<i64: 1, 64>}, {transform_indices = @transform_3, window_bounds = array<i64: 32, 64>}]} {
    %c0 = arith.constant 0 : index
    %c0_0 = arith.constant 0 : index
    %0 = vector.load %arg1[%c0, %c0_0] : memref<32x288xbf16, #tpu.memory_space<vmem>>, vector<32x288xbf16>
    %c0_1 = arith.constant 0 : index
    %c0_2 = arith.constant 0 : index
    %1 = vector.load %arg2[%c0_1, %c0_2] : memref<288x64xbf16, #tpu.memory_space<vmem>>, vector<288x64xbf16>
    %cst = arith.constant dense<0.000000e+00> : vector<32x64xf32>
    %2 = tpu.matmul %0, %1, %cst {dimension_numbers = #tpu.dot_dimension_numbers<[1], [0], [0], [1], [0, 0, 1, 1], [], []>} : vector<32x288xbf16>, vector<288x64xbf16>, vector<32x64xf32> -> vector<32x64xf32>
    %c0_3 = arith.constant 0 : index
    %c0_4 = arith.constant 0 : index
    %3 = vector.load %arg3[%c0_3, %c0_4] : memref<1x64xf32, #tpu.memory_space<vmem>>, vector<1x64xf32>
    %4 = vector.broadcast %3 : vector<1x64xf32> to vector<32x64xf32>
    %5 = arith.addf %2, %4 : vector<32x64xf32>
    %cst_5 = arith.constant 0.000000e+00 : f32
    %6 = vector.broadcast %cst_5 : f32 to vector<32x64xf32>
    %7 = arith.maximumf %5, %6 : vector<32x64xf32>
    %c0_6 = arith.constant 0 : index
    %c0_7 = arith.constant 0 : index
    %8 = vector.load %arg4[%c0_6, %c0_7] : memref<32x64xf32, #tpu.memory_space<vmem>>, vector<32x64xf32>
    tpu.vector_store %arg4[%c0_6, %c0_7], %7 {strides = array<i32>} : memref<32x64xf32, #tpu.memory_space<vmem>>, vector<32x64xf32>,
    return
  }
  func.func @transform_0(%arg0: i32) -> (i32, i32) {
    %c0_i32 = arith.constant 0 : i32
    %c0_i32_0 = arith.constant 0 : i32
    return %arg0, %c0_i32 : i32, i32
  }
  func.func @transform_1(%arg0: i32) -> (i32, i32) {
    %c0_i32 = arith.constant 0 : i32
    %c0_i32_0 = arith.constant 0 : i32
    %c0_i32_1 = arith.constant 0 : i32
    return %c0_i32, %c0_i32_0 : i32, i32
  }
  func.func @transform_2(%arg0: i32) -> (i32, i32) {
    %c0_i32 = arith.constant 0 : i32
    %c0_i32_0 = arith.constant 0 : i32
    %c0_i32_1 = arith.constant 0 : i32
    return %c0_i32, %c0_i32_0 : i32, i32
  }
  func.func @transform_3(%arg0: i32) -> (i32, i32) {
    %c0_i32 = arith.constant 0 : i32
    %c0_i32_0 = arith.constant 0 : i32
    return %arg0, %c0_i32 : i32, i32
  }
}

module attributes {stable_mosaic.version = 11 : i64} {
  func.func @_mm_bias_kernel(%arg0: i32, %arg1: memref<32x576xbf16, #tpu.memory_space<vmem>>, %arg2: memref<576x64xbf16, #tpu.memory_space<vmem>>, %arg3: memref<1x64xf32, #tpu.memory_space<vmem>>, %arg4: memref<32x64xf32, #tpu.memory_space<vmem>>) attributes {dimension_semantics = [#tpu.dimension_semantics<parallel>], iteration_bounds = array<i64: 1>, scalar_prefetch = 0 : i64, scratch_operands = 0 : i64, tpu.core_type = #tpu.core_type<tc>, window_params = [{transform_indices = @transform_0, window_bounds = array<i64: 32, 576>}, {pipeline_mode = #tpu.pipeline_mode<synchronous>, transform_indices = @transform_1, window_bounds = array<i64: 576, 64>}, {pipeline_mode = #tpu.pipeline_mode<synchronous>, transform_indices = @transform_2, window_bounds = array<i64: 1, 64>}, {transform_indices = @transform_3, window_bounds = array<i64: 32, 64>}]} {
    %c0 = arith.constant 0 : index
    %c0_0 = arith.constant 0 : index
    %0 = vector.load %arg1[%c0, %c0_0] : memref<32x576xbf16, #tpu.memory_space<vmem>>, vector<32x576xbf16>
    %c0_1 = arith.constant 0 : index
    %c0_2 = arith.constant 0 : index
    %1 = vector.load %arg2[%c0_1, %c0_2] : memref<576x64xbf16, #tpu.memory_space<vmem>>, vector<576x64xbf16>
    %cst = arith.constant dense<0.000000e+00> : vector<32x64xf32>
    %2 = tpu.matmul %0, %1, %cst {dimension_numbers = #tpu.dot_dimension_numbers<[1], [0], [0], [1], [0, 0, 1, 1], [], []>} : vector<32x576xbf16>, vector<576x64xbf16>, vector<32x64xf32> -> vector<32x64xf32>
    %c0_3 = arith.constant 0 : index
    %c0_4 = arith.constant 0 : index
    %3 = vector.load %arg3[%c0_3, %c0_4] : memref<1x64xf32, #tpu.memory_space<vmem>>, vector<1x64xf32>
    %4 = vector.broadcast %3 : vector<1x64xf32> to vector<32x64xf32>
    %5 = arith.addf %2, %4 : vector<32x64xf32>
    %cst_5 = arith.constant 0.000000e+00 : f32
    %6 = vector.broadcast %cst_5 : f32 to vector<32x64xf32>
    %7 = arith.maximumf %5, %6 : vector<32x64xf32>
    %c0_6 = arith.constant 0 : index
    %c0_7 = arith.constant 0 : index
    %8 = vector.load %arg4[%c0_6, %c0_7] : memref<32x64xf32, #tpu.memory_space<vmem>>, vector<32x64xf32>
    tpu.vector_store %arg4[%c0_6, %c0_7], %7 {strides = array<i32>} : memref<32x64xf32, #tpu.memory_space<vmem>>, vector<32x64xf32>,
    return
  }
  func.func @transform_0(%arg0: i32) -> (i32, i32) {
    %c0_i32 = arith.constant 0 : i32
    %c0_i32_0 = arith.constant 0 : i32
    return %arg0, %c0_i32 : i32, i32
  }
  func.func @transform_1(%arg0: i32) -> (i32, i32) {
    %c0_i32 = arith.constant 0 : i32
    %c0_i32_0 = arith.constant 0 : i32
    %c0_i32_1 = arith.constant 0 : i32
    return %c0_i32, %c0_i32_0 : i32, i32
  }
  func.func @transform_2(%arg0: i32) -> (i32, i32) {
    %c0_i32 = arith.constant 0 : i32
    %c0_i32_0 = arith.constant 0 : i32
    %c0_i32_1 = arith.constant 0 : i32
    return %c0_i32, %c0_i32_0 : i32, i32
  }
  func.func @transform_3(%arg0: i32) -> (i32, i32) {
    %c0_i32 = arith.constant 0 : i32
    %c0_i32_0 = arith.constant 0 : i32
    return %arg0, %c0_i32 : i32, i32
  }
}

module attributes {stable_mosaic.version = 11 : i64} {
  func.func @_mm_bias_res_kernel(%arg0: i32, %arg1: memref<32x576xbf16, #tpu.memory_space<vmem>>, %arg2: memref<576x64xbf16, #tpu.memory_space<vmem>>, %arg3: memref<1x64xf32, #tpu.memory_space<vmem>>, %arg4: memref<32x64xf32, #tpu.memory_space<vmem>>, %arg5: memref<32x64xf32, #tpu.memory_space<vmem>>) attributes {dimension_semantics = [#tpu.dimension_semantics<parallel>], iteration_bounds = array<i64: 1>, scalar_prefetch = 0 : i64, scratch_operands = 0 : i64, tpu.core_type = #tpu.core_type<tc>, window_params = [{transform_indices = @transform_0, window_bounds = array<i64: 32, 576>}, {pipeline_mode = #tpu.pipeline_mode<synchronous>, transform_indices = @transform_1, window_bounds = array<i64: 576, 64>}, {pipeline_mode = #tpu.pipeline_mode<synchronous>, transform_indices = @transform_2, window_bounds = array<i64: 1, 64>}, {transform_indices = @transform_3, window_bounds = array<i64: 32, 64>}, {transform_indices = @transform_4, window_bounds = array<i64: 32, 64>}]} {
    %c0 = arith.constant 0 : index
    %c0_0 = arith.constant 0 : index
    %0 = vector.load %arg1[%c0, %c0_0] : memref<32x576xbf16, #tpu.memory_space<vmem>>, vector<32x576xbf16>
    %c0_1 = arith.constant 0 : index
    %c0_2 = arith.constant 0 : index
    %1 = vector.load %arg2[%c0_1, %c0_2] : memref<576x64xbf16, #tpu.memory_space<vmem>>, vector<576x64xbf16>
    %cst = arith.constant dense<0.000000e+00> : vector<32x64xf32>
    %2 = tpu.matmul %0, %1, %cst {dimension_numbers = #tpu.dot_dimension_numbers<[1], [0], [0], [1], [0, 0, 1, 1], [], []>} : vector<32x576xbf16>, vector<576x64xbf16>, vector<32x64xf32> -> vector<32x64xf32>
    %c0_3 = arith.constant 0 : index
    %c0_4 = arith.constant 0 : index
    %3 = vector.load %arg3[%c0_3, %c0_4] : memref<1x64xf32, #tpu.memory_space<vmem>>, vector<1x64xf32>
    %4 = vector.broadcast %3 : vector<1x64xf32> to vector<32x64xf32>
    %5 = arith.addf %2, %4 : vector<32x64xf32>
    %c0_5 = arith.constant 0 : index
    %c0_6 = arith.constant 0 : index
    %6 = vector.load %arg4[%c0_5, %c0_6] : memref<32x64xf32, #tpu.memory_space<vmem>>, vector<32x64xf32>
    %7 = arith.addf %5, %6 : vector<32x64xf32>
    %cst_7 = arith.constant 0.000000e+00 : f32
    %8 = vector.broadcast %cst_7 : f32 to vector<32x64xf32>
    %9 = arith.maximumf %7, %8 : vector<32x64xf32>
    %c0_8 = arith.constant 0 : index
    %c0_9 = arith.constant 0 : index
    %10 = vector.load %arg5[%c0_8, %c0_9] : memref<32x64xf32, #tpu.memory_space<vmem>>, vector<32x64xf32>
    tpu.vector_store %arg5[%c0_8, %c0_9], %9 {strides = array<i32>} : memref<32x64xf32, #tpu.memory_space<vmem>>, vector<32x64xf32>,
    return
  }
  func.func @transform_0(%arg0: i32) -> (i32, i32) {
    %c0_i32 = arith.constant 0 : i32
    %c0_i32_0 = arith.constant 0 : i32
    return %arg0, %c0_i32 : i32, i32
  }
  func.func @transform_1(%arg0: i32) -> (i32, i32) {
    %c0_i32 = arith.constant 0 : i32
    %c0_i32_0 = arith.constant 0 : i32
    %c0_i32_1 = arith.constant 0 : i32
    return %c0_i32, %c0_i32_0 : i32, i32
  }
  func.func @transform_2(%arg0: i32) -> (i32, i32) {
    %c0_i32 = arith.constant 0 : i32
    %c0_i32_0 = arith.constant 0 : i32
    %c0_i32_1 = arith.constant 0 : i32
    return %c0_i32, %c0_i32_0 : i32, i32
  }
  func.func @transform_3(%arg0: i32) -> (i32, i32) {
    %c0_i32 = arith.constant 0 : i32
    %c0_i32_0 = arith.constant 0 : i32
    return %arg0, %c0_i32 : i32, i32
  }
  func.func @transform_4(%arg0: i32) -> (i32, i32) {
    %c0_i32 = arith.constant 0 : i32
    %c0_i32_0 = arith.constant 0 : i32
    return %arg0, %c0_i32 : i32, i32
  }
}

module attributes {stable_mosaic.version = 11 : i64} {
  func.func @_head_kernel(%arg0: memref<8x64xf32, #tpu.memory_space<vmem>>, %arg1: memref<64x32xf32, #tpu.memory_space<vmem>>, %arg2: memref<1x32xf32, #tpu.memory_space<vmem>>, %arg3: memref<32x16xf32, #tpu.memory_space<vmem>>, %arg4: memref<1x16xf32, #tpu.memory_space<vmem>>, %arg5: memref<16x16xf32, #tpu.memory_space<vmem>>, %arg6: memref<1x16xf32, #tpu.memory_space<vmem>>, %arg7: memref<8x16xf32, #tpu.memory_space<vmem>>) attributes {dimension_semantics = [], scalar_prefetch = 0 : i64, scratch_operands = 0 : i64, tpu.core_type = #tpu.core_type<tc>} {
    %c0 = arith.constant 0 : index
    %c0_0 = arith.constant 0 : index
    %0 = vector.load %arg0[%c0, %c0_0] : memref<8x64xf32, #tpu.memory_space<vmem>>, vector<8x64xf32>
    %c0_1 = arith.constant 0 : index
    %c0_2 = arith.constant 0 : index
    %1 = vector.load %arg1[%c0_1, %c0_2] : memref<64x32xf32, #tpu.memory_space<vmem>>, vector<64x32xf32>
    %cst = arith.constant dense<0.000000e+00> : vector<8x32xf32>
    %2 = tpu.matmul %0, %1, %cst {dimension_numbers = #tpu.dot_dimension_numbers<[1], [0], [0], [1], [0, 0, 1, 1], [], []>} : vector<8x64xf32>, vector<64x32xf32>, vector<8x32xf32> -> vector<8x32xf32>
    %c0_3 = arith.constant 0 : index
    %c0_4 = arith.constant 0 : index
    %3 = vector.load %arg2[%c0_3, %c0_4] : memref<1x32xf32, #tpu.memory_space<vmem>>, vector<1x32xf32>
    %4 = vector.broadcast %3 : vector<1x32xf32> to vector<8x32xf32>
    %5 = arith.addf %2, %4 : vector<8x32xf32>
    %c0_5 = arith.constant 0 : index
    %c0_6 = arith.constant 0 : index
    %6 = vector.load %arg3[%c0_5, %c0_6] : memref<32x16xf32, #tpu.memory_space<vmem>>, vector<32x16xf32>
    %cst_7 = arith.constant dense<0.000000e+00> : vector<8x16xf32>
    %7 = tpu.matmul %5, %6, %cst_7 {dimension_numbers = #tpu.dot_dimension_numbers<[1], [0], [0], [1], [0, 0, 1, 1], [], []>} : vector<8x32xf32>, vector<32x16xf32>, vector<8x16xf32> -> vector<8x16xf32>
    %c0_8 = arith.constant 0 : index
    %c0_9 = arith.constant 0 : index
    %8 = vector.load %arg4[%c0_8, %c0_9] : memref<1x16xf32, #tpu.memory_space<vmem>>, vector<1x16xf32>
    %9 = vector.broadcast %8 : vector<1x16xf32> to vector<8x16xf32>
    %10 = arith.addf %7, %9 : vector<8x16xf32>
    %cst_10 = arith.constant 0.000000e+00 : f32
    %11 = vector.broadcast %cst_10 : f32 to vector<8x16xf32>
    %12 = arith.maximumf %10, %11 : vector<8x16xf32>
    %c0_11 = arith.constant 0 : index
    %c0_12 = arith.constant 0 : index
    %13 = vector.load %arg5[%c0_11, %c0_12] : memref<16x16xf32, #tpu.memory_space<vmem>>, vector<16x16xf32>
    %cst_13 = arith.constant dense<0.000000e+00> : vector<8x16xf32>
    %14 = tpu.matmul %12, %13, %cst_13 {dimension_numbers = #tpu.dot_dimension_numbers<[1], [0], [0], [1], [0, 0, 1, 1], [], []>} : vector<8x16xf32>, vector<16x16xf32>, vector<8x16xf32> -> vector<8x16xf32>
    %c0_14 = arith.constant 0 : index
    %c0_15 = arith.constant 0 : index
    %15 = vector.load %arg6[%c0_14, %c0_15] : memref<1x16xf32, #tpu.memory_space<vmem>>, vector<1x16xf32>
    %16 = vector.broadcast %15 : vector<1x16xf32> to vector<8x16xf32>
    %17 = arith.addf %14, %16 : vector<8x16xf32>
    %cst_16 = arith.constant 0.000000e+00 : f32
    %18 = vector.broadcast %cst_16 : f32 to vector<8x16xf32>
    %19 = arith.maximumf %17, %18 : vector<8x16xf32>
    %20 = arith.mulf %19, %19 : vector<8x16xf32>
    %cst_17 = arith.constant dense<0.000000e+00> : vector<8xf32>
    %21 = vector.multi_reduction <add>, %20, %cst_17 [1] : vector<8x16xf32> to vector<8xf32>
    %22 = vector.shape_cast %21 : vector<8xf32> to vector<8x1xf32>
    %cst_18 = arith.constant 1.000000e-24 : f32
    %23 = vector.broadcast %cst_18 : f32 to vector<8x1xf32>
    %24 = arith.maximumf %22, %23 : vector<8x1xf32>
    %25 = math.rsqrt %24 : vector<8x1xf32>
    %26 = vector.broadcast %25 : vector<8x1xf32> to vector<8x16xf32>
    %27 = arith.mulf %19, %26 : vector<8x16xf32>
    %c0_19 = arith.constant 0 : index
    %c0_20 = arith.constant 0 : index
    %28 = vector.load %arg7[%c0_19, %c0_20] : memref<8x16xf32, #tpu.memory_space<vmem>>, vector<8x16xf32>
    tpu.vector_store %arg7[%c0_19, %c0_20], %27 {strides = array<i32>} : memref<8x16xf32, #tpu.memory_space<vmem>>, vector<8x16xf32>,
    return
  }
}

</mosaic_0001>

<bundles_post_ra>
// kernel: simclr_forward.14
= control target key start
LH: loop header
LB: loop body
LE: loop exit
PB: predicated region body
PF: predicated region fallthrough
CT: control target
= control target key end

     0   :  { %s583_s12 = smov 0   ;;  %s655_s0 = inlined_call_operand.vmem [shape: bf16[512,27], index: 0, kind: input, shape index: {}]   ;;  %s656_s1 = inlined_call_operand.vmem [shape: bf16[27,16], index: 1, kind: input, shape index: {}]   ;;  %s657_s2 = inlined_call_operand.vmem [shape: f32[1,16], index: 2, kind: input, shape index: {}]   ;;  %s658_s3 = inlined_call_operand.vmem [shape: f32[512,16], index: 3, kind: output, shape index: {}]  }
   0x1 LB: > { %s471_s13 = sadd.s32 4294967295, %s560_s12   ;;  %p475_p0 = scmp.ge.s32.totalorder %s560_s12, 1  ;;  %s560_s12 = sphi %s583_s12, %s13_s12  }
   0x2   : > { %p138_p1 = scmp.lt.s32.totalorder %s560_s12, 5 }
   0x4   : > { %p139_p2 = pnand %p475_p0, %p138_p1 }
   0x5   : > { %v544_v0 = vld [vmem:[%s656_s1] sm:$0xff] (!%p139_p2)   ;;  %vm278_vm0 = vcmask (!%p139_p2), 1044480   ;;  %v545_v1 = vld [vmem:[%s656_s1 + $0x8] sm:$0x3f] (!%p139_p2)   ;;  %vm279_vm1 = vcmask (!%p139_p2), 1045504   ;;  %s476_s18 = sshll.u32 (!%p139_p2), %s471_s13, 4 }
   0x6   : > { %142 = sbr.rel (%p139_p2) target bundleno = 247 (0xf7), region = 32  ;;  %511 = vmatprep.subr.bf16.mxu0 (!%p139_p2), %v544_v0  ;;  %531 = vmatprep.subr.bf16.mxu1 (!%p139_p2), %v544_v0  ;;  %v562_v2 = vmov (!%p139_p2), 65535   ;;  %p163_p3 = scmp.lt.s32.totalorder (!%p139_p2), %s476_s18, 63  ;;  %vm253_vm2 = vcmask (!%p139_p2), 220160   ;;  %v480_v14 = vld [vmem:[%s657_s2] ss:$0 sm:$0xff] (!%p139_p2) }
   0x7   : > { %512 = vmatpush3.bf16.msra.mxu0 (!%p139_p2), %v544_v0  ;;  %533 = vmatpush3.bf16.msra.mxu1 (!%p139_p2), %v544_v0  ;;  %v280_v3 = vsel (!%p139_p2), %vm278_vm0, 4294967295, %v562_v2  ;;  %vm398_vm3 = vcmask (!%p139_p2), 130048  }
   0x8   : > { %v281_v4 = vsel (!%p139_p2), %vm279_vm1, %v280_v3, 0 }
   0x9   : > { %v283_v5 = vand.u32 (!%p139_p2), %v545_v1, %v281_v4 }
   0xb   : > { %513 = vmatprep.subr.bf16.mxu0 (!%p139_p2), %v283_v5  ;;  %532 = vmatprep.subr.bf16.mxu1 (!%p139_p2), %v283_v5 }
   0xc   : > { %514 = vmatpush3.bf16.msra.mxu0 (!%p139_p2), %v283_v5  ;;  %534 = vmatpush3.bf16.msra.mxu1 (!%p139_p2), %v283_v5 }
   0xd   : > { %s660_s18 = smov (!%p163_p3, %s476_s18), 63 }
   0xe   : > { %s477_s19 = sshll.u32 %s660_s18, 2  ;;  %s479_s25 = sshll.u32 %s660_s18, 3 }
   0xf   : > { %s166_s22 = scalar_lea.vmem %s655_s0, %s477_s19  ;;  %s618_s28 = scalar_lea.vmem %s658_s3, %s479_s25 }
  0x10   : > { %v546_v6 = vld [vmem:[%s166_s22] sm:$0xff]   ;;  %v548_v8 = vld [vmem:[%s166_s22 + $0x8] sm:$0xff]   ;;  %v550_v10 = vld [vmem:[%s166_s22 + $0x10] sm:$0xff]  }
  0x11   : > { %v547_v7 = vld [vmem:[%s166_s22 + $0x20] sm:$0xff]   ;;  %515 = vmatprep.mubr.msk.bf16.mxu0 %vm253_vm2, %v546_v6  ;;  %v549_v9 = vld [vmem:[%s166_s22 + $0x28] sm:$0xff]   ;;  %v551_v11 = vld [vmem:[%s166_s22 + $0x30] sm:$0xff]  }
  0x12   : > { %523 = vmatprep.mubr.msk.bf16.mxu1 %vm253_vm2, %v547_v7  ;;  %516 = vmatmul.mubr.msk.bf16.vlgmr.msra.gmra.mrb[0].mxu0 %vm253_vm2, %v548_v8  ;;  %v552_v12 = vld [vmem:[%s166_s22 + $0x18] sm:$0xff]  }
  0x13   : > { %524 = vmatmul.mubr.msk.bf16.vlgmr.msra.gmra.mrb[0].mxu1 %vm253_vm2, %v549_v9  ;;  %519 = vmatprep.mubr.msk.bf16.mxu0 %vm253_vm2, %v550_v10  ;;  %v553_v13 = vld [vmem:[%s166_s22 + $0x38] sm:$0xff]  }
  0x14   : > { %527 = vmatprep.mubr.msk.bf16.mxu1 %vm253_vm2, %v551_v11 }
  0x1a   : > { %520 = vmatmul.mubr.msk.bf16.gmra.mrb[4].mxu0 %vm253_vm2, %v552_v12 }
  0x1b   : > { %528 = vmatmul.mubr.msk.bf16.gmra.mrb[4].mxu1 %vm253_vm2, %v553_v13 }
  0xe5   : > { %v517_v15 = vpop.f32.mrb[0].mxu0 }
  0xe6   : > { %v328_v16 = vadd.f32 %v517_v15, %v480_v14  ;;  %v525_v17 = vpop.f32.mrb[0].mxu1  ;;  %v319_v18 = vpop.f32.mrb[1].mxu0 }
  0xe7   : > { %v360_v19 = vadd.f32 %v525_v17, %v480_v14  ;;  %v320_v20 = vadd.f32 %v480_v14, %v319_v18  ;;  %v351_v21 = vpop.f32.mrb[1].mxu1  ;;  %v518_v22 = vpop.f32.mrb[2].mxu0 }
  0xe8   : > { %v384_v23 = vmax.f32 %v328_v16, 0.0  ;;  %v352_v24 = vadd.f32 %v480_v14, %v351_v21  ;;  %v331_v25 = vadd.f32 %v518_v22, %v480_v14  ;;  %v526_v26 = vpop.f32.mrb[2].mxu1  ;;  %v322_v27 = vpop.f32.mrb[3].mxu0 }
  0xe9   : > { %v392_v28 = vmax.f32 %v360_v19, 0.0  ;;  %v382_v29 = vmax.f32 %v320_v20, 0.0  ;;  %v363_v30 = vadd.f32 %v526_v26, %v480_v14  ;;  %v323_v31 = vadd.f32 %v480_v14, %v322_v27  ;;  %v354_v32 = vpop.f32.mrb[3].mxu1 }
  0xea   : > { %401 = vst.msk [vmem:[%s618_s28 + $0x10] sm:$0xff] %vm398_vm3, %v384_v23  ;;  %v390_v33 = vmax.f32 %v352_v24, 0.0  ;;  %v385_v34 = vmax.f32 %v331_v25, 0.0  ;;  %v355_v35 = vadd.f32 %v480_v14, %v354_v32 }
  0xeb   : > { %409 = vst.msk [vmem:[%s618_s28 + $0x50] sm:$0xff] %vm398_vm3, %v392_v28  ;;  %399 = vst.msk [vmem:[%s618_s28] sm:$0xff] %vm398_vm3, %v382_v29  ;;  %v393_v36 = vmax.f32 %v363_v30, 0.0  ;;  %v383_v37 = vmax.f32 %v323_v31, 0.0 }
  0xec   : > { %407 = vst.msk [vmem:[%s618_s28 + $0x40] sm:$0xff] %vm398_vm3, %v390_v33  ;;  %402 = vst.msk [vmem:[%s618_s28 + $0x18] sm:$0xff] %vm398_vm3, %v385_v34  ;;  %v391_v38 = vmax.f32 %v355_v35, 0.0 }
  0xed   : > { %410 = vst.msk [vmem:[%s618_s28 + $0x58] sm:$0xff] %vm398_vm3, %v393_v36  ;;  %400 = vst.msk [vmem:[%s618_s28 + $0x8] sm:$0xff] %vm398_vm3, %v383_v37  ;;  %v521_v39 = vpop.f32.mrb[4].mxu0 }
  0xee   : > { %408 = vst.msk [vmem:[%s618_s28 + $0x48] sm:$0xff] %vm398_vm3, %v391_v38  ;;  %v344_v40 = vadd.f32 %v521_v39, %v480_v14  ;;  %v529_v41 = vpop.f32.mrb[4].mxu1  ;;  %v335_v42 = vpop.f32.mrb[5].mxu0 }
  0xef   : > { %v376_v43 = vadd.f32 %v529_v41, %v480_v14  ;;  %v336_v44 = vadd.f32 %v480_v14, %v335_v42  ;;  %v367_v45 = vpop.f32.mrb[5].mxu1  ;;  %v522_v46 = vpop.f32.mrb[6].mxu0 }
  0xf0   : > { %v388_v47 = vmax.f32 %v344_v40, 0.0  ;;  %v368_v48 = vadd.f32 %v480_v14, %v367_v45  ;;  %v347_v49 = vadd.f32 %v522_v46, %v480_v14  ;;  %v530_v50 = vpop.f32.mrb[6].mxu1  ;;  %v338_v51 = vpop.f32.mrb[7].mxu0 }
  0xf1   : > { %v396_v52 = vmax.f32 %v376_v43, 0.0  ;;  %v386_v53 = vmax.f32 %v336_v44, 0.0  ;;  %v379_v54 = vadd.f32 %v530_v50, %v480_v14  ;;  %v339_v55 = vadd.f32 %v480_v14, %v338_v51  ;;  %v370_v56 = vpop.f32.mrb[7].mxu1 }
  0xf2   : > { %405 = vst.msk [vmem:[%s618_s28 + $0x30] sm:$0xff] %vm398_vm3, %v388_v47  ;;  %v394_v57 = vmax.f32 %v368_v48, 0.0  ;;  %v389_v58 = vmax.f32 %v347_v49, 0.0  ;;  %v371_v59 = vadd.f32 %v480_v14, %v370_v56 }
  0xf3   : > { %413 = vst.msk [vmem:[%s618_s28 + $0x70] sm:$0xff] %vm398_vm3, %v396_v52  ;;  %403 = vst.msk [vmem:[%s618_s28 + $0x20] sm:$0xff] %vm398_vm3, %v386_v53  ;;  %v397_v60 = vmax.f32 %v379_v54, 0.0  ;;  %v387_v61 = vmax.f32 %v339_v55, 0.0 }
  0xf4   : > { %411 = vst.msk [vmem:[%s618_s28 + $0x60] sm:$0xff] %vm398_vm3, %v394_v57  ;;  %406 = vst.msk [vmem:[%s618_s28 + $0x38] sm:$0xff] %vm398_vm3, %v389_v58  ;;  %v395_v62 = vmax.f32 %v371_v59, 0.0 }
  0xf5   : > { %414 = vst.msk [vmem:[%s618_s28 + $0x78] sm:$0xff] %vm398_vm3, %v397_v60  ;;  %404 = vst.msk [vmem:[%s618_s28 + $0x28] sm:$0xff] %vm398_vm3, %v387_v61 }
  0xf6   : > { %412 = vst.msk [vmem:[%s618_s28 + $0x68] sm:$0xff] %vm398_vm3, %v395_v62 }
  0xf7 PF: > { %s13_s12 = sadd.s32 1, %s560_s12  }
  0xf8   : > { %p10_p4 = scmp.ge.s32.totalorder %s13_s12, 6  }
  0xfa   :  { %12 = sbr.rel (!%p10_p4) target bundleno = 1 (0x1), region = 62 }

// kernel: simclr_forward.15
= control target key start
LH: loop header
LB: loop body
LE: loop exit
PB: predicated region body
PF: predicated region fallthrough
CT: control target
= control target key end

     0   :  { %s691_s12 = smov 0   ;;  %s823_s0 = inlined_call_operand.vmem [shape: bf16[512,144], index: 0, kind: input, shape index: {}]   ;;  %s824_s1 = inlined_call_operand.vmem [shape: bf16[144,16], index: 1, kind: input, shape index: {}]   ;;  %s825_s2 = inlined_call_operand.vmem [shape: f32[1,16], index: 2, kind: input, shape index: {}]   ;;  %s826_s3 = inlined_call_operand.vmem [shape: f32[512,16], index: 3, kind: output, shape index: {}]  }
   0x1 LB: > { %s555_s13 = sadd.s32 4294967295, %s668_s12   ;;  %p559_p0 = scmp.ge.s32.totalorder %s668_s12, 1  ;;  %s668_s12 = sphi %s691_s12, %s13_s12  }
   0x2   : > { %p139_p1 = scmp.lt.s32.totalorder %s668_s12, 5 }
   0x4   : > { %p140_p2 = pnand %p559_p0, %p139_p1 }
   0x5   : > { %v629_v0 = vld [vmem:[%s824_s1] sm:$0xff] (!%p140_p2)   ;;  %v670_v1 = vmov (!%p140_p2), 0   ;;  %s560_s16 = sshll.u32 (!%p140_p2), %s555_s13, 4  ;;  %v630_v2 = vld [vmem:[%s824_s1 + $0x8] sm:$0xff] (!%p140_p2)   ;;  %v631_v3 = vld [vmem:[%s824_s1 + $0x10] sm:$0xff] (!%p140_p2)   ;;  %vm345_vm0 = vcmask (!%p140_p2), 130048  }
   0x6   : > { %143 = sbr.rel (%p140_p2) target bundleno = 285 (0x11d), region = 32  ;;  %370 = vmatprep.subr.bf16.mxu0 (!%p140_p2), %v670_v1  ;;  %602 = vmatprep.subr.bf16.mxu1 (!%p140_p2), %v670_v1  ;;  %p165_p3 = scmp.lt.s32.totalorder (!%p140_p2), %s560_s16, 63  ;;  %v632_v4 = vld [vmem:[%s824_s1 + $0x18] sm:$0xff] (!%p140_p2)   ;;  %v633_v7 = vld [vmem:[%s824_s1 + $0x20] sm:$0xff] (!%p140_p2)   ;;  %v634_v8 = vld [vmem:[%s824_s1 + $0x28] sm:$0xff] (!%p140_p2)  }
   0x7   : > { %371 = vmatpush1.bf16.msra.mxu0 (!%p140_p2), %v629_v0  ;;  %611 = vmatpush1.bf16.msra.mxu1 (!%p140_p2), %v629_v0  ;;  %v635_v9 = vld [vmem:[%s824_s1 + $0x30] sm:$0xff] (!%p140_p2)   ;;  %v636_v10 = vld [vmem:[%s824_s1 + $0x38] sm:$0xff] (!%p140_p2)   ;;  %v637_v11 = vld [vmem:[%s824_s1 + $0x40] sm:$0xff] (!%p140_p2)  }
   0x8   : > { %372 = vmatprep.subr.bf16.mxu0 (!%p140_p2), %v670_v1  ;;  %603 = vmatprep.subr.bf16.mxu1 (!%p140_p2), %v670_v1  ;;  %v763_v26 = vld [vmem:[%s825_s2] ss:$0 sm:$0xff] (!%p140_p2) }
   0xb   : > { %373 = vmatpush1.bf16.msra.mxu0 (!%p140_p2), %v630_v2  ;;  %612 = vmatpush1.bf16.msra.mxu1 (!%p140_p2), %v630_v2 }
   0xc   : > { %374 = vmatprep.subr.bf16.mxu0 (!%p140_p2), %v670_v1  ;;  %604 = vmatprep.subr.bf16.mxu1 (!%p140_p2), %v670_v1 }
   0xd   : > { %s828_s16 = smov (!%p165_p3, %s560_s16), 63 }
   0xe   : > { %s601_s21 = sshll.u32 %s828_s16, 3 }
   0xf   : > { %s716_s24 = scalar_lea.vmem %s823_s0, %s601_s21  ;;  %375 = vmatpush1.bf16.msra.mxu0 %v631_v3  ;;  %613 = vmatpush1.bf16.msra.mxu1 %v631_v3  ;;  %s772_s15 = scalar_lea.vmem %s826_s3, %s601_s21 }
  0x10   : > { %v640_v5 = vld [vmem:[%s716_s24 + $0x4] ss:$8 sps:$4 sm:$0xff]   ;;  %376 = vmatprep.subr.bf16.mxu0 %v670_v1  ;;  %605 = vmatprep.subr.bf16.mxu1 %v670_v1  ;;  %v638_v12 = vld [vmem:[%s716_s24] ss:$8 sps:$4 sm:$0xff]   ;;  %v644_v14 = vld [vmem:[%s716_s24 + $0x14] ss:$8 sps:$4 sm:$0xff]  }
  0x11   : > { %v643_v6 = vld [vmem:[%s716_s24 + $0x44] ss:$8 sps:$4 sm:$0xff]   ;;  %591 = vmatprep.mubr.msk.bf16.mxu0 %vm345_vm0, %v640_v5  ;;  %v641_v13 = vld [vmem:[%s716_s24 + $0x40] ss:$8 sps:$4 sm:$0xff]   ;;  %v646_v15 = vld [vmem:[%s716_s24 + $0x54] ss:$8 sps:$4 sm:$0xff]  }
  0x12   : > { %595 = vmatprep.mubr.msk.bf16.mxu1 %vm345_vm0, %v643_v6  ;;  %v648_v16 = vld [vmem:[%s716_s24 + $0x10] ss:$8 sps:$4 sm:$0xff]   ;;  %v650_v18 = vld [vmem:[%s716_s24 + $0x24] ss:$8 sps:$4 sm:$0xff]   ;;  %v654_v20 = vld [vmem:[%s716_s24 + $0x20] ss:$8 sps:$4 sm:$0xff]  }
  0x13   : > { %377 = vmatpush1.bf16.msra.mxu0 %v632_v4  ;;  %614 = vmatpush1.bf16.msra.mxu1 %v632_v4  ;;  %v649_v17 = vld [vmem:[%s716_s24 + $0x50] ss:$8 sps:$4 sm:$0xff]   ;;  %v652_v19 = vld [vmem:[%s716_s24 + $0x64] ss:$8 sps:$4 sm:$0xff]   ;;  %v655_v21 = vld [vmem:[%s716_s24 + $0x60] ss:$8 sps:$4 sm:$0xff]  }
  0x14   : > { %378 = vmatprep.subr.bf16.mxu0 %v670_v1  ;;  %606 = vmatprep.subr.bf16.mxu1 %v670_v1  ;;  %v656_v22 = vld [vmem:[%s716_s24 + $0x34] ss:$8 sps:$4 sm:$0xff]   ;;  %v660_v24 = vld [vmem:[%s716_s24 + $0x30] ss:$8 sps:$4 sm:$0xff]  }
  0x15   : > { %v658_v23 = vld [vmem:[%s716_s24 + $0x74] ss:$8 sps:$4 sm:$0xff]   ;;  %v661_v25 = vld [vmem:[%s716_s24 + $0x70] ss:$8 sps:$4 sm:$0xff]  }
  0x17   : > { %379 = vmatpush1.bf16.msra.mxu0 %v633_v7  ;;  %615 = vmatpush1.bf16.msra.mxu1 %v633_v7 }
  0x18   : > { %380 = vmatprep.subr.bf16.mxu0 %v670_v1  ;;  %607 = vmatprep.subr.bf16.mxu1 %v670_v1 }
  0x1b   : > { %381 = vmatpush1.bf16.msra.mxu0 %v634_v8  ;;  %616 = vmatpush1.bf16.msra.mxu1 %v634_v8 }
  0x1c   : > { %382 = vmatprep.subr.bf16.mxu0 %v670_v1  ;;  %608 = vmatprep.subr.bf16.mxu1 %v670_v1 }
  0x1f   : > { %383 = vmatpush1.bf16.msra.mxu0 %v635_v9  ;;  %617 = vmatpush1.bf16.msra.mxu1 %v635_v9 }
  0x20   : > { %384 = vmatprep.subr.bf16.mxu0 %v670_v1  ;;  %609 = vmatprep.subr.bf16.mxu1 %v670_v1 }
  0x23   : > { %385 = vmatpush1.bf16.msra.mxu0 %v636_v10  ;;  %618 = vmatpush1.bf16.msra.mxu1 %v636_v10 }
  0x24   : > { %386 = vmatprep.subr.bf16.mxu0 %v670_v1  ;;  %610 = vmatprep.subr.bf16.mxu1 %v670_v1 }
  0x27   : > { %387 = vmatpush1.bf16.msra.mxu0 %v637_v11  ;;  %619 = vmatpush1.bf16.msra.mxu1 %v637_v11 }
  0x2a   : > { %403 = vmatmul.mubr.bf16.vlgmr.msra.gmra.mrb[0].mxu0 %v638_v12  ;;  %435 = vmatmul.mubr.bf16.vlgmr.msra.gmra.mrb[0].mxu1 %v641_v13 }
  0x2b   : > { %592 = vmatprep.mubr.msk.bf16.mxu0 %vm345_vm0, %v644_v14  ;;  %596 = vmatprep.mubr.msk.bf16.mxu1 %vm345_vm0, %v646_v15 }
  0x32   : > { %411 = vmatmul.mubr.bf16.gmra.mrb[4].mxu0 %v648_v16  ;;  %443 = vmatmul.mubr.bf16.gmra.mrb[4].mxu1 %v649_v17 }
  0x33   : > { %593 = vmatprep.mubr.msk.bf16.mxu0 %vm345_vm0, %v650_v18  ;;  %597 = vmatprep.mubr.msk.bf16.mxu1 %vm345_vm0, %v652_v19 }
  0x3a   : > { %419 = vmatmul.mubr.bf16.gmra.mrb[8].mxu0 %v654_v20  ;;  %451 = vmatmul.mubr.bf16.gmra.mrb[8].mxu1 %v655_v21 }
  0x3b   : > { %594 = vmatprep.mubr.msk.bf16.mxu0 %vm345_vm0, %v656_v22  ;;  %598 = vmatprep.mubr.msk.bf16.mxu1 %vm345_vm0, %v658_v23 }
  0x42   : > { %427 = vmatmul.mubr.bf16.gmra.mrb[12].mxu0 %v660_v24  ;;  %459 = vmatmul.mubr.bf16.gmra.mrb[12].mxu1 %v661_v25 }
  0xfd   : > { %v404_v27 = vpop.f32.mrb[0].mxu0  ;;  %v436_v28 = vpop.f32.mrb[0].mxu1 }
  0xfe   : > { %v405_v29 = vadd.f32 %v763_v26, %v404_v27  ;;  %v437_v30 = vadd.f32 %v763_v26, %v436_v28  ;;  %v406_v31 = vpop.f32.mrb[1].mxu0  ;;  %v438_v32 = vpop.f32.mrb[1].mxu1 }
  0xff   : > { %v407_v33 = vpop.f32.mrb[2].mxu0  ;;  %v439_v34 = vpop.f32.mrb[2].mxu1 }
 0x100   : > { %v467_v35 = vmax.f32 %v405_v29, 0.0  ;;  %v475_v36 = vmax.f32 %v437_v30, 0.0  ;;  %v408_v37 = vadd.f32 %v763_v26, %v407_v33  ;;  %v440_v38 = vadd.f32 %v763_v26, %v439_v34  ;;  %v409_v39 = vpop.f32.mrb[3].mxu0  ;;  %v441_v40 = vpop.f32.mrb[3].mxu1 }
 0x102   : > { %483 = vst.msk [vmem:[%s772_s15] sm:$0xff] %vm345_vm0, %v467_v35  ;;  %491 = vst.msk [vmem:[%s772_s15 + $0x40] sm:$0xff] %vm345_vm0, %v475_v36  ;;  %v468_v41 = vmax.f32 %v408_v37, 0.0  ;;  %v476_v42 = vmax.f32 %v440_v38, 0.0 }
 0x104   : > { %484 = vst.msk [vmem:[%s772_s15 + $0x8] sm:$0xff] %vm345_vm0, %v468_v41  ;;  %492 = vst.msk [vmem:[%s772_s15 + $0x48] sm:$0xff] %vm345_vm0, %v476_v42 }
 0x105   : > { %v412_v43 = vpop.f32.mrb[4].mxu0  ;;  %v444_v44 = vpop.f32.mrb[4].mxu1 }
 0x106   : > { %v413_v45 = vadd.f32 %v763_v26, %v412_v43  ;;  %v445_v46 = vadd.f32 %v763_v26, %v444_v44  ;;  %v414_v47 = vpop.f32.mrb[5].mxu0  ;;  %v446_v48 = vpop.f32.mrb[5].mxu1 }
 0x107   : > { %v415_v49 = vpop.f32.mrb[6].mxu0  ;;  %v447_v50 = vpop.f32.mrb[6].mxu1 }
 0x108   : > { %v469_v51 = vmax.f32 %v413_v45, 0.0  ;;  %v477_v52 = vmax.f32 %v445_v46, 0.0  ;;  %v416_v53 = vadd.f32 %v763_v26, %v415_v49  ;;  %v448_v54 = vadd.f32 %v763_v26, %v447_v50  ;;  %v417_v55 = vpop.f32.mrb[7].mxu0  ;;  %v449_v56 = vpop.f32.mrb[7].mxu1 }
 0x10a   : > { %485 = vst.msk [vmem:[%s772_s15 + $0x10] sm:$0xff] %vm345_vm0, %v469_v51  ;;  %493 = vst.msk [vmem:[%s772_s15 + $0x50] sm:$0xff] %vm345_vm0, %v477_v52  ;;  %v470_v57 = vmax.f32 %v416_v53, 0.0  ;;  %v478_v58 = vmax.f32 %v448_v54, 0.0 }
 0x10c   : > { %486 = vst.msk [vmem:[%s772_s15 + $0x18] sm:$0xff] %vm345_vm0, %v470_v57  ;;  %494 = vst.msk [vmem:[%s772_s15 + $0x58] sm:$0xff] %vm345_vm0, %v478_v58 }
 0x10d   : > { %v420_v59 = vpop.f32.mrb[8].mxu0  ;;  %v452_v60 = vpop.f32.mrb[8].mxu1 }
 0x10e   : > { %v421_v61 = vadd.f32 %v763_v26, %v420_v59  ;;  %v453_v62 = vadd.f32 %v763_v26, %v452_v60  ;;  %v422_v63 = vpop.f32.mrb[9].mxu0  ;;  %v454_v0 = vpop.f32.mrb[9].mxu1 }
 0x10f   : > { %v423_v1 = vpop.f32.mrb[10].mxu0  ;;  %v455_v2 = vpop.f32.mrb[10].mxu1 }
 0x110   : > { %v471_v3 = vmax.f32 %v421_v61, 0.0  ;;  %v479_v4 = vmax.f32 %v453_v62, 0.0  ;;  %v424_v5 = vadd.f32 %v763_v26, %v423_v1  ;;  %v456_v6 = vadd.f32 %v763_v26, %v455_v2  ;;  %v425_v7 = vpop.f32.mrb[11].mxu0  ;;  %v457_v8 = vpop.f32.mrb[11].mxu1 }
 0x112   : > { %487 = vst.msk [vmem:[%s772_s15 + $0x20] sm:$0xff] %vm345_vm0, %v471_v3  ;;  %495 = vst.msk [vmem:[%s772_s15 + $0x60] sm:$0xff] %vm345_vm0, %v479_v4  ;;  %v472_v9 = vmax.f32 %v424_v5, 0.0  ;;  %v480_v10 = vmax.f32 %v456_v6, 0.0 }
 0x114   : > { %488 = vst.msk [vmem:[%s772_s15 + $0x28] sm:$0xff] %vm345_vm0, %v472_v9  ;;  %496 = vst.msk [vmem:[%s772_s15 + $0x68] sm:$0xff] %vm345_vm0, %v480_v10 }
 0x115   : > { %v428_v11 = vpop.f32.mrb[12].mxu0  ;;  %v460_v12 = vpop.f32.mrb[12].mxu1 }
 0x116   : > { %v429_v13 = vadd.f32 %v763_v26, %v428_v11  ;;  %v461_v14 = vadd.f32 %v763_v26, %v460_v12  ;;  %v430_v15 = vpop.f32.mrb[13].mxu0  ;;  %v462_v16 = vpop.f32.mrb[13].mxu1 }
 0x117   : > { %v431_v17 = vpop.f32.mrb[14].mxu0  ;;  %v463_v18 = vpop.f32.mrb[14].mxu1 }
 0x118   : > { %v473_v19 = vmax.f32 %v429_v13, 0.0  ;;  %v481_v20 = vmax.f32 %v461_v14, 0.0  ;;  %v432_v21 = vadd.f32 %v763_v26, %v431_v17  ;;  %v464_v22 = vadd.f32 %v763_v26, %v463_v18  ;;  %v433_v23 = vpop.f32.mrb[15].mxu0  ;;  %v465_v24 = vpop.f32.mrb[15].mxu1 }
 0x11a   : > { %489 = vst.msk [vmem:[%s772_s15 + $0x30] sm:$0xff] %vm345_vm0, %v473_v19  ;;  %497 = vst.msk [vmem:[%s772_s15 + $0x70] sm:$0xff] %vm345_vm0, %v481_v20  ;;  %v474_v25 = vmax.f32 %v432_v21, 0.0  ;;  %v482_v27 = vmax.f32 %v464_v22, 0.0 }
 0x11c   : > { %490 = vst.msk [vmem:[%s772_s15 + $0x38] sm:$0xff] %vm345_vm0, %v474_v25  ;;  %498 = vst.msk [vmem:[%s772_s15 + $0x78] sm:$0xff] %vm345_vm0, %v482_v27 }
 0x11d PF: > { %s13_s12 = sadd.s32 1, %s668_s12  }
 0x11e   : > { %p10_p4 = scmp.ge.s32.totalorder %s13_s12, 6  }
 0x120   :  { %12 = sbr.rel (!%p10_p4) target bundleno = 1 (0x1), region = 62 }

// kernel: simclr_forward.16
= control target key start
LH: loop header
LB: loop body
LE: loop exit
PB: predicated region body
PF: predicated region fallthrough
CT: control target
= control target key end

     0   :  { %s791_s15 = smov 0   ;;  %s942_s0 = inlined_call_operand.vmem [shape: bf16[512,144], index: 0, kind: input, shape index: {}]   ;;  %s943_s1 = inlined_call_operand.vmem [shape: bf16[144,16], index: 1, kind: input, shape index: {}]   ;;  %s944_s2 = inlined_call_operand.vmem [shape: f32[1,16], index: 2, kind: input, shape index: {}]   ;;  %s945_s3 = inlined_call_operand.vmem [shape: f32[512,16], index: 3, kind: input, shape index: {}]   ;;  %s946_s4 = inlined_call_operand.vmem [shape: f32[512,16], index: 4, kind: output, shape index: {}]  }
   0x1 LB: > { %s648_s16 = sadd.s32 4294967295, %s763_s15   ;;  %p652_p0 = scmp.ge.s32.totalorder %s763_s15, 1  ;;  %s763_s15 = sphi %s791_s15, %s14_s15  }
   0x2   : > { %p175_p1 = scmp.lt.s32.totalorder %s763_s15, 5 }
   0x4   : > { %p176_p2 = pnand %p652_p0, %p175_p1 }
   0x5   : > { %v724_v0 = vld [vmem:[%s943_s1] sm:$0xff] (!%p176_p2)   ;;  %v765_v1 = vmov (!%p176_p2), 0   ;;  %s653_s19 = sshll.u32 (!%p176_p2), %s648_s16, 4  ;;  %v725_v2 = vld [vmem:[%s943_s1 + $0x8] sm:$0xff] (!%p176_p2)   ;;  %v726_v3 = vld [vmem:[%s943_s1 + $0x10] sm:$0xff] (!%p176_p2)   ;;  %vm394_vm0 = vcmask (!%p176_p2), 130048  }
   0x6   : > { %179 = sbr.rel (%p176_p2) target bundleno = 287 (0x11f), region = 36  ;;  %419 = vmatprep.subr.bf16.mxu0 (!%p176_p2), %v765_v1  ;;  %697 = vmatprep.subr.bf16.mxu1 (!%p176_p2), %v765_v1  ;;  %p208_p3 = scmp.lt.s32.totalorder (!%p176_p2), %s653_s19, 63  ;;  %v727_v4 = vld [vmem:[%s943_s1 + $0x18] sm:$0xff] (!%p176_p2)   ;;  %v728_v7 = vld [vmem:[%s943_s1 + $0x20] sm:$0xff] (!%p176_p2)   ;;  %v729_v8 = vld [vmem:[%s943_s1 + $0x28] sm:$0xff] (!%p176_p2)  }
   0x7   : > { %420 = vmatpush1.bf16.msra.mxu0 (!%p176_p2), %v724_v0  ;;  %706 = vmatpush1.bf16.msra.mxu1 (!%p176_p2), %v724_v0  ;;  %v730_v9 = vld [vmem:[%s943_s1 + $0x30] sm:$0xff] (!%p176_p2)   ;;  %v731_v10 = vld [vmem:[%s943_s1 + $0x38] sm:$0xff] (!%p176_p2)   ;;  %v732_v11 = vld [vmem:[%s943_s1 + $0x40] sm:$0xff] (!%p176_p2)  }
   0x8   : > { %421 = vmatprep.subr.bf16.mxu0 (!%p176_p2), %v765_v1  ;;  %698 = vmatprep.subr.bf16.mxu1 (!%p176_p2), %v765_v1  ;;  %v867_v26 = vld [vmem:[%s944_s2] ss:$0 sm:$0xff] (!%p176_p2) }
   0xb   : > { %422 = vmatpush1.bf16.msra.mxu0 (!%p176_p2), %v725_v2  ;;  %707 = vmatpush1.bf16.msra.mxu1 (!%p176_p2), %v725_v2 }
   0xc   : > { %423 = vmatprep.subr.bf16.mxu0 (!%p176_p2), %v765_v1  ;;  %699 = vmatprep.subr.bf16.mxu1 (!%p176_p2), %v765_v1 }
   0xd   : > { %s948_s19 = smov (!%p208_p3, %s653_s19), 63 }
   0xe   : > { %s808_s24 = sshll.u32 %s948_s19, 3 }
   0xf   : > { %s814_s27 = scalar_lea.vmem %s942_s0, %s808_s24  ;;  %424 = vmatpush1.bf16.msra.mxu0 %v726_v3  ;;  %708 = vmatpush1.bf16.msra.mxu1 %v726_v3  ;;  %s862_s17 = scalar_lea.vmem %s945_s3, %s808_s24 }
  0x10   : > { %v735_v5 = vld [vmem:[%s814_s27 + $0x4] ss:$8 sps:$4 sm:$0xff]   ;;  %425 = vmatprep.subr.bf16.mxu0 %v765_v1  ;;  %700 = vmatprep.subr.bf16.mxu1 %v765_v1  ;;  %v733_v12 = vld [vmem:[%s814_s27] ss:$8 sps:$4 sm:$0xff]   ;;  %v739_v14 = vld [vmem:[%s814_s27 + $0x14] ss:$8 sps:$4 sm:$0xff]   ;;  %s881_s22 = scalar_lea.vmem %s946_s4, %s808_s24 }
  0x11   : > { %v738_v6 = vld [vmem:[%s814_s27 + $0x44] ss:$8 sps:$4 sm:$0xff]   ;;  %686 = vmatprep.mubr.msk.bf16.mxu0 %vm394_vm0, %v735_v5  ;;  %v736_v13 = vld [vmem:[%s814_s27 + $0x40] ss:$8 sps:$4 sm:$0xff]   ;;  %v741_v15 = vld [vmem:[%s814_s27 + $0x54] ss:$8 sps:$4 sm:$0xff]  }
  0x12   : > { %690 = vmatprep.mubr.msk.bf16.mxu1 %vm394_vm0, %v738_v6  ;;  %v743_v16 = vld [vmem:[%s814_s27 + $0x10] ss:$8 sps:$4 sm:$0xff]   ;;  %v745_v18 = vld [vmem:[%s814_s27 + $0x24] ss:$8 sps:$4 sm:$0xff]   ;;  %v749_v20 = vld [vmem:[%s814_s27 + $0x20] ss:$8 sps:$4 sm:$0xff]  }
  0x13   : > { %426 = vmatpush1.bf16.msra.mxu0 %v727_v4  ;;  %709 = vmatpush1.bf16.msra.mxu1 %v727_v4  ;;  %v744_v17 = vld [vmem:[%s814_s27 + $0x50] ss:$8 sps:$4 sm:$0xff]   ;;  %v747_v19 = vld [vmem:[%s814_s27 + $0x64] ss:$8 sps:$4 sm:$0xff]   ;;  %v750_v21 = vld [vmem:[%s814_s27 + $0x60] ss:$8 sps:$4 sm:$0xff]  }
  0x14   : > { %427 = vmatprep.subr.bf16.mxu0 %v765_v1  ;;  %701 = vmatprep.subr.bf16.mxu1 %v765_v1  ;;  %v751_v22 = vld [vmem:[%s814_s27 + $0x34] ss:$8 sps:$4 sm:$0xff]   ;;  %v755_v24 = vld [vmem:[%s814_s27 + $0x30] ss:$8 sps:$4 sm:$0xff]   ;;  %v516_v28 = vld [vmem:[%s862_s17] sm:$0xff] }
  0x15   : > { %v753_v23 = vld [vmem:[%s814_s27 + $0x74] ss:$8 sps:$4 sm:$0xff]   ;;  %v756_v25 = vld [vmem:[%s814_s27 + $0x70] ss:$8 sps:$4 sm:$0xff]   ;;  %v524_v30 = vld [vmem:[%s862_s17 + $0x40] sm:$0xff] }
  0x16   : > { %v517_v36 = vld [vmem:[%s862_s17 + $0x8] sm:$0xff]  ;;  %v518_v52 = vld [vmem:[%s862_s17 + $0x10] sm:$0xff]  ;;  %v519_v60 = vld [vmem:[%s862_s17 + $0x18] sm:$0xff] }
  0x17   : > { %428 = vmatpush1.bf16.msra.mxu0 %v728_v7  ;;  %710 = vmatpush1.bf16.msra.mxu1 %v728_v7  ;;  %v525_v38 = vld [vmem:[%s862_s17 + $0x48] sm:$0xff]  ;;  %v526_v54 = vld [vmem:[%s862_s17 + $0x50] sm:$0xff]  ;;  %v527_v62 = vld [vmem:[%s862_s17 + $0x58] sm:$0xff] }
  0x18   : > { %429 = vmatprep.subr.bf16.mxu0 %v765_v1  ;;  %702 = vmatprep.subr.bf16.mxu1 %v765_v1 }
  0x1b   : > { %430 = vmatpush1.bf16.msra.mxu0 %v729_v8  ;;  %711 = vmatpush1.bf16.msra.mxu1 %v729_v8 }
  0x1c   : > { %431 = vmatprep.subr.bf16.mxu0 %v765_v1  ;;  %703 = vmatprep.subr.bf16.mxu1 %v765_v1 }
  0x1f   : > { %432 = vmatpush1.bf16.msra.mxu0 %v730_v9  ;;  %712 = vmatpush1.bf16.msra.mxu1 %v730_v9 }
  0x20   : > { %433 = vmatprep.subr.bf16.mxu0 %v765_v1  ;;  %704 = vmatprep.subr.bf16.mxu1 %v765_v1 }
  0x23   : > { %434 = vmatpush1.bf16.msra.mxu0 %v731_v10  ;;  %713 = vmatpush1.bf16.msra.mxu1 %v731_v10 }
  0x24   : > { %435 = vmatprep.subr.bf16.mxu0 %v765_v1  ;;  %705 = vmatprep.subr.bf16.mxu1 %v765_v1 }
  0x27   : > { %436 = vmatpush1.bf16.msra.mxu0 %v732_v11  ;;  %714 = vmatpush1.bf16.msra.mxu1 %v732_v11 }
  0x2a   : > { %452 = vmatmul.mubr.bf16.vlgmr.msra.gmra.mrb[0].mxu0 %v733_v12  ;;  %484 = vmatmul.mubr.bf16.vlgmr.msra.gmra.mrb[0].mxu1 %v736_v13  ;;  %v520_v12 = vld [vmem:[%s862_s17 + $0x20] sm:$0xff] }
  0x2b   : > { %687 = vmatprep.mubr.msk.bf16.mxu0 %vm394_vm0, %v739_v14  ;;  %691 = vmatprep.mubr.msk.bf16.mxu1 %vm394_vm0, %v741_v15  ;;  %v528_v14 = vld [vmem:[%s862_s17 + $0x60] sm:$0xff] }
  0x32   : > { %460 = vmatmul.mubr.bf16.gmra.mrb[4].mxu0 %v743_v16  ;;  %492 = vmatmul.mubr.bf16.gmra.mrb[4].mxu1 %v744_v17 }
  0x33   : > { %688 = vmatprep.mubr.msk.bf16.mxu0 %vm394_vm0, %v745_v18  ;;  %692 = vmatprep.mubr.msk.bf16.mxu1 %vm394_vm0, %v747_v19 }
  0x3a   : > { %468 = vmatmul.mubr.bf16.gmra.mrb[8].mxu0 %v749_v20  ;;  %500 = vmatmul.mubr.bf16.gmra.mrb[8].mxu1 %v750_v21  ;;  %v521_v20 = vld [vmem:[%s862_s17 + $0x28] sm:$0xff] }
  0x3b   : > { %689 = vmatprep.mubr.msk.bf16.mxu0 %vm394_vm0, %v751_v22  ;;  %693 = vmatprep.mubr.msk.bf16.mxu1 %vm394_vm0, %v753_v23  ;;  %v529_v22 = vld [vmem:[%s862_s17 + $0x68] sm:$0xff] }
  0x42   : > { %476 = vmatmul.mubr.bf16.gmra.mrb[12].mxu0 %v755_v24  ;;  %508 = vmatmul.mubr.bf16.gmra.mrb[12].mxu1 %v756_v25 }
  0xfd   : > { %v453_v27 = vpop.f32.mrb[0].mxu0  ;;  %v485_v29 = vpop.f32.mrb[0].mxu1 }
  0xfe   : > { %v454_v31 = vadd.f32 %v867_v26, %v453_v27  ;;  %v486_v32 = vadd.f32 %v867_v26, %v485_v29  ;;  %v455_v33 = vpop.f32.mrb[1].mxu0  ;;  %v487_v34 = vpop.f32.mrb[1].mxu1 }
  0xff   : > { %v456_v35 = vpop.f32.mrb[2].mxu0  ;;  %v488_v37 = vpop.f32.mrb[2].mxu1 }
 0x100   : > { %v532_v39 = vadd.f32 %v516_v28, %v454_v31  ;;  %v540_v40 = vadd.f32 %v524_v30, %v486_v32  ;;  %v457_v41 = vadd.f32 %v867_v26, %v456_v35  ;;  %v489_v42 = vadd.f32 %v867_v26, %v488_v37  ;;  %v458_v43 = vpop.f32.mrb[3].mxu0  ;;  %v490_v44 = vpop.f32.mrb[3].mxu1  ;;  %v522_v37 = vld [vmem:[%s862_s17 + $0x30] sm:$0xff] }
 0x102   : > { %v548_v45 = vmax.f32 %v532_v39, 0.0  ;;  %v556_v46 = vmax.f32 %v540_v40, 0.0  ;;  %v533_v47 = vadd.f32 %v517_v36, %v457_v41  ;;  %v541_v48 = vadd.f32 %v525_v38, %v489_v42  ;;  %v530_v39 = vld [vmem:[%s862_s17 + $0x70] sm:$0xff] }
 0x104   : > { %564 = vst.msk [vmem:[%s881_s22] sm:$0xff] %vm394_vm0, %v548_v45  ;;  %572 = vst.msk [vmem:[%s881_s22 + $0x40] sm:$0xff] %vm394_vm0, %v556_v46  ;;  %v549_v49 = vmax.f32 %v533_v47, 0.0  ;;  %v557_v50 = vmax.f32 %v541_v48, 0.0  ;;  %v523_v45 = vld [vmem:[%s862_s17 + $0x38] sm:$0xff] }
 0x105   : > { %v461_v51 = vpop.f32.mrb[4].mxu0  ;;  %v493_v53 = vpop.f32.mrb[4].mxu1  ;;  %v531_v47 = vld [vmem:[%s862_s17 + $0x78] sm:$0xff] }
 0x106   : > { %565 = vst.msk [vmem:[%s881_s22 + $0x8] sm:$0xff] %vm394_vm0, %v549_v49  ;;  %573 = vst.msk [vmem:[%s881_s22 + $0x48] sm:$0xff] %vm394_vm0, %v557_v50  ;;  %v462_v55 = vadd.f32 %v867_v26, %v461_v51  ;;  %v494_v56 = vadd.f32 %v867_v26, %v493_v53  ;;  %v463_v57 = vpop.f32.mrb[5].mxu0  ;;  %v495_v58 = vpop.f32.mrb[5].mxu1 }
 0x107   : > { %v464_v59 = vpop.f32.mrb[6].mxu0  ;;  %v496_v61 = vpop.f32.mrb[6].mxu1 }
 0x108   : > { %v534_v63 = vadd.f32 %v518_v52, %v462_v55  ;;  %v542_v0 = vadd.f32 %v526_v54, %v494_v56  ;;  %v465_v1 = vadd.f32 %v867_v26, %v464_v59  ;;  %v497_v2 = vadd.f32 %v867_v26, %v496_v61  ;;  %v466_v3 = vpop.f32.mrb[7].mxu0  ;;  %v498_v4 = vpop.f32.mrb[7].mxu1 }
 0x10a   : > { %v550_v5 = vmax.f32 %v534_v63, 0.0  ;;  %v558_v6 = vmax.f32 %v542_v0, 0.0  ;;  %v535_v7 = vadd.f32 %v519_v60, %v465_v1  ;;  %v543_v8 = vadd.f32 %v527_v62, %v497_v2 }
 0x10c   : > { %566 = vst.msk [vmem:[%s881_s22 + $0x10] sm:$0xff] %vm394_vm0, %v550_v5  ;;  %574 = vst.msk [vmem:[%s881_s22 + $0x50] sm:$0xff] %vm394_vm0, %v558_v6  ;;  %v551_v9 = vmax.f32 %v535_v7, 0.0  ;;  %v559_v10 = vmax.f32 %v543_v8, 0.0 }
 0x10d   : > { %v469_v11 = vpop.f32.mrb[8].mxu0  ;;  %v501_v13 = vpop.f32.mrb[8].mxu1 }
 0x10e   : > { %567 = vst.msk [vmem:[%s881_s22 + $0x18] sm:$0xff] %vm394_vm0, %v551_v9  ;;  %575 = vst.msk [vmem:[%s881_s22 + $0x58] sm:$0xff] %vm394_vm0, %v559_v10  ;;  %v470_v15 = vadd.f32 %v867_v26, %v469_v11  ;;  %v502_v16 = vadd.f32 %v867_v26, %v501_v13  ;;  %v471_v17 = vpop.f32.mrb[9].mxu0  ;;  %v503_v18 = vpop.f32.mrb[9].mxu1 }
 0x10f   : > { %v472_v19 = vpop.f32.mrb[10].mxu0  ;;  %v504_v21 = vpop.f32.mrb[10].mxu1 }
 0x110   : > { %v536_v23 = vadd.f32 %v520_v12, %v470_v15  ;;  %v544_v24 = vadd.f32 %v528_v14, %v502_v16  ;;  %v473_v25 = vadd.f32 %v867_v26, %v472_v19  ;;  %v505_v27 = vadd.f32 %v867_v26, %v504_v21  ;;  %v474_v28 = vpop.f32.mrb[11].mxu0  ;;  %v506_v29 = vpop.f32.mrb[11].mxu1 }
 0x112   : > { %v552_v30 = vmax.f32 %v536_v23, 0.0  ;;  %v560_v31 = vmax.f32 %v544_v24, 0.0  ;;  %v537_v32 = vadd.f32 %v521_v20, %v473_v25  ;;  %v545_v33 = vadd.f32 %v529_v22, %v505_v27 }
 0x114   : > { %568 = vst.msk [vmem:[%s881_s22 + $0x20] sm:$0xff] %vm394_vm0, %v552_v30  ;;  %576 = vst.msk [vmem:[%s881_s22 + $0x60] sm:$0xff] %vm394_vm0, %v560_v31  ;;  %v553_v34 = vmax.f32 %v537_v32, 0.0  ;;  %v561_v35 = vmax.f32 %v545_v33, 0.0 }
 0x115   : > { %v477_v36 = vpop.f32.mrb[12].mxu0  ;;  %v509_v38 = vpop.f32.mrb[12].mxu1 }
 0x116   : > { %569 = vst.msk [vmem:[%s881_s22 + $0x28] sm:$0xff] %vm394_vm0, %v553_v34  ;;  %577 = vst.msk [vmem:[%s881_s22 + $0x68] sm:$0xff] %vm394_vm0, %v561_v35  ;;  %v478_v40 = vadd.f32 %v867_v26, %v477_v36  ;;  %v510_v41 = vadd.f32 %v867_v26, %v509_v38  ;;  %v479_v42 = vpop.f32.mrb[13].mxu0  ;;  %v511_v43 = vpop.f32.mrb[13].mxu1 }
 0x117   : > { %v480_v44 = vpop.f32.mrb[14].mxu0  ;;  %v512_v46 = vpop.f32.mrb[14].mxu1 }
 0x118   : > { %v538_v48 = vadd.f32 %v522_v37, %v478_v40  ;;  %v546_v49 = vadd.f32 %v530_v39, %v510_v41  ;;  %v481_v50 = vadd.f32 %v867_v26, %v480_v44  ;;  %v513_v51 = vadd.f32 %v867_v26, %v512_v46  ;;  %v482_v52 = vpop.f32.mrb[15].mxu0  ;;  %v514_v53 = vpop.f32.mrb[15].mxu1 }
 0x11a   : > { %v554_v54 = vmax.f32 %v538_v48, 0.0  ;;  %v562_v55 = vmax.f32 %v546_v49, 0.0  ;;  %v539_v56 = vadd.f32 %v523_v45, %v481_v50  ;;  %v547_v57 = vadd.f32 %v531_v47, %v513_v51 }
 0x11c   : > { %570 = vst.msk [vmem:[%s881_s22 + $0x30] sm:$0xff] %vm394_vm0, %v554_v54  ;;  %578 = vst.msk [vmem:[%s881_s22 + $0x70] sm:$0xff] %vm394_vm0, %v562_v55  ;;  %v555_v58 = vmax.f32 %v539_v56, 0.0  ;;  %v563_v59 = vmax.f32 %v547_v57, 0.0 }
 0x11e   : > { %571 = vst.msk [vmem:[%s881_s22 + $0x38] sm:$0xff] %vm394_vm0, %v555_v58  ;;  %579 = vst.msk [vmem:[%s881_s22 + $0x78] sm:$0xff] %vm394_vm0, %v563_v59 }
 0x11f PF: > { %s14_s15 = sadd.s32 1, %s763_s15  }
 0x120   : > { %p11_p4 = scmp.ge.s32.totalorder %s14_s15, 6  }
 0x122   :  { %13 = sbr.rel (!%p11_p4) target bundleno = 1 (0x1), region = 69 }

// kernel: simclr_forward.19
= control target key start
LH: loop header
LB: loop body
LE: loop exit
PB: predicated region body
PF: predicated region fallthrough
CT: control target
= control target key end

     0   :  { %v427_v0 = vmov 0   ;;  %vm182_vm0 = vcmask 130048   ;;  %vm320_vm1 = vcmask 261120   ;;  %s616_s1 = inlined_call_operand.vmem [shape: bf16[144,32], index: 1, kind: input, shape index: {}]   ;;  %s617_s0 = inlined_call_operand.vmem [shape: bf16[128,144], index: 0, kind: input, shape index: {}]   ;;  %s618_s2 = inlined_call_operand.vmem [shape: f32[1,32], index: 2, kind: input, shape index: {}]   ;;  %s619_s3 = inlined_call_operand.vmem [shape: f32[128,32], index: 3, kind: output, shape index: {}]  }
   0x1   :  { %207 = vmatprep.subr.bf16.mxu0 %v427_v0  ;;  %375 = vmatprep.subr.bf16.mxu1 %v427_v0  ;;  %v394_v1 = vld [vmem:[%s616_s1] sm:$0xff]   ;;  %v395_v2 = vld [vmem:[%s616_s1 + $0x8] sm:$0xff]   ;;  %v396_v3 = vld [vmem:[%s616_s1 + $0x10] sm:$0xff]  }
   0x2   :  { %208 = vmatpush1.bf16.msra.mxu0 %v394_v1  ;;  %384 = vmatpush1.bf16.msra.mxu1 %v394_v1  ;;  %v397_v4 = vld [vmem:[%s616_s1 + $0x18] sm:$0xff]   ;;  %v405_v5 = vld [vmem:[%s617_s0 + $0x4] ss:$8 sps:$4 sm:$0xff]   ;;  %v400_v9 = vld [vmem:[%s616_s1 + $0x30] sm:$0xff]  }
   0x3   :  { %209 = vmatprep.subr.bf16.mxu0 %v427_v0  ;;  %376 = vmatprep.subr.bf16.mxu1 %v427_v0  ;;  %v408_v6 = vld [vmem:[%s617_s0 + $0x44] ss:$8 sps:$4 sm:$0xff]   ;;  %v401_v10 = vld [vmem:[%s616_s1 + $0x38] sm:$0xff]   ;;  %v403_v12 = vld [vmem:[%s617_s0] ss:$8 sps:$4 sm:$0xff]  }
   0x4   :  { %367 = vmatprep.mubr.msk.bf16.mxu0 %vm182_vm0, %v405_v5  ;;  %371 = vmatprep.mubr.msk.bf16.mxu1 %vm182_vm0, %v408_v6  ;;  %v398_v7 = vld [vmem:[%s616_s1 + $0x20] sm:$0xff]   ;;  %v399_v8 = vld [vmem:[%s616_s1 + $0x28] sm:$0xff]   ;;  %v409_v14 = vld [vmem:[%s617_s0 + $0x14] ss:$8 sps:$4 sm:$0xff]  }
   0x5   :  { %v402_v11 = vld [vmem:[%s616_s1 + $0x40] sm:$0xff]   ;;  %v411_v15 = vld [vmem:[%s617_s0 + $0x54] ss:$8 sps:$4 sm:$0xff]   ;;  %v413_v16 = vld [vmem:[%s617_s0 + $0x10] ss:$8 sps:$4 sm:$0xff]  }
   0x6   :  { %210 = vmatpush1.bf16.msra.mxu0 %v395_v2  ;;  %385 = vmatpush1.bf16.msra.mxu1 %v395_v2  ;;  %v406_v13 = vld [vmem:[%s617_s0 + $0x40] ss:$8 sps:$4 sm:$0xff]   ;;  %v414_v17 = vld [vmem:[%s617_s0 + $0x50] ss:$8 sps:$4 sm:$0xff]   ;;  %v415_v18 = vld [vmem:[%s617_s0 + $0x24] ss:$8 sps:$4 sm:$0xff]  }
   0x7   :  { %211 = vmatprep.subr.bf16.mxu0 %v427_v0  ;;  %377 = vmatprep.subr.bf16.mxu1 %v427_v0  ;;  %v417_v19 = vld [vmem:[%s617_s0 + $0x64] ss:$8 sps:$4 sm:$0xff]   ;;  %v419_v20 = vld [vmem:[%s617_s0 + $0x20] ss:$8 sps:$4 sm:$0xff]   ;;  %v421_v22 = vld [vmem:[%s617_s0 + $0x34] ss:$8 sps:$4 sm:$0xff]  }
   0x8   :  { %v420_v21 = vld [vmem:[%s617_s0 + $0x60] ss:$8 sps:$4 sm:$0xff]   ;;  %v423_v23 = vld [vmem:[%s617_s0 + $0x74] ss:$8 sps:$4 sm:$0xff]   ;;  %v425_v24 = vld [vmem:[%s617_s0 + $0x30] ss:$8 sps:$4 sm:$0xff]  }
   0x9   :  { %v426_v25 = vld [vmem:[%s617_s0 + $0x70] ss:$8 sps:$4 sm:$0xff]   ;;  %v534_v26 = vld [vmem:[%s618_s2] ss:$0 sm:$0xff] }
   0xa   :  { %212 = vmatpush1.bf16.msra.mxu0 %v396_v3  ;;  %386 = vmatpush1.bf16.msra.mxu1 %v396_v3 }
   0xb   :  { %213 = vmatprep.subr.bf16.mxu0 %v427_v0  ;;  %378 = vmatprep.subr.bf16.mxu1 %v427_v0 }
   0xe   :  { %214 = vmatpush1.bf16.msra.mxu0 %v397_v4  ;;  %387 = vmatpush1.bf16.msra.mxu1 %v397_v4 }
   0xf   :  { %215 = vmatprep.subr.bf16.mxu0 %v427_v0  ;;  %379 = vmatprep.subr.bf16.mxu1 %v427_v0 }
  0x12   :  { %216 = vmatpush1.bf16.msra.mxu0 %v398_v7  ;;  %388 = vmatpush1.bf16.msra.mxu1 %v398_v7 }
  0x13   :  { %217 = vmatprep.subr.bf16.mxu0 %v427_v0  ;;  %380 = vmatprep.subr.bf16.mxu1 %v427_v0 }
  0x16   :  { %218 = vmatpush1.bf16.msra.mxu0 %v399_v8  ;;  %389 = vmatpush1.bf16.msra.mxu1 %v399_v8 }
  0x17   :  { %219 = vmatprep.subr.bf16.mxu0 %v427_v0  ;;  %381 = vmatprep.subr.bf16.mxu1 %v427_v0 }
  0x1a   :  { %220 = vmatpush1.bf16.msra.mxu0 %v400_v9  ;;  %390 = vmatpush1.bf16.msra.mxu1 %v400_v9 }
  0x1b   :  { %221 = vmatprep.subr.bf16.mxu0 %v427_v0  ;;  %382 = vmatprep.subr.bf16.mxu1 %v427_v0 }
  0x1e   :  { %222 = vmatpush1.bf16.msra.mxu0 %v401_v10  ;;  %391 = vmatpush1.bf16.msra.mxu1 %v401_v10 }
  0x1f   :  { %223 = vmatprep.subr.bf16.mxu0 %v427_v0  ;;  %383 = vmatprep.subr.bf16.mxu1 %v427_v0 }
  0x22   :  { %224 = vmatpush1.bf16.msra.mxu0 %v402_v11  ;;  %392 = vmatpush1.bf16.msra.mxu1 %v402_v11 }
  0x25   :  { %240 = vmatmul.mubr.bf16.vlgmr.msra.gmra.mrb[0].mxu0 %v403_v12  ;;  %272 = vmatmul.mubr.bf16.vlgmr.msra.gmra.mrb[0].mxu1 %v406_v13 }
  0x26   :  { %368 = vmatprep.mubr.msk.bf16.mxu0 %vm182_vm0, %v409_v14  ;;  %372 = vmatprep.mubr.msk.bf16.mxu1 %vm182_vm0, %v411_v15 }
  0x2d   :  { %248 = vmatmul.mubr.bf16.gmra.mrb[4].mxu0 %v413_v16  ;;  %280 = vmatmul.mubr.bf16.gmra.mrb[4].mxu1 %v414_v17 }
  0x2e   :  { %369 = vmatprep.mubr.msk.bf16.mxu0 %vm182_vm0, %v415_v18  ;;  %373 = vmatprep.mubr.msk.bf16.mxu1 %vm182_vm0, %v417_v19 }
  0x35   :  { %256 = vmatmul.mubr.bf16.gmra.mrb[8].mxu0 %v419_v20  ;;  %288 = vmatmul.mubr.bf16.gmra.mrb[8].mxu1 %v420_v21 }
  0x36   :  { %370 = vmatprep.mubr.msk.bf16.mxu0 %vm182_vm0, %v421_v22  ;;  %374 = vmatprep.mubr.msk.bf16.mxu1 %vm182_vm0, %v423_v23 }
  0x3d   :  { %264 = vmatmul.mubr.bf16.gmra.mrb[12].mxu0 %v425_v24  ;;  %296 = vmatmul.mubr.bf16.gmra.mrb[12].mxu1 %v426_v25 }
  0xf8   :  { %v241_v27 = vpop.f32.mrb[0].mxu0  ;;  %v273_v28 = vpop.f32.mrb[0].mxu1 }
  0xf9   :  { %v242_v29 = vadd.f32 %v534_v26, %v241_v27  ;;  %v274_v30 = vadd.f32 %v534_v26, %v273_v28  ;;  %v243_v31 = vpop.f32.mrb[1].mxu0  ;;  %v275_v32 = vpop.f32.mrb[1].mxu1 }
  0xfa   :  { %v244_v33 = vpop.f32.mrb[2].mxu0  ;;  %v276_v34 = vpop.f32.mrb[2].mxu1 }
  0xfb   :  { %v304_v35 = vmax.f32 %v242_v29, 0.0  ;;  %v312_v36 = vmax.f32 %v274_v30, 0.0  ;;  %v245_v37 = vadd.f32 %v534_v26, %v244_v33  ;;  %v277_v38 = vadd.f32 %v534_v26, %v276_v34  ;;  %v246_v39 = vpop.f32.mrb[3].mxu0  ;;  %v278_v40 = vpop.f32.mrb[3].mxu1 }
  0xfd   :  { %321 = vst.msk [vmem:[%s619_s3] sm:$0xff] %vm320_vm1, %v304_v35  ;;  %329 = vst.msk [vmem:[%s619_s3 + $0x40] sm:$0xff] %vm320_vm1, %v312_v36  ;;  %v305_v41 = vmax.f32 %v245_v37, 0.0  ;;  %v313_v42 = vmax.f32 %v277_v38, 0.0 }
  0xff   :  { %322 = vst.msk [vmem:[%s619_s3 + $0x8] sm:$0xff] %vm320_vm1, %v305_v41  ;;  %330 = vst.msk [vmem:[%s619_s3 + $0x48] sm:$0xff] %vm320_vm1, %v313_v42 }
 0x100   :  { %v249_v43 = vpop.f32.mrb[4].mxu0  ;;  %v281_v44 = vpop.f32.mrb[4].mxu1 }
 0x101   :  { %v250_v45 = vadd.f32 %v534_v26, %v249_v43  ;;  %v282_v46 = vadd.f32 %v534_v26, %v281_v44  ;;  %v251_v47 = vpop.f32.mrb[5].mxu0  ;;  %v283_v48 = vpop.f32.mrb[5].mxu1 }
 0x102   :  { %v252_v49 = vpop.f32.mrb[6].mxu0  ;;  %v284_v50 = vpop.f32.mrb[6].mxu1 }
 0x103   :  { %v306_v51 = vmax.f32 %v250_v45, 0.0  ;;  %v314_v52 = vmax.f32 %v282_v46, 0.0  ;;  %v253_v53 = vadd.f32 %v534_v26, %v252_v49  ;;  %v285_v54 = vadd.f32 %v534_v26, %v284_v50  ;;  %v254_v55 = vpop.f32.mrb[7].mxu0  ;;  %v286_v56 = vpop.f32.mrb[7].mxu1 }
 0x105   :  { %323 = vst.msk [vmem:[%s619_s3 + $0x10] sm:$0xff] %vm320_vm1, %v306_v51  ;;  %331 = vst.msk [vmem:[%s619_s3 + $0x50] sm:$0xff] %vm320_vm1, %v314_v52  ;;  %v307_v57 = vmax.f32 %v253_v53, 0.0  ;;  %v315_v58 = vmax.f32 %v285_v54, 0.0 }
 0x107   :  { %324 = vst.msk [vmem:[%s619_s3 + $0x18] sm:$0xff] %vm320_vm1, %v307_v57  ;;  %332 = vst.msk [vmem:[%s619_s3 + $0x58] sm:$0xff] %vm320_vm1, %v315_v58 }
 0x108   :  { %v257_v59 = vpop.f32.mrb[8].mxu0  ;;  %v289_v60 = vpop.f32.mrb[8].mxu1 }
 0x109   :  { %v258_v61 = vadd.f32 %v534_v26, %v257_v59  ;;  %v290_v62 = vadd.f32 %v534_v26, %v289_v60  ;;  %v259_v63 = vpop.f32.mrb[9].mxu0  ;;  %v291_v0 = vpop.f32.mrb[9].mxu1 }
 0x10a   :  { %v260_v1 = vpop.f32.mrb[10].mxu0  ;;  %v292_v2 = vpop.f32.mrb[10].mxu1 }
 0x10b   :  { %v308_v3 = vmax.f32 %v258_v61, 0.0  ;;  %v316_v4 = vmax.f32 %v290_v62, 0.0  ;;  %v261_v5 = vadd.f32 %v534_v26, %v260_v1  ;;  %v293_v6 = vadd.f32 %v534_v26, %v292_v2  ;;  %v262_v7 = vpop.f32.mrb[11].mxu0  ;;  %v294_v8 = vpop.f32.mrb[11].mxu1 }
 0x10d   :  { %325 = vst.msk [vmem:[%s619_s3 + $0x20] sm:$0xff] %vm320_vm1, %v308_v3  ;;  %333 = vst.msk [vmem:[%s619_s3 + $0x60] sm:$0xff] %vm320_vm1, %v316_v4  ;;  %v309_v9 = vmax.f32 %v261_v5, 0.0  ;;  %v317_v10 = vmax.f32 %v293_v6, 0.0 }
 0x10f   :  { %326 = vst.msk [vmem:[%s619_s3 + $0x28] sm:$0xff] %vm320_vm1, %v309_v9  ;;  %334 = vst.msk [vmem:[%s619_s3 + $0x68] sm:$0xff] %vm320_vm1, %v317_v10 }
 0x110   :  { %v265_v11 = vpop.f32.mrb[12].mxu0  ;;  %v297_v12 = vpop.f32.mrb[12].mxu1 }
 0x111   :  { %v266_v13 = vadd.f32 %v534_v26, %v265_v11  ;;  %v298_v14 = vadd.f32 %v534_v26, %v297_v12  ;;  %v267_v15 = vpop.f32.mrb[13].mxu0  ;;  %v299_v16 = vpop.f32.mrb[13].mxu1 }
 0x112   :  { %v268_v17 = vpop.f32.mrb[14].mxu0  ;;  %v300_v18 = vpop.f32.mrb[14].mxu1 }
 0x113   :  { %v310_v19 = vmax.f32 %v266_v13, 0.0  ;;  %v318_v20 = vmax.f32 %v298_v14, 0.0  ;;  %v269_v21 = vadd.f32 %v534_v26, %v268_v17  ;;  %v301_v22 = vadd.f32 %v534_v26, %v300_v18  ;;  %v270_v23 = vpop.f32.mrb[15].mxu0  ;;  %v302_v24 = vpop.f32.mrb[15].mxu1 }
 0x115   :  { %327 = vst.msk [vmem:[%s619_s3 + $0x30] sm:$0xff] %vm320_vm1, %v310_v19  ;;  %335 = vst.msk [vmem:[%s619_s3 + $0x70] sm:$0xff] %vm320_vm1, %v318_v20  ;;  %v311_v25 = vmax.f32 %v269_v21, 0.0  ;;  %v319_v27 = vmax.f32 %v301_v22, 0.0 }
 0x117   :  { %328 = vst.msk [vmem:[%s619_s3 + $0x38] sm:$0xff] %vm320_vm1, %v311_v25  ;;  %336 = vst.msk [vmem:[%s619_s3 + $0x78] sm:$0xff] %vm320_vm1, %v319_v27 }

// kernel: simclr_forward.21
= control target key start
LH: loop header
LB: loop body
LE: loop exit
PB: predicated region body
PF: predicated region fallthrough
CT: control target
= control target key end

     0   :  { %vm318_vm0 = vcmask 261120   ;;  %s1035_s1 = inlined_call_operand.vmem [shape: bf16[288,32], index: 1, kind: input, shape index: {}]   ;;  %s1036_s0 = inlined_call_operand.vmem [shape: bf16[128,288], index: 0, kind: input, shape index: {}]   ;;  %s1037_s2 = inlined_call_operand.vmem [shape: f32[1,32], index: 2, kind: input, shape index: {}]   ;;  %s1038_s3 = inlined_call_operand.vmem [shape: f32[128,32], index: 3, kind: output, shape index: {}]  }
   0x1   :  { %v734_v0 = vld [vmem:[%s1035_s1 + $0x40] sm:$0xff]   ;;  %v736_v2 = vld [vmem:[%s1035_s1 + $0x48] sm:$0xff]   ;;  %v738_v4 = vld [vmem:[%s1035_s1 + $0x50] sm:$0xff]  }
   0x2   :  { %v735_v1 = vld [vmem:[%s1035_s1] sm:$0xff]   ;;  %624 = vmatprep.subr.bf16.mxu0 %v734_v0  ;;  %718 = vmatprep.subr.bf16.mxu1 %v734_v0  ;;  %v737_v3 = vld [vmem:[%s1035_s1 + $0x8] sm:$0xff]   ;;  %v739_v5 = vld [vmem:[%s1035_s1 + $0x10] sm:$0xff]  }
   0x3   :  { %625 = vmatpush3.bf16.msra.mxu0 %v735_v1  ;;  %726 = vmatpush3.bf16.msra.mxu1 %v735_v1  ;;  %v740_v6 = vld [vmem:[%s1035_s1 + $0x58] sm:$0xff]   ;;  %v742_v8 = vld [vmem:[%s1035_s1 + $0x60] sm:$0xff]   ;;  %v744_v10 = vld [vmem:[%s1035_s1 + $0x68] sm:$0xff]  }
   0x4   :  { %626 = vmatprep.subr.bf16.mxu0 %v736_v2  ;;  %719 = vmatprep.subr.bf16.mxu1 %v736_v2  ;;  %v741_v7 = vld [vmem:[%s1035_s1 + $0x18] sm:$0xff]   ;;  %v743_v9 = vld [vmem:[%s1035_s1 + $0x20] sm:$0xff]   ;;  %v745_v13 = vld [vmem:[%s1035_s1 + $0x28] sm:$0xff]  }
   0x5   :  { %v752_v11 = vld [vmem:[%s1036_s0 + $0x4] ss:$12 sps:$4 sm:$0xff]   ;;  %v755_v12 = vld [vmem:[%s1036_s0 + $0x94] ss:$12 sps:$4 sm:$0xff]   ;;  %v748_v16 = vld [vmem:[%s1035_s1 + $0x78] sm:$0xff]  }
   0x6   :  { %v746_v14 = vld [vmem:[%s1035_s1 + $0x70] sm:$0xff]   ;;  %375 = vmatprep.mubr.bf16.mxu0 %v752_v11  ;;  %423 = vmatprep.mubr.bf16.mxu1 %v755_v12  ;;  %v749_v17 = vld [vmem:[%s1035_s1 + $0x38] sm:$0xff]   ;;  %v750_v18 = vld [vmem:[%s1036_s0] ss:$12 sps:$4 sm:$0xff]  }
   0x7   :  { %627 = vmatpush3.bf16.msra.mxu0 %v737_v3  ;;  %727 = vmatpush3.bf16.msra.mxu1 %v737_v3  ;;  %v747_v15 = vld [vmem:[%s1035_s1 + $0x30] sm:$0xff]   ;;  %v756_v19 = vld [vmem:[%s1035_s1 + $0x80] sm:$0xff]   ;;  %v757_v21 = vld [vmem:[%s1036_s0 + $0x1c] ss:$12 sps:$4 sm:$0xff]  }
   0x8   :  { %628 = vmatprep.subr.bf16.mxu0 %v738_v4  ;;  %720 = vmatprep.subr.bf16.mxu1 %v738_v4  ;;  %v753_v20 = vld [vmem:[%s1036_s0 + $0x90] ss:$12 sps:$4 sm:$0xff]   ;;  %v759_v22 = vld [vmem:[%s1036_s0 + $0xac] ss:$12 sps:$4 sm:$0xff]   ;;  %v762_v25 = vld [vmem:[%s1036_s0 + $0xa8] ss:$12 sps:$4 sm:$0xff]  }
   0x9   :  { %v763_v23 = vld [vmem:[%s1035_s1 + $0x88] sm:$0xff]   ;;  %v761_v24 = vld [vmem:[%s1036_s0 + $0x18] ss:$12 sps:$4 sm:$0xff]   ;;  %v764_v26 = vld [vmem:[%s1036_s0 + $0x34] ss:$12 sps:$4 sm:$0xff]  }
   0xa   :  { %v766_v27 = vld [vmem:[%s1036_s0 + $0x8] ss:$12 sps:$4 sm:$0xff]   ;;  %v767_v28 = vld [vmem:[%s1036_s0 + $0x30] ss:$12 sps:$4 sm:$0xff]   ;;  %v768_v29 = vld [vmem:[%s1036_s0 + $0x20] ss:$12 sps:$4 sm:$0xff]  }
   0xb   :  { %629 = vmatpush3.bf16.msra.mxu0 %v739_v5  ;;  %728 = vmatpush3.bf16.msra.mxu1 %v739_v5  ;;  %v769_v30 = vld [vmem:[%s1036_s0 + $0x4c] ss:$12 sps:$4 sm:$0xff]   ;;  %v772_v32 = vld [vmem:[%s1036_s0 + $0x48] ss:$12 sps:$4 sm:$0xff]   ;;  %v773_v33 = vld [vmem:[%s1036_s0 + $0x50] ss:$12 sps:$4 sm:$0xff]  }
   0xc   :  { %630 = vmatprep.subr.bf16.mxu0 %v740_v6  ;;  %721 = vmatprep.subr.bf16.mxu1 %v740_v6  ;;  %v771_v31 = vld [vmem:[%s1036_s0 + $0x38] ss:$12 sps:$4 sm:$0xff]   ;;  %v776_v35 = vld [vmem:[%s1036_s0 + $0x68] ss:$12 sps:$4 sm:$0xff]   ;;  %v777_v36 = vld [vmem:[%s1036_s0 + $0x60] ss:$12 sps:$4 sm:$0xff]  }
   0xd   :  { %v774_v34 = vld [vmem:[%s1036_s0 + $0x64] ss:$12 sps:$4 sm:$0xff]   ;;  %v778_v37 = vld [vmem:[%s1036_s0 + $0x80] ss:$12 sps:$4 sm:$0xff]   ;;  %v779_v38 = vld [vmem:[%s1036_s0 + $0x7c] ss:$12 sps:$4 sm:$0xff]  }
   0xe   :  { %v781_v39 = vld [vmem:[%s1036_s0 + $0x98] ss:$12 sps:$4 sm:$0xff]   ;;  %v783_v41 = vld [vmem:[%s1036_s0 + $0xb0] ss:$12 sps:$4 sm:$0xff]   ;;  %v949_v2 = vld [vmem:[%s1037_s2] ss:$0 sm:$0xff] }
   0xf   :  { %631 = vmatpush3.bf16.msra.mxu0 %v741_v7  ;;  %729 = vmatpush3.bf16.msra.mxu1 %v741_v7  ;;  %v782_v40 = vld [vmem:[%s1036_s0 + $0x78] ss:$12 sps:$4 sm:$0xff]  }
  0x10   :  { %632 = vmatprep.subr.bf16.mxu0 %v742_v8  ;;  %722 = vmatprep.subr.bf16.mxu1 %v742_v8 }
  0x13   :  { %633 = vmatpush3.bf16.msra.mxu0 %v743_v9  ;;  %730 = vmatpush3.bf16.msra.mxu1 %v743_v9 }
  0x14   :  { %634 = vmatprep.subr.bf16.mxu0 %v744_v10  ;;  %723 = vmatprep.subr.bf16.mxu1 %v744_v10 }
  0x17   :  { %635 = vmatpush3.bf16.msra.mxu0 %v745_v13  ;;  %731 = vmatpush3.bf16.msra.mxu1 %v745_v13 }
  0x18   :  { %636 = vmatprep.subr.bf16.mxu0 %v746_v14  ;;  %724 = vmatprep.subr.bf16.mxu1 %v746_v14 }
  0x1b   :  { %637 = vmatpush3.bf16.msra.mxu0 %v747_v15  ;;  %732 = vmatpush3.bf16.msra.mxu1 %v747_v15 }
  0x1c   :  { %638 = vmatprep.subr.bf16.mxu0 %v748_v16  ;;  %725 = vmatprep.subr.bf16.mxu1 %v748_v16 }
  0x1f   :  { %639 = vmatpush3.bf16.msra.mxu0 %v749_v17  ;;  %733 = vmatpush3.bf16.msra.mxu1 %v749_v17 }
  0x20   :  { %698 = vmatprep.subr.bf16.mxu1 %v756_v19 }
  0x22   :  { %376 = vmatmul.mubr.bf16.vlgmr.msra.gmra.mrb[0].mxu0 %v750_v18  ;;  %424 = vmatmul.mubr.bf16.vlgmr.msra.gmra.mrb[0].mxu1 %v753_v20 }
  0x23   :  { %699 = vmatpush3.bf16.msra.mxu1 %v756_v19  ;;  %383 = vmatprep.mubr.bf16.mxu0 %v757_v21 }
  0x24   :  { %431 = vmatprep.mubr.bf16.mxu1 %v759_v22  ;;  %700 = vmatprep.subr.bf16.mxu1 %v763_v23 }
  0x27   :  { %701 = vmatpush3.bf16.msra.mxu1 %v763_v23 }
  0x2a   :  { %384 = vmatmul.mubr.bf16.gmra.mrb[4].mxu0 %v761_v24  ;;  %432 = vmatmul.mubr.bf16.gmra.mrb[4].mxu1 %v762_v25 }
  0x2b   :  { %391 = vmatprep.mubr.bf16.mxu0 %v764_v26  ;;  %702 = vmatprep.mubr.msk.bf16.mxu1 %vm318_vm0, %v766_v27 }
  0x32   :  { %392 = vmatmul.mubr.bf16.gmra.mrb[8].mxu0 %v767_v28  ;;  %703 = vmatmul.mubr.msk.bf16.vlgmr.msra.gmra.mrb[8].mxu1 %vm318_vm0, %v768_v29 }
  0x33   :  { %399 = vmatprep.mubr.bf16.mxu0 %v769_v30  ;;  %706 = vmatprep.mubr.msk.bf16.mxu1 %vm318_vm0, %v771_v31 }
  0x3a   :  { %400 = vmatmul.mubr.bf16.gmra.mrb[12].mxu0 %v772_v32  ;;  %707 = vmatmul.mubr.msk.bf16.gmra.mrb[12].mxu1 %vm318_vm0, %v773_v33 }
  0x3b   :  { %407 = vmatprep.mubr.bf16.mxu0 %v774_v34  ;;  %710 = vmatprep.mubr.msk.bf16.mxu1 %vm318_vm0, %v776_v35 }
  0x42   :  { %408 = vmatmul.mubr.bf16.gmra.mrb[16].mxu0 %v777_v36  ;;  %711 = vmatmul.mubr.msk.bf16.gmra.mrb[16].mxu1 %vm318_vm0, %v778_v37 }
  0x43   :  { %415 = vmatprep.mubr.bf16.mxu0 %v779_v38  ;;  %714 = vmatprep.mubr.msk.bf16.mxu1 %vm318_vm0, %v781_v39 }
  0x4a   :  { %416 = vmatmul.mubr.bf16.gmra.mrb[20].mxu0 %v782_v40  ;;  %715 = vmatmul.mubr.msk.bf16.gmra.mrb[20].mxu1 %vm318_vm0, %v783_v41 }
  0xf5   :  { %v640_v42 = vpop.f32.mrb[0].mxu0  ;;  %v676_v43 = vpop.f32.mrb[0].mxu1 }
  0xf6   :  { %v641_v44 = vpop.f32.mrb[1].mxu0  ;;  %v677_v45 = vpop.f32.mrb[1].mxu1 }
  0xf7   :  { %v642_v46 = vadd.f32 %v641_v44, %v640_v42  ;;  %v643_v47 = vpop.f32.mrb[2].mxu0  ;;  %v938_v48 = vadd.f32 %v677_v45, %v676_v43  ;;  %v679_v49 = vpop.f32.mrb[2].mxu1 }
  0xf8   :  { %v644_v50 = vpop.f32.mrb[3].mxu0  ;;  %v680_v51 = vpop.f32.mrb[3].mxu1 }
  0xf9   :  { %v645_v52 = vadd.f32 %v644_v50, %v643_v47  ;;  %v940_v53 = vadd.f32 %v680_v51, %v679_v49  ;;  %v378_v6 = vadd.f32 %v642_v46, %v949_v2 }
  0xfb   :  { %v381_v15 = vadd.f32 %v645_v52, %v949_v2 }
  0xfd   :  { %v646_v54 = vpop.f32.mrb[4].mxu0  ;;  %v682_v55 = vpop.f32.mrb[4].mxu1 }
  0xfe   :  { %v647_v56 = vpop.f32.mrb[5].mxu0  ;;  %v683_v57 = vpop.f32.mrb[5].mxu1 }
  0xff   :  { %v648_v58 = vadd.f32 %v647_v56, %v646_v54  ;;  %v649_v59 = vpop.f32.mrb[6].mxu0  ;;  %v942_v60 = vadd.f32 %v683_v57, %v682_v55  ;;  %v685_v61 = vpop.f32.mrb[6].mxu1 }
 0x100   :  { %v650_v62 = vpop.f32.mrb[7].mxu0  ;;  %v686_v63 = vpop.f32.mrb[7].mxu1 }
 0x101   :  { %v651_v0 = vadd.f32 %v650_v62, %v649_v59  ;;  %v944_v1 = vadd.f32 %v686_v63, %v685_v61  ;;  %v386_v3 = vadd.f32 %v648_v58, %v949_v2  ;;  %v434_v63 = vadd.f32 %v942_v60, %v949_v2 }
 0x103   :  { %v389_v10 = vadd.f32 %v651_v0, %v949_v2 }
 0x105   :  { %v652_v4 = vpop.f32.mrb[8].mxu0  ;;  %v704_v5 = vpop.f32.mrb[8].mxu1 }
 0x106   :  { %v483_v7 = vadd.f32 %v704_v5, %v386_v3  ;;  %v653_v8 = vpop.f32.mrb[9].mxu0  ;;  %v474_v9 = vpop.f32.mrb[9].mxu1 }
 0x107   :  { %v654_v11 = vadd.f32 %v653_v8, %v652_v4  ;;  %v475_v12 = vadd.f32 %v474_v9, %v378_v6  ;;  %v655_v13 = vpop.f32.mrb[10].mxu0  ;;  %v705_v14 = vpop.f32.mrb[10].mxu1  ;;  %v426_v6 = vadd.f32 %v938_v48, %v949_v2 }
 0x108   :  { %v539_v16 = vmax.f32 %v483_v7, 0.0  ;;  %v486_v17 = vadd.f32 %v705_v14, %v389_v10  ;;  %v656_v18 = vpop.f32.mrb[11].mxu0  ;;  %v477_v19 = vpop.f32.mrb[11].mxu1  ;;  %v437_v10 = vadd.f32 %v944_v1, %v949_v2 }
 0x109   :  { %v537_v20 = vmax.f32 %v475_v12, 0.0  ;;  %v657_v21 = vadd.f32 %v656_v18, %v655_v13  ;;  %v478_v22 = vadd.f32 %v477_v19, %v381_v15  ;;  %v394_v27 = vadd.f32 %v654_v11, %v949_v2 }
 0x10a   :  { %555 = vst.msk [vmem:[%s1038_s3 + $0x10] sm:$0xff] %vm318_vm0, %v539_v16  ;;  %v540_v23 = vmax.f32 %v486_v17, 0.0  ;;  %v429_v15 = vadd.f32 %v940_v53, %v949_v2 }
 0x10b   :  { %553 = vst.msk [vmem:[%s1038_s3] sm:$0xff] %vm318_vm0, %v537_v20  ;;  %v538_v24 = vmax.f32 %v478_v22, 0.0  ;;  %v397_v34 = vadd.f32 %v657_v21, %v949_v2 }
 0x10c   :  { %556 = vst.msk [vmem:[%s1038_s3 + $0x18] sm:$0xff] %vm318_vm0, %v540_v23 }
 0x10d   :  { %554 = vst.msk [vmem:[%s1038_s3 + $0x8] sm:$0xff] %vm318_vm0, %v538_v24  ;;  %v658_v25 = vpop.f32.mrb[12].mxu0  ;;  %v708_v26 = vpop.f32.mrb[12].mxu1 }
 0x10e   :  { %v659_v28 = vpop.f32.mrb[13].mxu0  ;;  %v490_v29 = vpop.f32.mrb[13].mxu1 }
 0x10f   :  { %v660_v30 = vadd.f32 %v659_v28, %v658_v25  ;;  %v491_v31 = vadd.f32 %v490_v29, %v394_v27  ;;  %v661_v32 = vpop.f32.mrb[14].mxu0  ;;  %v709_v33 = vpop.f32.mrb[14].mxu1 }
 0x110   :  { %v662_v35 = vpop.f32.mrb[15].mxu0  ;;  %v493_v36 = vpop.f32.mrb[15].mxu1 }
 0x111   :  { %v402_v37 = vadd.f32 %v660_v30, %v949_v2  ;;  %v541_v38 = vmax.f32 %v491_v31, 0.0  ;;  %v663_v39 = vadd.f32 %v662_v35, %v661_v32  ;;  %v494_v40 = vadd.f32 %v493_v36, %v397_v34 }
 0x113   :  { %v499_v41 = vadd.f32 %v708_v26, %v402_v37  ;;  %557 = vst.msk [vmem:[%s1038_s3 + $0x20] sm:$0xff] %vm318_vm0, %v541_v38  ;;  %v405_v42 = vadd.f32 %v663_v39, %v949_v2  ;;  %v542_v43 = vmax.f32 %v494_v40, 0.0 }
 0x115   :  { %v543_v44 = vmax.f32 %v499_v41, 0.0  ;;  %v502_v45 = vadd.f32 %v709_v33, %v405_v42  ;;  %558 = vst.msk [vmem:[%s1038_s3 + $0x28] sm:$0xff] %vm318_vm0, %v542_v43  ;;  %v664_v46 = vpop.f32.mrb[16].mxu0  ;;  %v712_v47 = vpop.f32.mrb[16].mxu1 }
 0x116   :  { %v665_v49 = vpop.f32.mrb[17].mxu0  ;;  %v506_v50 = vpop.f32.mrb[17].mxu1 }
 0x117   :  { %559 = vst.msk [vmem:[%s1038_s3 + $0x30] sm:$0xff] %vm318_vm0, %v543_v44  ;;  %v544_v51 = vmax.f32 %v502_v45, 0.0  ;;  %v666_v52 = vadd.f32 %v665_v49, %v664_v46  ;;  %v667_v54 = vpop.f32.mrb[18].mxu0  ;;  %v713_v55 = vpop.f32.mrb[18].mxu1 }
 0x118   :  { %v668_v56 = vpop.f32.mrb[19].mxu0  ;;  %v509_v57 = vpop.f32.mrb[19].mxu1 }
 0x119   :  { %560 = vst.msk [vmem:[%s1038_s3 + $0x38] sm:$0xff] %vm318_vm0, %v544_v51  ;;  %v410_v58 = vadd.f32 %v666_v52, %v949_v2  ;;  %v669_v59 = vadd.f32 %v668_v56, %v667_v54 }
 0x11b   :  { %v507_v61 = vadd.f32 %v506_v50, %v410_v58  ;;  %v413_v62 = vadd.f32 %v669_v59, %v949_v2 }
 0x11d   :  { %v545_v0 = vmax.f32 %v507_v61, 0.0  ;;  %v510_v3 = vadd.f32 %v509_v57, %v413_v62  ;;  %v670_v4 = vpop.f32.mrb[20].mxu0  ;;  %v716_v5 = vpop.f32.mrb[20].mxu1 }
 0x11e   :  { %v531_v7 = vadd.f32 %v716_v5, %v434_v63  ;;  %v671_v8 = vpop.f32.mrb[21].mxu0  ;;  %v522_v9 = vpop.f32.mrb[21].mxu1 }
 0x11f   :  { %561 = vst.msk [vmem:[%s1038_s3 + $0x40] sm:$0xff] %vm318_vm0, %v545_v0  ;;  %v546_v11 = vmax.f32 %v510_v3, 0.0  ;;  %v672_v60 = vadd.f32 %v671_v8, %v670_v4  ;;  %v523_v12 = vadd.f32 %v522_v9, %v426_v6  ;;  %v673_v13 = vpop.f32.mrb[22].mxu0  ;;  %v717_v14 = vpop.f32.mrb[22].mxu1 }
 0x120   :  { %v551_v48 = vmax.f32 %v531_v7, 0.0  ;;  %v534_v16 = vadd.f32 %v717_v14, %v437_v10  ;;  %v674_v17 = vpop.f32.mrb[23].mxu0  ;;  %v525_v18 = vpop.f32.mrb[23].mxu1 }
 0x121   :  { %562 = vst.msk [vmem:[%s1038_s3 + $0x48] sm:$0xff] %vm318_vm0, %v546_v11  ;;  %v418_v1 = vadd.f32 %v672_v60, %v949_v2  ;;  %v549_v19 = vmax.f32 %v523_v12, 0.0  ;;  %v675_v20 = vadd.f32 %v674_v17, %v673_v13  ;;  %v526_v21 = vadd.f32 %v525_v18, %v429_v15 }
 0x122   :  { %567 = vst.msk [vmem:[%s1038_s3 + $0x70] sm:$0xff] %vm318_vm0, %v551_v48  ;;  %v552_v53 = vmax.f32 %v534_v16, 0.0 }
 0x123   :  { %v515_v22 = vadd.f32 %v712_v47, %v418_v1  ;;  %565 = vst.msk [vmem:[%s1038_s3 + $0x60] sm:$0xff] %vm318_vm0, %v549_v19  ;;  %v421_v23 = vadd.f32 %v675_v20, %v949_v2  ;;  %v550_v24 = vmax.f32 %v526_v21, 0.0 }
 0x124   :  { %568 = vst.msk [vmem:[%s1038_s3 + $0x78] sm:$0xff] %vm318_vm0, %v552_v53 }
 0x125   :  { %v547_v25 = vmax.f32 %v515_v22, 0.0  ;;  %v518_v26 = vadd.f32 %v713_v55, %v421_v23  ;;  %566 = vst.msk [vmem:[%s1038_s3 + $0x68] sm:$0xff] %vm318_vm0, %v550_v24 }
 0x127   :  { %563 = vst.msk [vmem:[%s1038_s3 + $0x50] sm:$0xff] %vm318_vm0, %v547_v25  ;;  %v548_v27 = vmax.f32 %v518_v26, 0.0 }
 0x129   :  { %564 = vst.msk [vmem:[%s1038_s3 + $0x58] sm:$0xff] %vm318_vm0, %v548_v27 }

// kernel: simclr_forward.20
= control target key start
LH: loop header
LB: loop body
LE: loop exit
PB: predicated region body
PF: predicated region fallthrough
CT: control target
= control target key end

     0   :  { %vm321_vm0 = vcmask 261120   ;;  %s1123_s1 = inlined_call_operand.vmem [shape: bf16[288,32], index: 1, kind: input, shape index: {}]   ;;  %s1124_s0 = inlined_call_operand.vmem [shape: bf16[128,288], index: 0, kind: input, shape index: {}]   ;;  %s1125_s2 = inlined_call_operand.vmem [shape: f32[1,32], index: 2, kind: input, shape index: {}]   ;;  %s1126_s3 = inlined_call_operand.vmem [shape: f32[128,32], index: 3, kind: input, shape index: {}]   ;;  %s1127_s4 = inlined_call_operand.vmem [shape: f32[128,32], index: 4, kind: output, shape index: {}]  }
   0x1   :  { %v769_v0 = vld [vmem:[%s1123_s1 + $0x40] sm:$0xff]   ;;  %v771_v2 = vld [vmem:[%s1123_s1 + $0x48] sm:$0xff]   ;;  %v773_v4 = vld [vmem:[%s1123_s1 + $0x50] sm:$0xff]  }
   0x2   :  { %v770_v1 = vld [vmem:[%s1123_s1] sm:$0xff]   ;;  %659 = vmatprep.subr.bf16.mxu0 %v769_v0  ;;  %753 = vmatprep.subr.bf16.mxu1 %v769_v0  ;;  %v772_v3 = vld [vmem:[%s1123_s1 + $0x8] sm:$0xff]   ;;  %v774_v5 = vld [vmem:[%s1123_s1 + $0x10] sm:$0xff]  }
   0x3   :  { %660 = vmatpush3.bf16.msra.mxu0 %v770_v1  ;;  %761 = vmatpush3.bf16.msra.mxu1 %v770_v1  ;;  %v775_v6 = vld [vmem:[%s1123_s1 + $0x58] sm:$0xff]   ;;  %v777_v8 = vld [vmem:[%s1123_s1 + $0x60] sm:$0xff]   ;;  %v779_v10 = vld [vmem:[%s1123_s1 + $0x68] sm:$0xff]  }
   0x4   :  { %661 = vmatprep.subr.bf16.mxu0 %v771_v2  ;;  %754 = vmatprep.subr.bf16.mxu1 %v771_v2  ;;  %v776_v7 = vld [vmem:[%s1123_s1 + $0x18] sm:$0xff]   ;;  %v778_v9 = vld [vmem:[%s1123_s1 + $0x20] sm:$0xff]   ;;  %v780_v13 = vld [vmem:[%s1123_s1 + $0x28] sm:$0xff]  }
   0x5   :  { %v787_v11 = vld [vmem:[%s1124_s0 + $0x4] ss:$12 sps:$4 sm:$0xff]   ;;  %v790_v12 = vld [vmem:[%s1124_s0 + $0x94] ss:$12 sps:$4 sm:$0xff]   ;;  %v783_v16 = vld [vmem:[%s1123_s1 + $0x78] sm:$0xff]  }
   0x6   :  { %v781_v14 = vld [vmem:[%s1123_s1 + $0x70] sm:$0xff]   ;;  %378 = vmatprep.mubr.bf16.mxu0 %v787_v11  ;;  %426 = vmatprep.mubr.bf16.mxu1 %v790_v12  ;;  %v784_v17 = vld [vmem:[%s1123_s1 + $0x38] sm:$0xff]   ;;  %v785_v18 = vld [vmem:[%s1124_s0] ss:$12 sps:$4 sm:$0xff]  }
   0x7   :  { %662 = vmatpush3.bf16.msra.mxu0 %v772_v3  ;;  %762 = vmatpush3.bf16.msra.mxu1 %v772_v3  ;;  %v782_v15 = vld [vmem:[%s1123_s1 + $0x30] sm:$0xff]   ;;  %v791_v19 = vld [vmem:[%s1123_s1 + $0x80] sm:$0xff]   ;;  %v792_v21 = vld [vmem:[%s1124_s0 + $0x1c] ss:$12 sps:$4 sm:$0xff]  }
   0x8   :  { %663 = vmatprep.subr.bf16.mxu0 %v773_v4  ;;  %755 = vmatprep.subr.bf16.mxu1 %v773_v4  ;;  %v788_v20 = vld [vmem:[%s1124_s0 + $0x90] ss:$12 sps:$4 sm:$0xff]   ;;  %v794_v22 = vld [vmem:[%s1124_s0 + $0xac] ss:$12 sps:$4 sm:$0xff]   ;;  %v797_v25 = vld [vmem:[%s1124_s0 + $0xa8] ss:$12 sps:$4 sm:$0xff]  }
   0x9   :  { %v798_v23 = vld [vmem:[%s1123_s1 + $0x88] sm:$0xff]   ;;  %v796_v24 = vld [vmem:[%s1124_s0 + $0x18] ss:$12 sps:$4 sm:$0xff]   ;;  %v799_v26 = vld [vmem:[%s1124_s0 + $0x34] ss:$12 sps:$4 sm:$0xff]  }
   0xa   :  { %v801_v27 = vld [vmem:[%s1124_s0 + $0x8] ss:$12 sps:$4 sm:$0xff]   ;;  %v802_v28 = vld [vmem:[%s1124_s0 + $0x30] ss:$12 sps:$4 sm:$0xff]   ;;  %v803_v29 = vld [vmem:[%s1124_s0 + $0x20] ss:$12 sps:$4 sm:$0xff]  }
   0xb   :  { %664 = vmatpush3.bf16.msra.mxu0 %v774_v5  ;;  %763 = vmatpush3.bf16.msra.mxu1 %v774_v5  ;;  %v804_v30 = vld [vmem:[%s1124_s0 + $0x4c] ss:$12 sps:$4 sm:$0xff]   ;;  %v807_v32 = vld [vmem:[%s1124_s0 + $0x48] ss:$12 sps:$4 sm:$0xff]   ;;  %v808_v33 = vld [vmem:[%s1124_s0 + $0x50] ss:$12 sps:$4 sm:$0xff]  }
   0xc   :  { %665 = vmatprep.subr.bf16.mxu0 %v775_v6  ;;  %756 = vmatprep.subr.bf16.mxu1 %v775_v6  ;;  %v806_v31 = vld [vmem:[%s1124_s0 + $0x38] ss:$12 sps:$4 sm:$0xff]   ;;  %v811_v35 = vld [vmem:[%s1124_s0 + $0x68] ss:$12 sps:$4 sm:$0xff]   ;;  %v812_v36 = vld [vmem:[%s1124_s0 + $0x60] ss:$12 sps:$4 sm:$0xff]  }
   0xd   :  { %v809_v34 = vld [vmem:[%s1124_s0 + $0x64] ss:$12 sps:$4 sm:$0xff]   ;;  %v813_v37 = vld [vmem:[%s1124_s0 + $0x80] ss:$12 sps:$4 sm:$0xff]   ;;  %v814_v38 = vld [vmem:[%s1124_s0 + $0x7c] ss:$12 sps:$4 sm:$0xff]  }
   0xe   :  { %v816_v39 = vld [vmem:[%s1124_s0 + $0x98] ss:$12 sps:$4 sm:$0xff]   ;;  %v818_v41 = vld [vmem:[%s1124_s0 + $0xb0] ss:$12 sps:$4 sm:$0xff]   ;;  %v989_v2 = vld [vmem:[%s1125_s2] ss:$0 sm:$0xff] }
   0xf   :  { %666 = vmatpush3.bf16.msra.mxu0 %v776_v7  ;;  %764 = vmatpush3.bf16.msra.mxu1 %v776_v7  ;;  %v817_v40 = vld [vmem:[%s1124_s0 + $0x78] ss:$12 sps:$4 sm:$0xff]   ;;  %v542_v6 = vld [vmem:[%s1126_s3 + $0x10] sm:$0xff] }
  0x10   :  { %667 = vmatprep.subr.bf16.mxu0 %v777_v8  ;;  %757 = vmatprep.subr.bf16.mxu1 %v777_v8  ;;  %v540_v11 = vld [vmem:[%s1126_s3] sm:$0xff] }
  0x13   :  { %668 = vmatpush3.bf16.msra.mxu0 %v778_v9  ;;  %765 = vmatpush3.bf16.msra.mxu1 %v778_v9 }
  0x14   :  { %669 = vmatprep.subr.bf16.mxu0 %v779_v10  ;;  %758 = vmatprep.subr.bf16.mxu1 %v779_v10 }
  0x17   :  { %670 = vmatpush3.bf16.msra.mxu0 %v780_v13  ;;  %766 = vmatpush3.bf16.msra.mxu1 %v780_v13 }
  0x18   :  { %671 = vmatprep.subr.bf16.mxu0 %v781_v14  ;;  %759 = vmatprep.subr.bf16.mxu1 %v781_v14 }
  0x1b   :  { %672 = vmatpush3.bf16.msra.mxu0 %v782_v15  ;;  %767 = vmatpush3.bf16.msra.mxu1 %v782_v15 }
  0x1c   :  { %673 = vmatprep.subr.bf16.mxu0 %v783_v16  ;;  %760 = vmatprep.subr.bf16.mxu1 %v783_v16 }
  0x1f   :  { %674 = vmatpush3.bf16.msra.mxu0 %v784_v17  ;;  %768 = vmatpush3.bf16.msra.mxu1 %v784_v17  ;;  %v543_v17 = vld [vmem:[%s1126_s3 + $0x18] sm:$0xff] }
  0x20   :  { %733 = vmatprep.subr.bf16.mxu1 %v791_v19 }
  0x22   :  { %379 = vmatmul.mubr.bf16.vlgmr.msra.gmra.mrb[0].mxu0 %v785_v18  ;;  %427 = vmatmul.mubr.bf16.vlgmr.msra.gmra.mrb[0].mxu1 %v788_v20 }
  0x23   :  { %734 = vmatpush3.bf16.msra.mxu1 %v791_v19  ;;  %386 = vmatprep.mubr.bf16.mxu0 %v792_v21 }
  0x24   :  { %434 = vmatprep.mubr.bf16.mxu1 %v794_v22  ;;  %735 = vmatprep.subr.bf16.mxu1 %v798_v23 }
  0x27   :  { %736 = vmatpush3.bf16.msra.mxu1 %v798_v23  ;;  %v541_v23 = vld [vmem:[%s1126_s3 + $0x8] sm:$0xff] }
  0x2a   :  { %387 = vmatmul.mubr.bf16.gmra.mrb[4].mxu0 %v796_v24  ;;  %435 = vmatmul.mubr.bf16.gmra.mrb[4].mxu1 %v797_v25 }
  0x2b   :  { %394 = vmatprep.mubr.bf16.mxu0 %v799_v26  ;;  %737 = vmatprep.mubr.msk.bf16.mxu1 %vm321_vm0, %v801_v27 }
  0x32   :  { %395 = vmatmul.mubr.bf16.gmra.mrb[8].mxu0 %v802_v28  ;;  %738 = vmatmul.mubr.msk.bf16.vlgmr.msra.gmra.mrb[8].mxu1 %vm321_vm0, %v803_v29 }
  0x33   :  { %402 = vmatprep.mubr.bf16.mxu0 %v804_v30  ;;  %741 = vmatprep.mubr.msk.bf16.mxu1 %vm321_vm0, %v806_v31 }
  0x3a   :  { %403 = vmatmul.mubr.bf16.gmra.mrb[12].mxu0 %v807_v32  ;;  %742 = vmatmul.mubr.msk.bf16.gmra.mrb[12].mxu1 %vm321_vm0, %v808_v33 }
  0x3b   :  { %410 = vmatprep.mubr.bf16.mxu0 %v809_v34  ;;  %745 = vmatprep.mubr.msk.bf16.mxu1 %vm321_vm0, %v811_v35 }
  0x42   :  { %411 = vmatmul.mubr.bf16.gmra.mrb[16].mxu0 %v812_v36  ;;  %746 = vmatmul.mubr.msk.bf16.gmra.mrb[16].mxu1 %vm321_vm0, %v813_v37 }
  0x43   :  { %418 = vmatprep.mubr.bf16.mxu0 %v814_v38  ;;  %749 = vmatprep.mubr.msk.bf16.mxu1 %vm321_vm0, %v816_v39  ;;  %v544_v38 = vld [vmem:[%s1126_s3 + $0x20] sm:$0xff] }
  0x4a   :  { %419 = vmatmul.mubr.bf16.gmra.mrb[20].mxu0 %v817_v40  ;;  %750 = vmatmul.mubr.msk.bf16.gmra.mrb[20].mxu1 %vm321_vm0, %v818_v41 }
  0xf5   :  { %v675_v42 = vpop.f32.mrb[0].mxu0  ;;  %v711_v43 = vpop.f32.mrb[0].mxu1 }
  0xf6   :  { %v676_v44 = vpop.f32.mrb[1].mxu0  ;;  %v712_v45 = vpop.f32.mrb[1].mxu1 }
  0xf7   :  { %v677_v46 = vadd.f32 %v676_v44, %v675_v42  ;;  %v678_v47 = vpop.f32.mrb[2].mxu0  ;;  %v978_v48 = vadd.f32 %v712_v45, %v711_v43  ;;  %v714_v49 = vpop.f32.mrb[2].mxu1 }
  0xf8   :  { %v679_v50 = vpop.f32.mrb[3].mxu0  ;;  %v715_v51 = vpop.f32.mrb[3].mxu1 }
  0xf9   :  { %v680_v52 = vadd.f32 %v679_v50, %v678_v47  ;;  %v980_v53 = vadd.f32 %v715_v51, %v714_v49  ;;  %v381_v7 = vadd.f32 %v677_v46, %v989_v2  ;;  %v545_v46 = vld [vmem:[%s1126_s3 + $0x28] sm:$0xff] }
  0xfb   :  { %v384_v18 = vadd.f32 %v680_v52, %v989_v2  ;;  %v546_v52 = vld [vmem:[%s1126_s3 + $0x30] sm:$0xff] }
  0xfd   :  { %v681_v54 = vpop.f32.mrb[4].mxu0  ;;  %v717_v55 = vpop.f32.mrb[4].mxu1 }
  0xfe   :  { %v682_v56 = vpop.f32.mrb[5].mxu0  ;;  %v718_v57 = vpop.f32.mrb[5].mxu1 }
  0xff   :  { %v683_v58 = vadd.f32 %v682_v56, %v681_v54  ;;  %v684_v59 = vpop.f32.mrb[6].mxu0  ;;  %v982_v60 = vadd.f32 %v718_v57, %v717_v55  ;;  %v720_v61 = vpop.f32.mrb[6].mxu1 }
 0x100   :  { %v685_v62 = vpop.f32.mrb[7].mxu0  ;;  %v721_v63 = vpop.f32.mrb[7].mxu1 }
 0x101   :  { %v686_v0 = vadd.f32 %v685_v62, %v684_v59  ;;  %v984_v1 = vadd.f32 %v721_v63, %v720_v61  ;;  %v389_v3 = vadd.f32 %v683_v58, %v989_v2  ;;  %v547_v58 = vld [vmem:[%s1126_s3 + $0x38] sm:$0xff] }
 0x103   :  { %v392_v12 = vadd.f32 %v686_v0, %v989_v2 }
 0x105   :  { %v687_v4 = vpop.f32.mrb[8].mxu0  ;;  %v739_v5 = vpop.f32.mrb[8].mxu1 }
 0x106   :  { %v486_v8 = vadd.f32 %v739_v5, %v389_v3  ;;  %v688_v9 = vpop.f32.mrb[9].mxu0  ;;  %v477_v10 = vpop.f32.mrb[9].mxu1 }
 0x107   :  { %v689_v13 = vadd.f32 %v688_v9, %v687_v4  ;;  %v478_v14 = vadd.f32 %v477_v10, %v381_v7  ;;  %v690_v15 = vpop.f32.mrb[10].mxu0  ;;  %v740_v16 = vpop.f32.mrb[10].mxu1 }
 0x108   :  { %v558_v19 = vadd.f32 %v542_v6, %v486_v8  ;;  %v489_v20 = vadd.f32 %v740_v16, %v392_v12  ;;  %v691_v21 = vpop.f32.mrb[11].mxu0  ;;  %v480_v22 = vpop.f32.mrb[11].mxu1 }
 0x109   :  { %v556_v24 = vadd.f32 %v540_v11, %v478_v14  ;;  %v692_v25 = vadd.f32 %v691_v21, %v690_v15  ;;  %v481_v26 = vadd.f32 %v480_v22, %v384_v18  ;;  %v397_v35 = vadd.f32 %v689_v13, %v989_v2  ;;  %v548_v15 = vld [vmem:[%s1126_s3 + $0x40] sm:$0xff]  ;;  %v549_v18 = vld [vmem:[%s1126_s3 + $0x48] sm:$0xff] }
 0x10a   :  { %v574_v27 = vmax.f32 %v558_v19, 0.0  ;;  %v559_v28 = vadd.f32 %v543_v17, %v489_v20  ;;  %v437_v19 = vadd.f32 %v982_v60, %v989_v2  ;;  %v440_v60 = vadd.f32 %v984_v1, %v989_v2 }
 0x10b   :  { %v572_v29 = vmax.f32 %v556_v24, 0.0  ;;  %v557_v30 = vadd.f32 %v541_v23, %v481_v26  ;;  %v400_v43 = vadd.f32 %v692_v25, %v989_v2  ;;  %v554_v24 = vld [vmem:[%s1126_s3 + $0x70] sm:$0xff]  ;;  %v429_v25 = vadd.f32 %v978_v48, %v989_v2  ;;  %v555_v48 = vld [vmem:[%s1126_s3 + $0x78] sm:$0xff] }
 0x10c   :  { %590 = vst.msk [vmem:[%s1127_s4 + $0x10] sm:$0xff] %vm321_vm0, %v574_v27  ;;  %v575_v31 = vmax.f32 %v559_v28, 0.0 }
 0x10d   :  { %588 = vst.msk [vmem:[%s1127_s4] sm:$0xff] %vm321_vm0, %v572_v29  ;;  %v573_v32 = vmax.f32 %v557_v30, 0.0  ;;  %v693_v33 = vpop.f32.mrb[12].mxu0  ;;  %v743_v34 = vpop.f32.mrb[12].mxu1  ;;  %v552_v29 = vld [vmem:[%s1126_s3 + $0x60] sm:$0xff] }
 0x10e   :  { %591 = vst.msk [vmem:[%s1127_s4 + $0x18] sm:$0xff] %vm321_vm0, %v575_v31  ;;  %v694_v36 = vpop.f32.mrb[13].mxu0  ;;  %v493_v37 = vpop.f32.mrb[13].mxu1 }
 0x10f   :  { %589 = vst.msk [vmem:[%s1127_s4 + $0x8] sm:$0xff] %vm321_vm0, %v573_v32  ;;  %v695_v39 = vadd.f32 %v694_v36, %v693_v33  ;;  %v494_v40 = vadd.f32 %v493_v37, %v397_v35  ;;  %v696_v41 = vpop.f32.mrb[14].mxu0  ;;  %v744_v42 = vpop.f32.mrb[14].mxu1 }
 0x110   :  { %v697_v44 = vpop.f32.mrb[15].mxu0  ;;  %v496_v45 = vpop.f32.mrb[15].mxu1 }
 0x111   :  { %v405_v47 = vadd.f32 %v695_v39, %v989_v2  ;;  %v560_v49 = vadd.f32 %v544_v38, %v494_v40  ;;  %v698_v50 = vadd.f32 %v697_v44, %v696_v41  ;;  %v497_v51 = vadd.f32 %v496_v45, %v400_v43  ;;  %v553_v44 = vld [vmem:[%s1126_s3 + $0x68] sm:$0xff] }
 0x112   :  { %v432_v39 = vadd.f32 %v980_v53, %v989_v2  ;;  %v550_v53 = vld [vmem:[%s1126_s3 + $0x50] sm:$0xff] }
 0x113   :  { %v502_v54 = vadd.f32 %v743_v34, %v405_v47  ;;  %v576_v55 = vmax.f32 %v560_v49, 0.0  ;;  %v408_v56 = vadd.f32 %v698_v50, %v989_v2  ;;  %v561_v57 = vadd.f32 %v545_v46, %v497_v51 }
 0x115   :  { %v562_v59 = vadd.f32 %v546_v52, %v502_v54  ;;  %592 = vst.msk [vmem:[%s1127_s4 + $0x20] sm:$0xff] %vm321_vm0, %v576_v55  ;;  %v505_v61 = vadd.f32 %v744_v42, %v408_v56  ;;  %v577_v62 = vmax.f32 %v561_v57, 0.0  ;;  %v699_v63 = vpop.f32.mrb[16].mxu0  ;;  %v747_v0 = vpop.f32.mrb[16].mxu1  ;;  %v551_v54 = vld [vmem:[%s1126_s3 + $0x58] sm:$0xff] }
 0x116   :  { %v700_v3 = vpop.f32.mrb[17].mxu0  ;;  %v509_v4 = vpop.f32.mrb[17].mxu1 }
 0x117   :  { %v578_v5 = vmax.f32 %v562_v59, 0.0  ;;  %v563_v6 = vadd.f32 %v547_v58, %v505_v61  ;;  %593 = vst.msk [vmem:[%s1127_s4 + $0x28] sm:$0xff] %vm321_vm0, %v577_v62  ;;  %v701_v7 = vadd.f32 %v700_v3, %v699_v63  ;;  %v702_v8 = vpop.f32.mrb[18].mxu0  ;;  %v748_v9 = vpop.f32.mrb[18].mxu1 }
 0x118   :  { %v703_v10 = vpop.f32.mrb[19].mxu0  ;;  %v512_v11 = vpop.f32.mrb[19].mxu1 }
 0x119   :  { %594 = vst.msk [vmem:[%s1127_s4 + $0x30] sm:$0xff] %vm321_vm0, %v578_v5  ;;  %v579_v12 = vmax.f32 %v563_v6, 0.0  ;;  %v413_v13 = vadd.f32 %v701_v7, %v989_v2  ;;  %v704_v14 = vadd.f32 %v703_v10, %v702_v8 }
 0x11b   :  { %595 = vst.msk [vmem:[%s1127_s4 + $0x38] sm:$0xff] %vm321_vm0, %v579_v12  ;;  %v510_v16 = vadd.f32 %v509_v4, %v413_v13  ;;  %v416_v17 = vadd.f32 %v704_v14, %v989_v2 }
 0x11d   :  { %v564_v20 = vadd.f32 %v548_v15, %v510_v16  ;;  %v513_v21 = vadd.f32 %v512_v11, %v416_v17  ;;  %v705_v22 = vpop.f32.mrb[20].mxu0  ;;  %v751_v23 = vpop.f32.mrb[20].mxu1 }
 0x11e   :  { %v534_v26 = vadd.f32 %v751_v23, %v437_v19  ;;  %v706_v27 = vpop.f32.mrb[21].mxu0  ;;  %v525_v28 = vpop.f32.mrb[21].mxu1 }
 0x11f   :  { %v580_v30 = vmax.f32 %v564_v20, 0.0  ;;  %v565_v31 = vadd.f32 %v549_v18, %v513_v21  ;;  %v707_v32 = vadd.f32 %v706_v27, %v705_v22  ;;  %v526_v33 = vadd.f32 %v525_v28, %v429_v25  ;;  %v708_v34 = vpop.f32.mrb[22].mxu0  ;;  %v752_v35 = vpop.f32.mrb[22].mxu1 }
 0x120   :  { %v570_v36 = vadd.f32 %v554_v24, %v534_v26  ;;  %v537_v37 = vadd.f32 %v752_v35, %v440_v60  ;;  %v709_v38 = vpop.f32.mrb[23].mxu0  ;;  %v528_v40 = vpop.f32.mrb[23].mxu1 }
 0x121   :  { %596 = vst.msk [vmem:[%s1127_s4 + $0x40] sm:$0xff] %vm321_vm0, %v580_v30  ;;  %v581_v1 = vmax.f32 %v565_v31, 0.0  ;;  %v421_v41 = vadd.f32 %v707_v32, %v989_v2  ;;  %v568_v42 = vadd.f32 %v552_v29, %v526_v33  ;;  %v710_v43 = vadd.f32 %v709_v38, %v708_v34 }
 0x122   :  { %v586_v45 = vmax.f32 %v570_v36, 0.0  ;;  %v571_v46 = vadd.f32 %v555_v48, %v537_v37  ;;  %v529_v47 = vadd.f32 %v528_v40, %v432_v39 }
 0x123   :  { %597 = vst.msk [vmem:[%s1127_s4 + $0x48] sm:$0xff] %vm321_vm0, %v581_v1  ;;  %v518_v49 = vadd.f32 %v747_v0, %v421_v41  ;;  %v584_v50 = vmax.f32 %v568_v42, 0.0  ;;  %v424_v51 = vadd.f32 %v710_v43, %v989_v2 }
 0x124   :  { %602 = vst.msk [vmem:[%s1127_s4 + $0x70] sm:$0xff] %vm321_vm0, %v586_v45  ;;  %v587_v52 = vmax.f32 %v571_v46, 0.0  ;;  %v569_v55 = vadd.f32 %v553_v44, %v529_v47 }
 0x125   :  { %v566_v56 = vadd.f32 %v550_v53, %v518_v49  ;;  %600 = vst.msk [vmem:[%s1127_s4 + $0x60] sm:$0xff] %vm321_vm0, %v584_v50  ;;  %v521_v57 = vadd.f32 %v748_v9, %v424_v51 }
 0x126   :  { %603 = vst.msk [vmem:[%s1127_s4 + $0x78] sm:$0xff] %vm321_vm0, %v587_v52  ;;  %v585_v2 = vmax.f32 %v569_v55, 0.0 }
 0x127   :  { %v582_v58 = vmax.f32 %v566_v56, 0.0  ;;  %v567_v59 = vadd.f32 %v551_v54, %v521_v57 }
 0x128   :  { %601 = vst.msk [vmem:[%s1127_s4 + $0x68] sm:$0xff] %vm321_vm0, %v585_v2 }
 0x129   :  { %598 = vst.msk [vmem:[%s1127_s4 + $0x50] sm:$0xff] %vm321_vm0, %v582_v58  ;;  %v583_v61 = vmax.f32 %v567_v59, 0.0 }
 0x12b   :  { %599 = vst.msk [vmem:[%s1127_s4 + $0x58] sm:$0xff] %vm321_vm0, %v583_v61 }

// kernel: simclr_forward.23
= control target key start
LH: loop header
LB: loop body
LE: loop exit
PB: predicated region body
PF: predicated region fallthrough
CT: control target
= control target key end

     0   :  { %vm204_vm0 = vcmask 261120   ;;  %vm313_vm1 = vcmask 523264   ;;  %s526_s1 = inlined_call_operand.vmem [shape: bf16[288,64], index: 1, kind: input, shape index: {}]   ;;  %s527_s0 = inlined_call_operand.vmem [shape: bf16[32,288], index: 0, kind: input, shape index: {}]   ;;  %s528_s2 = inlined_call_operand.vmem [shape: f32[1,64], index: 2, kind: input, shape index: {}]   ;;  %s529_s3 = inlined_call_operand.vmem [shape: f32[32,64], index: 3, kind: output, shape index: {}]  }
   0x1   :  { %v389_v0 = vld [vmem:[%s526_s1 + $0x40] sm:$0xff]   ;;  %v391_v2 = vld [vmem:[%s526_s1 + $0x48] sm:$0xff]   ;;  %v393_v4 = vld [vmem:[%s526_s1 + $0x50] sm:$0xff]  }
   0x2   :  { %v390_v1 = vld [vmem:[%s526_s1] sm:$0xff]   ;;  %349 = vmatprep.subr.bf16.mxu0 %v389_v0  ;;  %v392_v3 = vld [vmem:[%s526_s1 + $0x8] sm:$0xff]   ;;  %v394_v5 = vld [vmem:[%s526_s1 + $0x10] sm:$0xff]  }
   0x3   :  { %350 = vmatpush3.bf16.msra.mxu0 %v390_v1  ;;  %v395_v6 = vld [vmem:[%s526_s1 + $0x58] sm:$0xff]   ;;  %v397_v8 = vld [vmem:[%s526_s1 + $0x60] sm:$0xff]   ;;  %v399_v11 = vld [vmem:[%s526_s1 + $0x68] sm:$0xff]  }
   0x4   :  { %351 = vmatprep.subr.bf16.mxu0 %v391_v2  ;;  %v396_v7 = vld [vmem:[%s526_s1 + $0x18] sm:$0xff]   ;;  %v398_v9 = vld [vmem:[%s526_s1 + $0x20] sm:$0xff]   ;;  %v400_v12 = vld [vmem:[%s526_s1 + $0x28] sm:$0xff]  }
   0x5   :  { %v404_v10 = vld [vmem:[%s526_s1 + $0x80] sm:$0xff]   ;;  %v401_v13 = vld [vmem:[%s526_s1 + $0x70] sm:$0xff]   ;;  %v409_v15 = vld [vmem:[%s526_s1 + $0x88] sm:$0xff]  }
   0x6   :  { %381 = vmatprep.subr.bf16.mxu1 %v404_v10  ;;  %v408_v14 = vld [vmem:[%s527_s0 + $0x4] ss:$12 sps:$4 sm:$0xff]   ;;  %v410_v16 = vld [vmem:[%s527_s0 + $0x8] ss:$12 sps:$4 sm:$0xff]   ;;  %v411_v17 = vld [vmem:[%s527_s0 + $0x20] ss:$12 sps:$4 sm:$0xff]  }
   0x7   :  { %352 = vmatpush3.bf16.msra.mxu0 %v392_v3  ;;  %382 = vmatpush3.bf16.msra.mxu1 %v404_v10  ;;  %v402_v18 = vld [vmem:[%s526_s1 + $0x30] sm:$0xff]   ;;  %v403_v19 = vld [vmem:[%s526_s1 + $0x78] sm:$0xff]   ;;  %v406_v21 = vld [vmem:[%s527_s0] ss:$12 sps:$4 sm:$0xff]  }
   0x8   :  { %353 = vmatprep.subr.bf16.mxu0 %v393_v4  ;;  %243 = vmatprep.mubr.bf16.mxu0 %v408_v14  ;;  %v405_v20 = vld [vmem:[%s526_s1 + $0x38] sm:$0xff]   ;;  %v322_v30 = vld [vmem:[%s528_s2] ss:$0 sm:$0xff] }
   0x9   :  { %383 = vmatprep.subr.bf16.mxu1 %v409_v15  ;;  %385 = vmatprep.mubr.msk.bf16.mxu1 %vm204_vm0, %v410_v16  ;;  %v412_v22 = vld [vmem:[%s527_s0 + $0x1c] ss:$12 sps:$4 sm:$0xff]   ;;  %v414_v23 = vld [vmem:[%s527_s0 + $0x18] ss:$12 sps:$4 sm:$0xff]  }
   0xb   :  { %354 = vmatpush3.bf16.msra.mxu0 %v394_v5  ;;  %384 = vmatpush3.bf16.msra.mxu1 %v409_v15 }
   0xc   :  { %355 = vmatprep.subr.bf16.mxu0 %v395_v6 }
   0xe   :  { %386 = vmatmul.mubr.msk.bf16.vlgmr.msra.gmra.mrb[0].mxu1 %vm204_vm0, %v411_v17 }
   0xf   :  { %356 = vmatpush3.bf16.msra.mxu0 %v396_v7 }
  0x10   :  { %357 = vmatprep.subr.bf16.mxu0 %v397_v8 }
  0x13   :  { %358 = vmatpush3.bf16.msra.mxu0 %v398_v9 }
  0x14   :  { %359 = vmatprep.subr.bf16.mxu0 %v399_v11 }
  0x17   :  { %360 = vmatpush3.bf16.msra.mxu0 %v400_v12 }
  0x18   :  { %361 = vmatprep.subr.bf16.mxu0 %v401_v13 }
  0x1b   :  { %362 = vmatpush3.bf16.msra.mxu0 %v402_v18 }
  0x1c   :  { %363 = vmatprep.subr.bf16.mxu0 %v403_v19 }
  0x1f   :  { %364 = vmatpush3.bf16.msra.mxu0 %v405_v20 }
  0x22   :  { %244 = vmatmul.mubr.bf16.vlgmr.msra.gmra.mrb[0].mxu0 %v406_v21 }
  0x23   :  { %251 = vmatprep.mubr.bf16.mxu0 %v412_v22 }
  0x2a   :  { %252 = vmatmul.mubr.bf16.gmra.mrb[4].mxu0 %v414_v23 }
  0xe1   :  { %v387_v24 = vpop.f32.mrb[0].mxu1 }
  0xe2   :  { %v294_v25 = vpop.f32.mrb[1].mxu1 }
  0xe3   :  { %v388_v26 = vpop.f32.mrb[2].mxu1 }
  0xe4   :  { %v297_v27 = vpop.f32.mrb[3].mxu1 }
  0xf5   :  { %v365_v28 = vpop.f32.mrb[0].mxu0 }
  0xf6   :  { %v366_v29 = vpop.f32.mrb[1].mxu0 }
  0xf7   :  { %v367_v31 = vadd.f32 %v366_v29, %v365_v28  ;;  %v368_v32 = vpop.f32.mrb[2].mxu0 }
  0xf8   :  { %v369_v33 = vpop.f32.mrb[3].mxu0 }
  0xf9   :  { %v370_v34 = vadd.f32 %v369_v33, %v368_v32  ;;  %v246_v35 = vadd.f32 %v367_v31, %v322_v30 }
  0xfb   :  { %v295_v36 = vadd.f32 %v294_v25, %v246_v35  ;;  %v249_v37 = vadd.f32 %v370_v34, %v322_v30 }
  0xfd   :  { %v309_v38 = vmax.f32 %v295_v36, 0.0  ;;  %v298_v39 = vadd.f32 %v297_v27, %v249_v37  ;;  %v371_v40 = vpop.f32.mrb[4].mxu0 }
  0xfe   :  { %v372_v41 = vpop.f32.mrb[5].mxu0 }
  0xff   :  { %314 = vst.msk [vmem:[%s529_s3] sm:$0xff] %vm313_vm1, %v309_v38  ;;  %v310_v42 = vmax.f32 %v298_v39, 0.0  ;;  %v373_v43 = vadd.f32 %v372_v41, %v371_v40  ;;  %v374_v44 = vpop.f32.mrb[6].mxu0 }
 0x100   :  { %v375_v45 = vpop.f32.mrb[7].mxu0 }
 0x101   :  { %315 = vst.msk [vmem:[%s529_s3 + $0x8] sm:$0xff] %vm313_vm1, %v310_v42  ;;  %v254_v46 = vadd.f32 %v373_v43, %v322_v30  ;;  %v376_v47 = vadd.f32 %v375_v45, %v374_v44 }
 0x103   :  { %v303_v48 = vadd.f32 %v387_v24, %v254_v46  ;;  %v257_v49 = vadd.f32 %v376_v47, %v322_v30 }
 0x105   :  { %v311_v50 = vmax.f32 %v303_v48, 0.0  ;;  %v306_v51 = vadd.f32 %v388_v26, %v257_v49 }
 0x107   :  { %316 = vst.msk [vmem:[%s529_s3 + $0x10] sm:$0xff] %vm313_vm1, %v311_v50  ;;  %v312_v52 = vmax.f32 %v306_v51, 0.0 }
 0x109   :  { %317 = vst.msk [vmem:[%s529_s3 + $0x18] sm:$0xff] %vm313_vm1, %v312_v52 }

// kernel: simclr_forward.25
= control target key start
LH: loop header
LB: loop body
LE: loop exit
PB: predicated region body
PF: predicated region fallthrough
CT: control target
= control target key end

     0   :  { %vm372_vm0 = vcmask 523264   ;;  %s890_s1 = inlined_call_operand.vmem [shape: bf16[576,64], index: 1, kind: input, shape index: {}]   ;;  %s891_s0 = inlined_call_operand.vmem [shape: bf16[32,576], index: 0, kind: input, shape index: {}]   ;;  %s892_s2 = inlined_call_operand.vmem [shape: f32[1,64], index: 2, kind: input, shape index: {}]   ;;  %s893_s3 = inlined_call_operand.vmem [shape: f32[32,64], index: 3, kind: output, shape index: {}]  }
   0x1   :  { %v661_v0 = vld [vmem:[%s890_s1 + $0x40] sm:$0xff]   ;;  %v665_v4 = vld [vmem:[%s890_s1 + $0x48] sm:$0xff]   ;;  %v669_v8 = vld [vmem:[%s890_s1 + $0x50] sm:$0xff]  }
   0x2   :  { %v662_v1 = vld [vmem:[%s890_s1] sm:$0xff]   ;;  %587 = vmatprep.subr.bf16.mxu0 %v661_v0  ;;  %v666_v5 = vld [vmem:[%s890_s1 + $0x8] sm:$0xff]   ;;  %v670_v9 = vld [vmem:[%s890_s1 + $0x10] sm:$0xff]  }
   0x3   :  { %v663_v2 = vld [vmem:[%s890_s1 + $0xc0] sm:$0xff]   ;;  %588 = vmatpush3.bf16.msra.mxu0 %v662_v1  ;;  %v667_v6 = vld [vmem:[%s890_s1 + $0xc8] sm:$0xff]   ;;  %v671_v10 = vld [vmem:[%s890_s1 + $0xd0] sm:$0xff]  }
   0x4   :  { %v664_v3 = vld [vmem:[%s890_s1 + $0x80] sm:$0xff]   ;;  %615 = vmatprep.subr.bf16.mxu1 %v663_v2  ;;  %589 = vmatprep.subr.bf16.mxu0 %v665_v4  ;;  %v668_v7 = vld [vmem:[%s890_s1 + $0x88] sm:$0xff]   ;;  %v672_v11 = vld [vmem:[%s890_s1 + $0x90] sm:$0xff]  }
   0x5   :  { %616 = vmatpush3.bf16.msra.mxu1 %v664_v3  ;;  %v673_v12 = vld [vmem:[%s890_s1 + $0x58] sm:$0xff]   ;;  %v677_v16 = vld [vmem:[%s890_s1 + $0x60] sm:$0xff]   ;;  %v681_v20 = vld [vmem:[%s890_s1 + $0x68] sm:$0xff]  }
   0x6   :  { %617 = vmatprep.subr.bf16.mxu1 %v667_v6  ;;  %v674_v13 = vld [vmem:[%s890_s1 + $0x18] sm:$0xff]   ;;  %v678_v17 = vld [vmem:[%s890_s1 + $0x20] sm:$0xff]   ;;  %v682_v21 = vld [vmem:[%s890_s1 + $0x28] sm:$0xff]  }
   0x7   :  { %590 = vmatpush3.bf16.msra.mxu0 %v666_v5  ;;  %v675_v14 = vld [vmem:[%s890_s1 + $0xd8] sm:$0xff]   ;;  %v679_v18 = vld [vmem:[%s890_s1 + $0xe0] sm:$0xff]   ;;  %v683_v22 = vld [vmem:[%s890_s1 + $0xe8] sm:$0xff]  }
   0x8   :  { %591 = vmatprep.subr.bf16.mxu0 %v669_v8  ;;  %v676_v15 = vld [vmem:[%s890_s1 + $0x98] sm:$0xff]   ;;  %v680_v19 = vld [vmem:[%s890_s1 + $0xa0] sm:$0xff]   ;;  %v684_v23 = vld [vmem:[%s890_s1 + $0xa8] sm:$0xff]  }
   0x9   :  { %618 = vmatpush3.bf16.msra.mxu1 %v668_v7  ;;  %v685_v24 = vld [vmem:[%s890_s1 + $0x70] sm:$0xff]   ;;  %v689_v28 = vld [vmem:[%s890_s1 + $0x78] sm:$0xff]   ;;  %v696_v34 = vld [vmem:[%s890_s1 + $0x100] sm:$0xff]  }
   0xa   :  { %619 = vmatprep.subr.bf16.mxu1 %v671_v10  ;;  %v686_v25 = vld [vmem:[%s890_s1 + $0x30] sm:$0xff]   ;;  %v690_v29 = vld [vmem:[%s890_s1 + $0x38] sm:$0xff]   ;;  %v699_v36 = vld [vmem:[%s891_s0 + $0xc] ss:$20 sps:$4 sm:$0xff]  }
   0xb   :  { %592 = vmatpush3.bf16.msra.mxu0 %v670_v9  ;;  %v687_v26 = vld [vmem:[%s890_s1 + $0xf0] sm:$0xff]   ;;  %v691_v30 = vld [vmem:[%s890_s1 + $0xf8] sm:$0xff]   ;;  %v700_v37 = vld [vmem:[%s890_s1 + $0x108] sm:$0xff]   ;;  %460 = vmatprep.mubr.bf16.mxu1 %v699_v36 }
   0xc   :  { %593 = vmatprep.subr.bf16.mxu0 %v673_v12  ;;  %v688_v27 = vld [vmem:[%s890_s1 + $0xb0] sm:$0xff]   ;;  %v694_v32 = vld [vmem:[%s891_s0 + $0x4] ss:$20 sps:$4 sm:$0xff]   ;;  %v697_v35 = vld [vmem:[%s891_s0 + $0x8] ss:$20 sps:$4 sm:$0xff]  }
   0xd   :  { %620 = vmatpush3.bf16.msra.mxu1 %v672_v11  ;;  %v692_v31 = vld [vmem:[%s891_s0] ss:$20 sps:$4 sm:$0xff]   ;;  %v695_v33 = vld [vmem:[%s890_s1 + $0xb8] sm:$0xff]   ;;  %411 = vmatprep.mubr.bf16.mxu0 %v694_v32  ;;  %v707_v42 = vld [vmem:[%s891_s0 + $0x30] ss:$20 sps:$4 sm:$0xff]  }
   0xe   :  { %621 = vmatprep.subr.bf16.mxu1 %v675_v14  ;;  %v701_v38 = vld [vmem:[%s891_s0 + $0x2c] ss:$20 sps:$4 sm:$0xff]   ;;  %v703_v39 = vld [vmem:[%s891_s0 + $0x28] ss:$20 sps:$4 sm:$0xff]   ;;  %v704_v40 = vld [vmem:[%s890_s1 + $0x110] sm:$0xff]  }
   0xf   :  { %594 = vmatpush3.bf16.msra.mxu0 %v674_v13  ;;  %v705_v41 = vld [vmem:[%s891_s0 + $0x34] ss:$20 sps:$4 sm:$0xff]   ;;  %v708_v43 = vld [vmem:[%s890_s1 + $0x118] sm:$0xff]   ;;  %v709_v44 = vld [vmem:[%s891_s0 + $0x10] ss:$20 sps:$4 sm:$0xff]  }
  0x10   :  { %595 = vmatprep.subr.bf16.mxu0 %v677_v16  ;;  %v710_v45 = vld [vmem:[%s891_s0 + $0x38] ss:$20 sps:$4 sm:$0xff]   ;;  %v538_v47 = vld [vmem:[%s892_s2] ss:$0 sm:$0xff] }
  0x11   :  { %622 = vmatpush3.bf16.msra.mxu1 %v676_v15 }
  0x12   :  { %623 = vmatprep.subr.bf16.mxu1 %v679_v18 }
  0x13   :  { %596 = vmatpush3.bf16.msra.mxu0 %v678_v17 }
  0x14   :  { %597 = vmatprep.subr.bf16.mxu0 %v681_v20 }
  0x15   :  { %624 = vmatpush3.bf16.msra.mxu1 %v680_v19 }
  0x16   :  { %625 = vmatprep.subr.bf16.mxu1 %v683_v22 }
  0x17   :  { %598 = vmatpush3.bf16.msra.mxu0 %v682_v21 }
  0x18   :  { %599 = vmatprep.subr.bf16.mxu0 %v685_v24 }
  0x19   :  { %626 = vmatpush3.bf16.msra.mxu1 %v684_v23 }
  0x1a   :  { %627 = vmatprep.subr.bf16.mxu1 %v687_v26 }
  0x1b   :  { %600 = vmatpush3.bf16.msra.mxu0 %v686_v25 }
  0x1c   :  { %601 = vmatprep.subr.bf16.mxu0 %v689_v28 }
  0x1d   :  { %628 = vmatpush3.bf16.msra.mxu1 %v688_v27 }
  0x1e   :  { %629 = vmatprep.subr.bf16.mxu1 %v691_v30 }
  0x1f   :  { %602 = vmatpush3.bf16.msra.mxu0 %v690_v29 }
  0x20   :  { %649 = vmatprep.subr.bf16.mxu0 %v696_v34 }
  0x21   :  { %630 = vmatpush3.bf16.msra.mxu1 %v695_v33 }
  0x22   :  { %412 = vmatmul.mubr.bf16.vlgmr.msra.gmra.mrb[0].mxu0 %v692_v31 }
  0x23   :  { %650 = vmatpush3.bf16.msra.mxu0 %v696_v34  ;;  %419 = vmatprep.mubr.bf16.mxu0 %v701_v38 }
  0x24   :  { %461 = vmatmul.mubr.bf16.vlgmr.msra.gmra.mrb[0].mxu1 %v697_v35  ;;  %651 = vmatprep.subr.bf16.mxu0 %v700_v37 }
  0x25   :  { %468 = vmatprep.mubr.bf16.mxu1 %v705_v41 }
  0x27   :  { %652 = vmatpush3.bf16.msra.mxu0 %v700_v37 }
  0x28   :  { %653 = vmatprep.subr.bf16.mxu0 %v704_v40 }
  0x2a   :  { %420 = vmatmul.mubr.bf16.gmra.mrb[4].mxu0 %v703_v39 }
  0x2b   :  { %657 = vmatprep.mubr.msk.bf16.mxu0 %vm372_vm0, %v709_v44  ;;  %654 = vmatpush3.bf16.msra.mxu0 %v704_v40 }
  0x2c   :  { %469 = vmatmul.mubr.bf16.gmra.mrb[4].mxu1 %v707_v42  ;;  %655 = vmatprep.subr.bf16.mxu0 %v708_v43 }
  0x2f   :  { %656 = vmatpush3.bf16.msra.mxu0 %v708_v43 }
  0x32   :  { %658 = vmatmul.mubr.msk.bf16.vlgmr.msra.gmra.mrb[8].mxu0 %vm372_vm0, %v710_v45 }
  0xf5   :  { %v603_v46 = vpop.f32.mrb[0].mxu0 }
  0xf6   :  { %v604_v48 = vpop.f32.mrb[1].mxu0 }
  0xf7   :  { %v605_v49 = vadd.f32 %v604_v48, %v603_v46  ;;  %v606_v50 = vpop.f32.mrb[2].mxu0  ;;  %v631_v51 = vpop.f32.mrb[0].mxu1 }
  0xf8   :  { %v607_v52 = vpop.f32.mrb[3].mxu0  ;;  %v632_v55 = vpop.f32.mrb[1].mxu1 }
  0xf9   :  { %v414_v53 = vadd.f32 %v605_v49, %v538_v47  ;;  %v608_v54 = vadd.f32 %v607_v52, %v606_v50  ;;  %v633_v56 = vadd.f32 %v632_v55, %v631_v51  ;;  %v634_v57 = vpop.f32.mrb[2].mxu1 }
  0xfa   :  { %v635_v59 = vpop.f32.mrb[3].mxu1 }
  0xfb   :  { %v417_v58 = vadd.f32 %v608_v54, %v538_v47  ;;  %v636_v60 = vadd.f32 %v635_v59, %v634_v57  ;;  %v463_v61 = vadd.f32 %v633_v56, %v414_v53 }
  0xfd   :  { %v609_v62 = vpop.f32.mrb[4].mxu0  ;;  %v466_v0 = vadd.f32 %v636_v60, %v417_v58 }
  0xfe   :  { %v610_v63 = vpop.f32.mrb[5].mxu0 }
  0xff   :  { %v611_v1 = vadd.f32 %v610_v63, %v609_v62  ;;  %v612_v2 = vpop.f32.mrb[6].mxu0  ;;  %v637_v3 = vpop.f32.mrb[4].mxu1 }
 0x100   :  { %v613_v4 = vpop.f32.mrb[7].mxu0  ;;  %v638_v7 = vpop.f32.mrb[5].mxu1 }
 0x101   :  { %v422_v5 = vadd.f32 %v611_v1, %v538_v47  ;;  %v614_v6 = vadd.f32 %v613_v4, %v612_v2  ;;  %v639_v8 = vadd.f32 %v638_v7, %v637_v3  ;;  %v640_v9 = vpop.f32.mrb[6].mxu1 }
 0x102   :  { %v641_v11 = vpop.f32.mrb[7].mxu1 }
 0x103   :  { %v425_v10 = vadd.f32 %v614_v6, %v538_v47  ;;  %v642_v12 = vadd.f32 %v641_v11, %v640_v9  ;;  %v471_v13 = vadd.f32 %v639_v8, %v422_v5 }
 0x105   :  { %v659_v14 = vpop.f32.mrb[8].mxu0  ;;  %v474_v15 = vadd.f32 %v642_v12, %v425_v10 }
 0x106   :  { %v520_v16 = vadd.f32 %v659_v14, %v471_v13  ;;  %v511_v17 = vpop.f32.mrb[9].mxu0 }
 0x107   :  { %v512_v18 = vadd.f32 %v511_v17, %v463_v61  ;;  %v660_v19 = vpop.f32.mrb[10].mxu0 }
 0x108   :  { %v528_v20 = vmax.f32 %v520_v16, 0.0  ;;  %v523_v21 = vadd.f32 %v660_v19, %v474_v15  ;;  %v514_v22 = vpop.f32.mrb[11].mxu0 }
 0x109   :  { %v526_v23 = vmax.f32 %v512_v18, 0.0  ;;  %v515_v24 = vadd.f32 %v514_v22, %v466_v0 }
 0x10a   :  { %532 = vst.msk [vmem:[%s893_s3 + $0x10] sm:$0xff] %vm372_vm0, %v528_v20  ;;  %v529_v25 = vmax.f32 %v523_v21, 0.0 }
 0x10b   :  { %530 = vst.msk [vmem:[%s893_s3] sm:$0xff] %vm372_vm0, %v526_v23  ;;  %v527_v26 = vmax.f32 %v515_v24, 0.0 }
 0x10c   :  { %533 = vst.msk [vmem:[%s893_s3 + $0x18] sm:$0xff] %vm372_vm0, %v529_v25 }
 0x10d   :  { %531 = vst.msk [vmem:[%s893_s3 + $0x8] sm:$0xff] %vm372_vm0, %v527_v26 }

// kernel: simclr_forward.24
= control target key start
LH: loop header
LB: loop body
LE: loop exit
PB: predicated region body
PF: predicated region fallthrough
CT: control target
= control target key end

     0   :  { %vm375_vm0 = vcmask 523264   ;;  %s918_s1 = inlined_call_operand.vmem [shape: bf16[576,64], index: 1, kind: input, shape index: {}]   ;;  %s919_s0 = inlined_call_operand.vmem [shape: bf16[32,576], index: 0, kind: input, shape index: {}]   ;;  %s920_s2 = inlined_call_operand.vmem [shape: f32[1,64], index: 2, kind: input, shape index: {}]   ;;  %s921_s3 = inlined_call_operand.vmem [shape: f32[32,64], index: 3, kind: input, shape index: {}]   ;;  %s922_s4 = inlined_call_operand.vmem [shape: f32[32,64], index: 4, kind: output, shape index: {}]  }
   0x1   :  { %v672_v0 = vld [vmem:[%s918_s1 + $0x40] sm:$0xff]   ;;  %v676_v4 = vld [vmem:[%s918_s1 + $0x48] sm:$0xff]   ;;  %v680_v8 = vld [vmem:[%s918_s1 + $0x50] sm:$0xff]  }
   0x2   :  { %v673_v1 = vld [vmem:[%s918_s1] sm:$0xff]   ;;  %598 = vmatprep.subr.bf16.mxu0 %v672_v0  ;;  %v677_v5 = vld [vmem:[%s918_s1 + $0x8] sm:$0xff]   ;;  %v681_v9 = vld [vmem:[%s918_s1 + $0x10] sm:$0xff]  }
   0x3   :  { %v674_v2 = vld [vmem:[%s918_s1 + $0xc0] sm:$0xff]   ;;  %599 = vmatpush3.bf16.msra.mxu0 %v673_v1  ;;  %v678_v6 = vld [vmem:[%s918_s1 + $0xc8] sm:$0xff]   ;;  %v682_v10 = vld [vmem:[%s918_s1 + $0xd0] sm:$0xff]  }
   0x4   :  { %v675_v3 = vld [vmem:[%s918_s1 + $0x80] sm:$0xff]   ;;  %626 = vmatprep.subr.bf16.mxu1 %v674_v2  ;;  %600 = vmatprep.subr.bf16.mxu0 %v676_v4  ;;  %v679_v7 = vld [vmem:[%s918_s1 + $0x88] sm:$0xff]   ;;  %v683_v11 = vld [vmem:[%s918_s1 + $0x90] sm:$0xff]  }
   0x5   :  { %627 = vmatpush3.bf16.msra.mxu1 %v675_v3  ;;  %v684_v12 = vld [vmem:[%s918_s1 + $0x58] sm:$0xff]   ;;  %v688_v16 = vld [vmem:[%s918_s1 + $0x60] sm:$0xff]   ;;  %v692_v20 = vld [vmem:[%s918_s1 + $0x68] sm:$0xff]  }
   0x6   :  { %628 = vmatprep.subr.bf16.mxu1 %v678_v6  ;;  %v685_v13 = vld [vmem:[%s918_s1 + $0x18] sm:$0xff]   ;;  %v689_v17 = vld [vmem:[%s918_s1 + $0x20] sm:$0xff]   ;;  %v693_v21 = vld [vmem:[%s918_s1 + $0x28] sm:$0xff]  }
   0x7   :  { %601 = vmatpush3.bf16.msra.mxu0 %v677_v5  ;;  %v686_v14 = vld [vmem:[%s918_s1 + $0xd8] sm:$0xff]   ;;  %v690_v18 = vld [vmem:[%s918_s1 + $0xe0] sm:$0xff]   ;;  %v694_v22 = vld [vmem:[%s918_s1 + $0xe8] sm:$0xff]  }
   0x8   :  { %602 = vmatprep.subr.bf16.mxu0 %v680_v8  ;;  %v687_v15 = vld [vmem:[%s918_s1 + $0x98] sm:$0xff]   ;;  %v691_v19 = vld [vmem:[%s918_s1 + $0xa0] sm:$0xff]   ;;  %v695_v23 = vld [vmem:[%s918_s1 + $0xa8] sm:$0xff]  }
   0x9   :  { %629 = vmatpush3.bf16.msra.mxu1 %v679_v7  ;;  %v696_v24 = vld [vmem:[%s918_s1 + $0x70] sm:$0xff]   ;;  %v700_v28 = vld [vmem:[%s918_s1 + $0x78] sm:$0xff]   ;;  %v707_v34 = vld [vmem:[%s918_s1 + $0x100] sm:$0xff]  }
   0xa   :  { %630 = vmatprep.subr.bf16.mxu1 %v682_v10  ;;  %v697_v25 = vld [vmem:[%s918_s1 + $0x30] sm:$0xff]   ;;  %v701_v29 = vld [vmem:[%s918_s1 + $0x38] sm:$0xff]   ;;  %v710_v36 = vld [vmem:[%s919_s0 + $0xc] ss:$20 sps:$4 sm:$0xff]  }
   0xb   :  { %603 = vmatpush3.bf16.msra.mxu0 %v681_v9  ;;  %v698_v26 = vld [vmem:[%s918_s1 + $0xf0] sm:$0xff]   ;;  %v702_v30 = vld [vmem:[%s918_s1 + $0xf8] sm:$0xff]   ;;  %v711_v37 = vld [vmem:[%s918_s1 + $0x108] sm:$0xff]   ;;  %463 = vmatprep.mubr.bf16.mxu1 %v710_v36 }
   0xc   :  { %604 = vmatprep.subr.bf16.mxu0 %v684_v12  ;;  %v699_v27 = vld [vmem:[%s918_s1 + $0xb0] sm:$0xff]   ;;  %v705_v32 = vld [vmem:[%s919_s0 + $0x4] ss:$20 sps:$4 sm:$0xff]   ;;  %v708_v35 = vld [vmem:[%s919_s0 + $0x8] ss:$20 sps:$4 sm:$0xff]  }
   0xd   :  { %631 = vmatpush3.bf16.msra.mxu1 %v683_v11  ;;  %v703_v31 = vld [vmem:[%s919_s0] ss:$20 sps:$4 sm:$0xff]   ;;  %v706_v33 = vld [vmem:[%s918_s1 + $0xb8] sm:$0xff]   ;;  %414 = vmatprep.mubr.bf16.mxu0 %v705_v32  ;;  %v718_v42 = vld [vmem:[%s919_s0 + $0x30] ss:$20 sps:$4 sm:$0xff]  }
   0xe   :  { %632 = vmatprep.subr.bf16.mxu1 %v686_v14  ;;  %v712_v38 = vld [vmem:[%s919_s0 + $0x2c] ss:$20 sps:$4 sm:$0xff]   ;;  %v714_v39 = vld [vmem:[%s919_s0 + $0x28] ss:$20 sps:$4 sm:$0xff]   ;;  %v715_v40 = vld [vmem:[%s918_s1 + $0x110] sm:$0xff]  }
   0xf   :  { %605 = vmatpush3.bf16.msra.mxu0 %v685_v13  ;;  %v716_v41 = vld [vmem:[%s919_s0 + $0x34] ss:$20 sps:$4 sm:$0xff]   ;;  %v719_v43 = vld [vmem:[%s918_s1 + $0x118] sm:$0xff]   ;;  %v720_v44 = vld [vmem:[%s919_s0 + $0x10] ss:$20 sps:$4 sm:$0xff]  }
  0x10   :  { %606 = vmatprep.subr.bf16.mxu0 %v688_v16  ;;  %v721_v45 = vld [vmem:[%s919_s0 + $0x38] ss:$20 sps:$4 sm:$0xff]   ;;  %v549_v47 = vld [vmem:[%s920_s2] ss:$0 sm:$0xff] }
  0x11   :  { %633 = vmatpush3.bf16.msra.mxu1 %v687_v15  ;;  %v531_v15 = vld [vmem:[%s921_s3 + $0x10] sm:$0xff] }
  0x12   :  { %634 = vmatprep.subr.bf16.mxu1 %v690_v18 }
  0x13   :  { %607 = vmatpush3.bf16.msra.mxu0 %v689_v17 }
  0x14   :  { %608 = vmatprep.subr.bf16.mxu0 %v692_v20 }
  0x15   :  { %635 = vmatpush3.bf16.msra.mxu1 %v691_v19  ;;  %v529_v19 = vld [vmem:[%s921_s3] sm:$0xff] }
  0x16   :  { %636 = vmatprep.subr.bf16.mxu1 %v694_v22  ;;  %v532_v22 = vld [vmem:[%s921_s3 + $0x18] sm:$0xff] }
  0x17   :  { %609 = vmatpush3.bf16.msra.mxu0 %v693_v21 }
  0x18   :  { %610 = vmatprep.subr.bf16.mxu0 %v696_v24 }
  0x19   :  { %637 = vmatpush3.bf16.msra.mxu1 %v695_v23 }
  0x1a   :  { %638 = vmatprep.subr.bf16.mxu1 %v698_v26  ;;  %v530_v26 = vld [vmem:[%s921_s3 + $0x8] sm:$0xff] }
  0x1b   :  { %611 = vmatpush3.bf16.msra.mxu0 %v697_v25 }
  0x1c   :  { %612 = vmatprep.subr.bf16.mxu0 %v700_v28 }
  0x1d   :  { %639 = vmatpush3.bf16.msra.mxu1 %v699_v27 }
  0x1e   :  { %640 = vmatprep.subr.bf16.mxu1 %v702_v30 }
  0x1f   :  { %613 = vmatpush3.bf16.msra.mxu0 %v701_v29 }
  0x20   :  { %660 = vmatprep.subr.bf16.mxu0 %v707_v34 }
  0x21   :  { %641 = vmatpush3.bf16.msra.mxu1 %v706_v33 }
  0x22   :  { %415 = vmatmul.mubr.bf16.vlgmr.msra.gmra.mrb[0].mxu0 %v703_v31 }
  0x23   :  { %661 = vmatpush3.bf16.msra.mxu0 %v707_v34  ;;  %422 = vmatprep.mubr.bf16.mxu0 %v712_v38 }
  0x24   :  { %464 = vmatmul.mubr.bf16.vlgmr.msra.gmra.mrb[0].mxu1 %v708_v35  ;;  %662 = vmatprep.subr.bf16.mxu0 %v711_v37 }
  0x25   :  { %471 = vmatprep.mubr.bf16.mxu1 %v716_v41 }
  0x27   :  { %663 = vmatpush3.bf16.msra.mxu0 %v711_v37 }
  0x28   :  { %664 = vmatprep.subr.bf16.mxu0 %v715_v40 }
  0x2a   :  { %423 = vmatmul.mubr.bf16.gmra.mrb[4].mxu0 %v714_v39 }
  0x2b   :  { %668 = vmatprep.mubr.msk.bf16.mxu0 %vm375_vm0, %v720_v44  ;;  %665 = vmatpush3.bf16.msra.mxu0 %v715_v40 }
  0x2c   :  { %472 = vmatmul.mubr.bf16.gmra.mrb[4].mxu1 %v718_v42  ;;  %666 = vmatprep.subr.bf16.mxu0 %v719_v43 }
  0x2f   :  { %667 = vmatpush3.bf16.msra.mxu0 %v719_v43 }
  0x32   :  { %669 = vmatmul.mubr.msk.bf16.vlgmr.msra.gmra.mrb[8].mxu0 %vm375_vm0, %v721_v45 }
  0xf5   :  { %v614_v46 = vpop.f32.mrb[0].mxu0 }
  0xf6   :  { %v615_v48 = vpop.f32.mrb[1].mxu0 }
  0xf7   :  { %v616_v49 = vadd.f32 %v615_v48, %v614_v46  ;;  %v617_v50 = vpop.f32.mrb[2].mxu0  ;;  %v642_v51 = vpop.f32.mrb[0].mxu1 }
  0xf8   :  { %v618_v52 = vpop.f32.mrb[3].mxu0  ;;  %v643_v55 = vpop.f32.mrb[1].mxu1 }
  0xf9   :  { %v417_v53 = vadd.f32 %v616_v49, %v549_v47  ;;  %v619_v54 = vadd.f32 %v618_v52, %v617_v50  ;;  %v644_v56 = vadd.f32 %v643_v55, %v642_v51  ;;  %v645_v57 = vpop.f32.mrb[2].mxu1 }
  0xfa   :  { %v646_v59 = vpop.f32.mrb[3].mxu1 }
  0xfb   :  { %v420_v58 = vadd.f32 %v619_v54, %v549_v47  ;;  %v647_v60 = vadd.f32 %v646_v59, %v645_v57  ;;  %v466_v61 = vadd.f32 %v644_v56, %v417_v53 }
  0xfd   :  { %v620_v62 = vpop.f32.mrb[4].mxu0  ;;  %v469_v0 = vadd.f32 %v647_v60, %v420_v58 }
  0xfe   :  { %v621_v63 = vpop.f32.mrb[5].mxu0 }
  0xff   :  { %v622_v1 = vadd.f32 %v621_v63, %v620_v62  ;;  %v623_v2 = vpop.f32.mrb[6].mxu0  ;;  %v648_v3 = vpop.f32.mrb[4].mxu1 }
 0x100   :  { %v624_v4 = vpop.f32.mrb[7].mxu0  ;;  %v649_v7 = vpop.f32.mrb[5].mxu1 }
 0x101   :  { %v425_v5 = vadd.f32 %v622_v1, %v549_v47  ;;  %v625_v6 = vadd.f32 %v624_v4, %v623_v2  ;;  %v650_v8 = vadd.f32 %v649_v7, %v648_v3  ;;  %v651_v9 = vpop.f32.mrb[6].mxu1 }
 0x102   :  { %v652_v11 = vpop.f32.mrb[7].mxu1 }
 0x103   :  { %v428_v10 = vadd.f32 %v625_v6, %v549_v47  ;;  %v653_v12 = vadd.f32 %v652_v11, %v651_v9  ;;  %v474_v13 = vadd.f32 %v650_v8, %v425_v5 }
 0x105   :  { %v670_v14 = vpop.f32.mrb[8].mxu0  ;;  %v477_v16 = vadd.f32 %v653_v12, %v428_v10 }
 0x106   :  { %v523_v17 = vadd.f32 %v670_v14, %v474_v13  ;;  %v514_v18 = vpop.f32.mrb[9].mxu0 }
 0x107   :  { %v515_v20 = vadd.f32 %v514_v18, %v466_v61  ;;  %v671_v21 = vpop.f32.mrb[10].mxu0 }
 0x108   :  { %v535_v23 = vadd.f32 %v531_v15, %v523_v17  ;;  %v526_v24 = vadd.f32 %v671_v21, %v477_v16  ;;  %v517_v25 = vpop.f32.mrb[11].mxu0 }
 0x109   :  { %v533_v27 = vadd.f32 %v529_v19, %v515_v20  ;;  %v518_v28 = vadd.f32 %v517_v25, %v469_v0 }
 0x10a   :  { %v539_v29 = vmax.f32 %v535_v23, 0.0  ;;  %v536_v30 = vadd.f32 %v532_v22, %v526_v24 }
 0x10b   :  { %v537_v31 = vmax.f32 %v533_v27, 0.0  ;;  %v534_v32 = vadd.f32 %v530_v26, %v518_v28 }
 0x10c   :  { %543 = vst.msk [vmem:[%s922_s4 + $0x10] sm:$0xff] %vm375_vm0, %v539_v29  ;;  %v540_v33 = vmax.f32 %v536_v30, 0.0 }
 0x10d   :  { %541 = vst.msk [vmem:[%s922_s4] sm:$0xff] %vm375_vm0, %v537_v31  ;;  %v538_v34 = vmax.f32 %v534_v32, 0.0 }
 0x10e   :  { %544 = vst.msk [vmem:[%s922_s4 + $0x18] sm:$0xff] %vm375_vm0, %v540_v33 }
 0x10f   :  { %542 = vst.msk [vmem:[%s922_s4 + $0x8] sm:$0xff] %vm375_vm0, %v538_v34 }

// kernel: simclr_forward.27
= control target key start
LH: loop header
LB: loop body
LE: loop exit
PB: predicated region body
PF: predicated region fallthrough
CT: control target
= control target key end

     0   :  { %v384_v0 = vmov 0.0|0.0   ;;  %vm385_vm0 = vmmov 0   ;;  %v386_v4 = vmov 0.0   ;;  %vm42_vm1 = vcmask 523264   ;;  %s490_s1 = inlined_call_operand.vmem [shape: f32[64,32], index: 1, kind: input, shape index: {}]   ;;  %s491_s3 = inlined_call_operand.vmem [shape: f32[32,16], index: 3, kind: input, shape index: {}]   ;;  %s492_s0 = inlined_call_operand.vmem [shape: f32[8,64], index: 0, kind: input, shape index: {}]   ;;  %s493_s2 = inlined_call_operand.vmem [shape: f32[1,32], index: 2, kind: input, shape index: {}]   ;;  %s494_s5 = inlined_call_operand.vmem [shape: f32[16,16], index: 5, kind: input, shape index: {}]   ;;  %s495_s4 = inlined_call_operand.vmem [shape: f32[1,16], index: 4, kind: input, shape index: {}]   ;;  %s496_s6 = inlined_call_operand.vmem [shape: f32[1,16], index: 6, kind: input, shape index: {}]   ;;  %s497_s7 = inlined_call_operand.vmem [shape: f32[8,16], index: 7, kind: output, shape index: {}]  }
   0x1   :  { %358 = vmatprep.subr.bf16.mxu0 %v384_v0  ;;  %v27_v1 = vld [vmem:[%s490_s1] sm:$0xff]  ;;  %v28_v2 = vld [vmem:[%s490_s1 + $0x8] sm:$0xff]  ;;  %v29_v3 = vld [vmem:[%s490_s1 + $0x10] sm:$0xff]  ;;  %337 = vmatprep.mubr.msk.f32.mxu0 %vm385_vm0, %v386_v4  ;;  %vm127_vm2 = vcmask 261120   ;;  %vm211_vm3 = vcmask 130048  }
   0x2   :  { %v359_v5 = vpack.c.bf16 %v28_v2, %v27_v1  ;;  %v30_v6 = vld [vmem:[%s490_s1 + $0x18] sm:$0xff]  ;;  %370 = vmatprep.subr.bf16.mxu1 %v384_v0  ;;  %348 = vmatprep.mubr.msk.f32.mxu1 %vm385_vm0, %v386_v4  ;;  %v116_v8 = vld [vmem:[%s491_s3] sm:$0xff]  ;;  %v117_v9 = vld [vmem:[%s491_s3 + $0x8] sm:$0xff] }
   0x3   :  { %v362_v7 = vpack.c.bf16 %v30_v6, %v29_v3  ;;  %v31_v10 = vld [vmem:[%s490_s1 + $0x20] sm:$0xff]  ;;  %v32_v11 = vld [vmem:[%s490_s1 + $0x28] sm:$0xff]  ;;  %v371_v12 = vpack.c.bf16 %v117_v9, %v116_v8  ;;  %v33_v14 = vld [vmem:[%s490_s1 + $0x30] sm:$0xff] }
   0x4   :  { %360 = vmatpush3.bf16.msra.mxu0 %v359_v5  ;;  %v365_v13 = vpack.c.bf16 %v32_v11, %v31_v10  ;;  %v34_v15 = vld [vmem:[%s490_s1 + $0x38] sm:$0xff]  ;;  %v26_v17 = vld [vmem:[%s492_s0] sm:$0xff]  ;;  %v118_v18 = vld [vmem:[%s491_s3 + $0x10] sm:$0xff] }
   0x5   :  { %361 = vmatprep.subr.bf16.mxu0 %v384_v0  ;;  %372 = vmatpush3.bf16.msra.mxu1 %v371_v12  ;;  %v368_v16 = vpack.c.bf16 %v34_v15, %v33_v14  ;;  %v119_v19 = vld [vmem:[%s491_s3 + $0x18] sm:$0xff]  ;;  %v298_v21 = vld [vmem:[%s493_s2] ss:$0 sm:$0xff]  ;;  %v203_v26 = vld [vmem:[%s494_s5 + $0x8] sm:$0xff] }
   0x6   :  { %373 = vmatprep.subr.bf16.mxu1 %v384_v0  ;;  %v374_v20 = vpack.c.bf16 %v119_v19, %v118_v18  ;;  %v202_v25 = vld [vmem:[%s494_s5] sm:$0xff] }
   0x7   :  { %v377_v27 = vpack.c.bf16 %v203_v26, %v202_v25  ;;  %v300_v28 = vld [vmem:[%s495_s4] ss:$0 sm:$0xff] }
   0x8   :  { %363 = vmatpush3.bf16.msra.mxu0 %v362_v7  ;;  %v302_v33 = vld [vmem:[%s496_s6] ss:$0 sm:$0xff] }
   0x9   :  { %364 = vmatprep.subr.bf16.mxu0 %v384_v0  ;;  %375 = vmatpush3.bf16.msra.mxu1 %v374_v20 }
   0xa   :  { %376 = vmatprep.subr.bf16.mxu1 %v384_v0 }
   0xc   :  { %366 = vmatpush3.bf16.msra.mxu0 %v365_v13 }
   0xd   :  { %367 = vmatprep.subr.bf16.mxu0 %v384_v0 }
  0x10   :  { %369 = vmatpush3.bf16.msra.mxu0 %v368_v16 }
  0x13   :  { %338 = vmatmul.mubr.msk.f32.vlgmr.msra.gmra.mrb[0].mxu0 %vm42_vm1, %v26_v17 }
  0xe6   :  { %v112_v22 = vpop.f32.mrb[0].mxu0 }
  0xe7   :  { %v113_v23 = vadd.f32 %v298_v21, %v112_v22  ;;  %v339_v24 = vpop.f32.mrb[1].mxu0 }
  0xe9   :  { %349 = vmatmul.mubr.msk.f32.vlgmr.msra.gmra.mrb[0].mxu1 %vm127_vm2, %v113_v23 }
  0xea   :  { %355 = vmatprep.mubr.msk.f32.mxu1 %vm385_vm0, %v386_v4  ;;  %378 = vmatpush3.bf16.msra.mxu1 %v377_v27 }
 0x1bc   :  { %v197_v29 = vpop.f32.mrb[0].mxu1 }
 0x1bd   :  { %v198_v30 = vadd.f32 %v300_v28, %v197_v29  ;;  %v350_v31 = vpop.f32.mrb[1].mxu1 }
 0x1bf   :  { %v201_v32 = vmax.f32 %v198_v30, 0.0 }
 0x1c1   :  { %356 = vmatmul.mubr.msk.f32.vlgmr.msra.gmra.mrb[2].mxu1 %vm211_vm3, %v201_v32 }
 0x294   :  { %v281_v34 = vpop.f32.mrb[2].mxu1 }
 0x295   :  { %v282_v35 = vadd.f32 %v302_v33, %v281_v34  ;;  %v357_v36 = vpop.f32.mrb[3].mxu1 }
 0x297   :  { %v285_v37 = vmax.f32 %v282_v35, 0.0 }
 0x299   :  { %v286_v38 = vmul.f32 %v285_v37, %v285_v37 }
 0x29b   :  { %v287_v39 = vsel %vm211_vm3, %v286_v38, 0.0 }
 0x29c   :  { %288 = vadd.xlane.f32.xlu0 %v287_v39 }
 0x329   :  { %v289_v40 = vpop.xlane.xlu0 %288 }
 0x32a   :  { %v290_v41 = vmax.f32 %v289_v40, 1e-24 }
 0x32c   :  { %382 = vrsqrt.f32 %v290_v41 }
 0x336   :  { %v383_v42 = vpop.eup %382 }
 0x337   :  { %v292_v43 = vmul.f32 %v383_v42, %v285_v37 }
 0x339   :  { %293 = vst.msk [vmem:[%s497_s7] sm:$0xff] %vm211_vm3, %v292_v43 }

</bundles_post_ra>
